<compile_context>
chip_gen: v5e
topology: v5e:2x2
jax: 0.10.0
libtpu: 0.0.40
codegen_flags: <defaults>
</compile_context>

<pallas_src>
import functools

import jax
import jax.numpy as jnp
from jax import lax
from jax.experimental import pallas as pl
from jax.experimental.pallas import tpu as pltpu

CHANNEL_N = 16
HIDDEN = 128
INPUT_CHANNELS = 3
FIRE_RATE = 0.5


# ----------------------------------------------------------------------------
# Pallas kernel: full `steps`-long NCA recurrence for one image of the batch.
# ----------------------------------------------------------------------------
def _nca_backbone_kernel(seed_ref, x_ref, wc_ref, bc_ref, fc1w_ref,
                         out_ref, xp_ref, col_ref, *, steps, fire_rate):
    _, H, W, C = x_ref.shape
    HW = H * W
    hidden = wc_ref.shape[1]
    # keep iff uniform32 > fire_rate   (== torch.rand(...) > fire_rate)
    thr = jnp.uint32(min(int(fire_rate * 4294967296.0), 4294967295))

    # Per-image seed (scalar-prefetched into SMEM), folded into the hash PRNG.
    seed_u = seed_ref[pl.program_id(0)].astype(jnp.uint32)

    # Zero the padded scratch once (borders defined before first read), then
    # place the state in the interior; it stays in VMEM for all `steps` steps.
    xp_ref[...] = jnp.zeros(xp_ref.shape, xp_ref.dtype)
    xp_ref[1:H + 1, 1:W + 1, :] = x_ref[0]

    # Loop-invariant operands hoisted out of the recurrence.
    wc = wc_ref[...]                                       # (9C, hidden) bf16
    fc1w = fc1w_ref[...]                                   # (hidden, C)  bf16
    bcb = jnp.broadcast_to(bc_ref[...], (HW, hidden))      # bias, broadcast once
    pix_u = lax.broadcasted_iota(jnp.uint32, (HW, 1), 0)   # pixel counter

    def step_fn(t, carry):
        # Refresh reflect borders (pad=1, mode="reflect"); rows first, then
        # full-height column copies fix the corners.
        xp_ref[0:1, :, :] = xp_ref[2:3, :, :]
        xp_ref[H + 1:H + 2, :, :] = xp_ref[H - 1:H, :, :]
        xp_ref[:, 0:1, :] = xp_ref[:, 2:3, :]
        xp_ref[:, W + 1:W + 2, :] = xp_ref[:, W - 1:W, :]

        # im2col: gather the 9 shifted windows into one (HW, 9C) bf16 matrix,
        # so perceive+fc0 is a single K=9C MXU contraction.
        for k in range(9):
            ki, kj = divmod(k, 3)
            patch = xp_ref[ki:ki + H, kj:kj + W, :].reshape(HW, C)
            col_ref[:, k * C:(k + 1) * C] = patch.astype(jnp.bfloat16)

        h = jnp.dot(col_ref[...], wc, preferred_element_type=jnp.float32)
        h = jnp.maximum(h + bcb, 0.0)
        d = jnp.dot(h.astype(jnp.bfloat16), fc1w,
                    preferred_element_type=jnp.float32)              # (HW, C)

        # Stochastic per-pixel fire mask in matmul layout (HW, 1), produced by
        # a counter-based uint32 hash (portable: no pltpu.prng_* needed).
        v = (seed_u + pix_u * jnp.uint32(0x9E3779B9)
             + t.astype(jnp.uint32) * jnp.uint32(0x85EBCA6B))
        v = v ^ (v >> 16)
        v = v * jnp.uint32(0x7FEB352D)
        v = v ^ (v >> 15)
        v = v * jnp.uint32(0x846CA68B)
        v = v ^ (v >> 16)
        fire = v > thr                                               # (HW, 1)

        dx = jnp.where(fire, d, 0.0)                                 # (HW, C)
        xp_ref[1:H + 1, 1:W + 1, :] = (xp_ref[1:H + 1, 1:W + 1, :]
                                       + dx.reshape(H, W, C))
        return carry

    lax.fori_loop(0, steps, step_fn, 0)

    out_ref[0] = xp_ref[1:H + 1, 1:W + 1, :]


def nca_backbone_run(x_nhwc, folded_params, seeds, *, steps, fire_rate):
    """Run one BackboneNCA for `steps` update steps. x_nhwc: (N,H,W,C) f32."""
    N, H, W, C = x_nhwc.shape
    wc, bc, fc1w = folded_params
    hidden = wc.shape[1]
    HW = H * W

    # Explicit VMEM budget (scoped defaults are only 16/32 MiB): working set
    # with generous headroom, capped at v7x's 64 MiB physical VMEM.
    ws = ((H + 2) * (W + 2) * C * 4          # padded f32 state scratch
          + HW * 9 * C * 2                   # bf16 im2col scratch
          + HW * hidden * 4                  # f32 hidden activation
          + 4 * H * W * C * 4                # double-buffered in/out blocks
          + 9 * C * hidden * 2 + hidden * 4 + hidden * C * 2)
    vmem_limit = int(min(64 * 1024 * 1024, max(32 * 1024 * 1024, 4 * ws)))

    kernel = functools.partial(_nca_backbone_kernel,
                               steps=steps, fire_rate=fire_rate)
    grid_spec = pltpu.PrefetchScalarGridSpec(
        num_scalar_prefetch=1,                # per-image PRNG seeds -> SMEM
        grid=(N,),
        in_specs=[
            pl.BlockSpec((1, H, W, C), lambda n, s: (n, 0, 0, 0)),    # state
            pl.BlockSpec((9 * C, hidden), lambda n, s: (0, 0)),       # folded conv/fc0 w
            pl.BlockSpec((1, hidden), lambda n, s: (0, 0)),           # folded fc0 bias
            pl.BlockSpec((hidden, C), lambda n, s: (0, 0)),           # fc1 weight
        ],
        out_specs=pl.BlockSpec((1, H, W, C), lambda n, s: (n, 0, 0, 0)),
        scratch_shapes=[
            pltpu.VMEM((H + 2, W + 2, C), jnp.float32),   # persistent padded state
            pltpu.VMEM((HW, 9 * C), jnp.bfloat16),        # im2col matrix
        ],
    )
    return pl.pallas_call(
        kernel,
        out_shape=jax.ShapeDtypeStruct((N, H, W, C), jnp.float32),
        grid_spec=grid_spec,
        compiler_params=pltpu.CompilerParams(
            dimension_semantics=("parallel",),
            vmem_limit_bytes=vmem_limit),
    )(seeds, x_nhwc, wc, bc, fc1w)


# ----------------------------------------------------------------------------
# Weight folding: conv(p0), conv(p1) folded into fc0 (algebraically exact)
# ----------------------------------------------------------------------------
def fold_backbone_params(params, matmul_dtype=jnp.bfloat16):
    w0, b0, w1, b1, fc0w, fc0b, fc1w = params
    # wc[ki,kj] = w0[ki,kj] @ fc0w[1] + w1[ki,kj] @ fc0w[2];
    # the identity (center) tap additionally carries fc0w[0].
    wc = (jnp.einsum('ijab,bh->ijah', w0, fc0w[1])
          + jnp.einsum('ijab,bh->ijah', w1, fc0w[2]))
    wc = wc.at[1, 1].add(fc0w[0])
    C = w0.shape[-1]
    hidden = fc0w.shape[-1]
    wc = wc.reshape(9 * C, hidden)                     # im2col-ordered K axis
    bc = fc0b + b0 @ fc0w[1] + b1 @ fc0w[2]            # (1, hidden)
    return (wc.astype(matmul_dtype),
            bc.astype(jnp.float32),
            fc1w.astype(matmul_dtype))


# ----------------------------------------------------------------------------
# Plain-JAX glue (resizes, channel padding, layout conversion)
# ----------------------------------------------------------------------------
def bilinear_resize_nchw(x, out_h, out_w):
    """F.interpolate(..., mode='bilinear', align_corners=False) equivalent."""
    N, C, H, W = x.shape

    def src_idx(out_size, in_size):
        scale = in_size / out_size
        d = jnp.arange(out_size, dtype=jnp.float32)
        src = jnp.clip((d + 0.5) * scale - 0.5, 0.0, in_size - 1)
        i0 = jnp.floor(src).astype(jnp.int32)
        i1 = jnp.minimum(i0 + 1, in_size - 1)
        frac = src - i0.astype(jnp.float32)
        return i0, i1, frac

    h0, h1, fh = src_idx(out_h, H)
    iw0, iw1, fw = src_idx(out_w, W)
    top = x[:, :, h0, :]
    bot = x[:, :, h1, :]
    rows = top * (1.0 - fh)[None, None, :, None] + bot * fh[None, None, :, None]
    left = rows[:, :, :, iw0]
    right = rows[:, :, :, iw1]
    return left * (1.0 - fw) + right * fw


def run_backbone(x_nchw, folded_params, key, steps, fire_rate):
    N = x_nchw.shape[0]
    x = jnp.transpose(x_nchw, (0, 2, 3, 1))                      # -> NHWC
    seeds = jax.random.randint(key, (N,), 0, jnp.iinfo(jnp.int32).max,
                               dtype=jnp.int32)
    out = nca_backbone_run(x, folded_params, seeds,
                           steps=steps, fire_rate=fire_rate)
    return jnp.transpose(out, (0, 3, 1, 2))                      # -> NCHW


def mednca_highres_forward(img, params_b1, params_b2, key,
                           channel_n=CHANNEL_N, input_channels=INPUT_CHANNELS,
                           fire_rate=FIRE_RATE, steps_b1=48, steps_b2=48):
    N, C_in, H, W = img.shape

    folded_b1 = fold_backbone_params(params_b1)
    folded_b2 = fold_backbone_params(params_b2)

    # 1) downsample x0.25, pad channels to channel_n
    img_down = bilinear_resize_nchw(img, H // 4, W // 4)
    if C_in < channel_n:
        pad = jnp.zeros((N, channel_n - C_in, H // 4, W // 4), img.dtype)
        x = jnp.concatenate([img_down, pad], axis=1)
    elif C_in > channel_n:
        x = img_down[:, :channel_n]
    else:
        x = img_down

    k1, k2 = jax.random.split(key)

    # 2) low-res NCA (48 fused steps in one kernel call)
    out_b1 = run_backbone(x, folded_b1, k1, steps_b1, fire_rate)

    # 3) upsample x4, re-augment with the original image
    out_b1_up = bilinear_resize_nchw(out_b1, H, W)
    img_aug = jnp.concatenate([img, out_b1_up[:, input_channels:]], axis=1)
    if img_aug.shape[1] > channel_n:
        patch_x = img_aug[:, :channel_n]
    elif img_aug.shape[1] < channel_n:
        pad = jnp.zeros((N, channel_n - img_aug.shape[1], H, W), img.dtype)
        patch_x = jnp.concatenate([img_aug, pad], axis=1)
    else:
        patch_x = img_aug

    # 4) high-res NCA (48 fused steps in one kernel call)
    out_b2 = run_backbone(patch_x, folded_b2, k2, steps_b2, fire_rate)

    # 5) first channel is the prediction
    return out_b2[:, :1]


# ----------------------------------------------------------------------------
# Deterministic parameter init (shapes follow BackboneNCA's __init__)
# ----------------------------------------------------------------------------
def init_backbone_params(key, channel_n=CHANNEL_N, hidden=HIDDEN):
    C = channel_n
    ks = jax.random.split(key, 7)

    def u(k, shape, fan_in):
        bound = 1.0 / (fan_in ** 0.5)
        return jax.random.uniform(k, shape, jnp.float32, -bound, bound)

    # conv weights stored as (kh, kw, c_in, c_out)  (== torch (co,ci,kh,kw).T)
    w0 = u(ks[0], (3, 3, C, C), 9 * C)
    b0 = u(ks[1], (1, C), 9 * C)
    w1 = u(ks[2], (3, 3, C, C), 9 * C)
    b1 = u(ks[3], (1, C), 9 * C)
    # fc0 torch weight (hidden, 3C) -> stored transposed/split as (3, C, hidden)
    fc0w = u(ks[4], (3, C, hidden), 3 * C)
    fc0b = u(ks[5], (1, hidden), 3 * C)
    # fc1 torch weight (C, hidden) -> stored transposed (hidden, C); scaled
    # down to keep the 48-step residual recurrence numerically stable
    # (deviates from torch default init — flagged for checkpoint parity).
    fc1w = u(ks[6], (hidden, C), hidden) * 0.1
    return (w0, b0, w1, b1, fc0w, fc0b, fc1w)


if __name__ == "__main__":
    key = jax.random.PRNGKey(0)
    k_img, k_p1, k_p2, k_fire = jax.random.split(key, 4)

    img = jax.random.normal(k_img, (2, INPUT_CHANNELS, 16, 16), jnp.float32)
    params_b1 = init_backbone_params(k_p1)
    params_b2 = init_backbone_params(k_p2)

    fwd = jax.jit(functools.partial(mednca_highres_forward,
                                    steps_b1=48, steps_b2=48))
    out = fwd(img, params_b1, params_b2, k_fire)
    out = jax.block_until_ready(out)

    assert out.shape == (2, 1, 16, 16), out.shape
    assert bool(jnp.all(jnp.isfinite(out)))
    print("KERNEL_OK")
</pallas_src>

<mosaic_0001>
module attributes {stable_mosaic.version = 11 : i64} {
  func.func @_nca_backbone_kernel(%arg0: i32, %arg1: memref<2xi32, #tpu.memory_space<smem>>, %arg2: memref<1x4x4x16xf32, #tpu.memory_space<vmem>>, %arg3: memref<144x128xbf16, #tpu.memory_space<vmem>>, %arg4: memref<1x128xf32, #tpu.memory_space<vmem>>, %arg5: memref<128x16xbf16, #tpu.memory_space<vmem>>, %arg6: memref<1x4x4x16xf32, #tpu.memory_space<vmem>>, %arg7: memref<6x6x16xf32, #tpu.memory_space<vmem>>, %arg8: memref<16x144xbf16, #tpu.memory_space<vmem>>) attributes {dimension_semantics = [#tpu.dimension_semantics<parallel>], iteration_bounds = array<i64: 2>, scalar_prefetch = 1 : i64, scratch_operands = 2 : i64, tpu.core_type = #tpu.core_type<tc>, window_params = [{transform_indices = @transform_0, window_bounds = array<i64: 1, 4, 4, 16>}, {pipeline_mode = #tpu.pipeline_mode<synchronous>, transform_indices = @transform_1, window_bounds = array<i64: 144, 128>}, {pipeline_mode = #tpu.pipeline_mode<synchronous>, transform_indices = @transform_2, window_bounds = array<i64: 1, 128>}, {pipeline_mode = #tpu.pipeline_mode<synchronous>, transform_indices = @transform_3, window_bounds = array<i64: 128, 16>}, {transform_indices = @transform_4, window_bounds = array<i64: 1, 4, 4, 16>}]} {
    %0 = arith.index_cast %arg0 : i32 to index
    %1 = memref.load %arg1[%0] : memref<2xi32, #tpu.memory_space<smem>>
    %cst = arith.constant 0.000000e+00 : f32
    %2 = vector.broadcast %cst : f32 to vector<6x6x16xf32>
    %c0 = arith.constant 0 : index
    %c0_0 = arith.constant 0 : index
    %c0_1 = arith.constant 0 : index
    %3 = vector.load %arg7[%c0, %c0_0, %c0_1] : memref<6x6x16xf32, #tpu.memory_space<vmem>>, vector<6x6x16xf32>
    tpu.vector_store %arg7[%c0, %c0_0, %c0_1], %2 {strides = array<i32>} : memref<6x6x16xf32, #tpu.memory_space<vmem>>, vector<6x6x16xf32>,
    %c0_2 = arith.constant 0 : index
    %c0_3 = arith.constant 0 : index
    %c0_4 = arith.constant 0 : index
    %c0_5 = arith.constant 0 : index
    %4 = vector.load %arg2[%c0_2, %c0_3, %c0_4, %c0_5] : memref<1x4x4x16xf32, #tpu.memory_space<vmem>>, vector<1x4x4x16xf32>
    %5 = vector.shape_cast %4 : vector<1x4x4x16xf32> to vector<4x4x16xf32>
    %c1 = arith.constant 1 : index
    %c1_6 = arith.constant 1 : index
    %c0_7 = arith.constant 0 : index
    %6 = vector.load %arg7[%c1, %c1_6, %c0_7] : memref<6x6x16xf32, #tpu.memory_space<vmem>>, vector<4x4x16xf32>
    tpu.vector_store %arg7[%c1, %c1_6, %c0_7], %5 {strides = array<i32>} : memref<6x6x16xf32, #tpu.memory_space<vmem>>, vector<4x4x16xf32>,
    %c0_8 = arith.constant 0 : index
    %c0_9 = arith.constant 0 : index
    %7 = vector.load %arg3[%c0_8, %c0_9] : memref<144x128xbf16, #tpu.memory_space<vmem>>, vector<144x128xbf16>
    %c0_10 = arith.constant 0 : index
    %c0_11 = arith.constant 0 : index
    %8 = vector.load %arg5[%c0_10, %c0_11] : memref<128x16xbf16, #tpu.memory_space<vmem>>, vector<128x16xbf16>
    %c0_12 = arith.constant 0 : index
    %c0_13 = arith.constant 0 : index
    %9 = vector.load %arg4[%c0_12, %c0_13] : memref<1x128xf32, #tpu.memory_space<vmem>>, vector<1x128xf32>
    %10 = vector.shape_cast %9 : vector<1x128xf32> to vector<1x128xf32>
    %11 = vector.broadcast %10 : vector<1x128xf32> to vector<16x128xf32>
    %12 = tpu.iota {dimensions = array<i32: 0>} : vector<16x1xi32>
    %c-2147483648_i32 = arith.constant -2147483648 : i32
    %c0_i32 = arith.constant 0 : i32
    %c48_i32 = arith.constant 48 : i32
    %13 = arith.addi %c0_i32, %c48_i32 : i32
    %c1_i32 = arith.constant 1 : i32
    scf.for %arg9 = %c0_i32 to %13 step %c1_i32  : i32 {
      %c2 = arith.constant 2 : index
      %c0_22 = arith.constant 0 : index
      %c0_23 = arith.constant 0 : index
      %18 = vector.load %arg7[%c2, %c0_22, %c0_23] : memref<6x6x16xf32, #tpu.memory_space<vmem>>, vector<1x6x16xf32>
      %c0_24 = arith.constant 0 : index
      %c0_25 = arith.constant 0 : index
      %c0_26 = arith.constant 0 : index
      %19 = vector.load %arg7[%c0_24, %c0_25, %c0_26] : memref<6x6x16xf32, #tpu.memory_space<vmem>>, vector<1x6x16xf32>
      tpu.vector_store %arg7[%c0_24, %c0_25, %c0_26], %18 {strides = array<i32>} : memref<6x6x16xf32, #tpu.memory_space<vmem>>, vector<1x6x16xf32>,
      %c3 = arith.constant 3 : index
      %c0_27 = arith.constant 0 : index
      %c0_28 = arith.constant 0 : index
      %20 = vector.load %arg7[%c3, %c0_27, %c0_28] : memref<6x6x16xf32, #tpu.memory_space<vmem>>, vector<1x6x16xf32>
      %c5 = arith.constant 5 : index
      %c0_29 = arith.constant 0 : index
      %c0_30 = arith.constant 0 : index
      %21 = vector.load %arg7[%c5, %c0_29, %c0_30] : memref<6x6x16xf32, #tpu.memory_space<vmem>>, vector<1x6x16xf32>
      tpu.vector_store %arg7[%c5, %c0_29, %c0_30], %20 {strides = array<i32>} : memref<6x6x16xf32, #tpu.memory_space<vmem>>, vector<1x6x16xf32>,
      %c0_31 = arith.constant 0 : index
      %c2_32 = arith.constant 2 : index
      %c0_33 = arith.constant 0 : index
      %22 = vector.load %arg7[%c0_31, %c2_32, %c0_33] : memref<6x6x16xf32, #tpu.memory_space<vmem>>, vector<6x1x16xf32>
      %c0_34 = arith.constant 0 : index
      %c0_35 = arith.constant 0 : index
      %c0_36 = arith.constant 0 : index
      %23 = vector.load %arg7[%c0_34, %c0_35, %c0_36] : memref<6x6x16xf32, #tpu.memory_space<vmem>>, vector<6x1x16xf32>
      tpu.vector_store %arg7[%c0_34, %c0_35, %c0_36], %22 {strides = array<i32>} : memref<6x6x16xf32, #tpu.memory_space<vmem>>, vector<6x1x16xf32>,
      %c0_37 = arith.constant 0 : index
      %c3_38 = arith.constant 3 : index
      %c0_39 = arith.constant 0 : index
      %24 = vector.load %arg7[%c0_37, %c3_38, %c0_39] : memref<6x6x16xf32, #tpu.memory_space<vmem>>, vector<6x1x16xf32>
      %c0_40 = arith.constant 0 : index
      %c5_41 = arith.constant 5 : index
      %c0_42 = arith.constant 0 : index
      %25 = vector.load %arg7[%c0_40, %c5_41, %c0_42] : memref<6x6x16xf32, #tpu.memory_space<vmem>>, vector<6x1x16xf32>
      tpu.vector_store %arg7[%c0_40, %c5_41, %c0_42], %24 {strides = array<i32>} : memref<6x6x16xf32, #tpu.memory_space<vmem>>, vector<6x1x16xf32>,
      %c0_43 = arith.constant 0 : index
      %c0_44 = arith.constant 0 : index
      %c0_45 = arith.constant 0 : index
      %26 = vector.load %arg7[%c0_43, %c0_44, %c0_45] : memref<6x6x16xf32, #tpu.memory_space<vmem>>, vector<4x4x16xf32>
      %27 = vector.shape_cast %26 : vector<4x4x16xf32> to vector<16x16xf32>
      %28 = arith.truncf %27 : vector<16x16xf32> to vector<16x16xbf16>
      %c0_46 = arith.constant 0 : index
      %c0_47 = arith.constant 0 : index
      %29 = vector.load %arg8[%c0_46, %c0_47] : memref<16x144xbf16, #tpu.memory_space<vmem>>, vector<16x16xbf16>
      tpu.vector_store %arg8[%c0_46, %c0_47], %28 {strides = array<i32>} : memref<16x144xbf16, #tpu.memory_space<vmem>>, vector<16x16xbf16>,
      %c0_48 = arith.constant 0 : index
      %c1_49 = arith.constant 1 : index
      %c0_50 = arith.constant 0 : index
      %30 = vector.load %arg7[%c0_48, %c1_49, %c0_50] : memref<6x6x16xf32, #tpu.memory_space<vmem>>, vector<4x4x16xf32>
      %31 = vector.shape_cast %30 : vector<4x4x16xf32> to vector<16x16xf32>
      %32 = arith.truncf %31 : vector<16x16xf32> to vector<16x16xbf16>
      %c0_51 = arith.constant 0 : index
      %c16 = arith.constant 16 : index
      %33 = vector.load %arg8[%c0_51, %c16] : memref<16x144xbf16, #tpu.memory_space<vmem>>, vector<16x16xbf16>
      tpu.vector_store %arg8[%c0_51, %c16], %32 {strides = array<i32>} : memref<16x144xbf16, #tpu.memory_space<vmem>>, vector<16x16xbf16>,
      %c0_52 = arith.constant 0 : index
      %c2_53 = arith.constant 2 : index
      %c0_54 = arith.constant 0 : index
      %34 = vector.load %arg7[%c0_52, %c2_53, %c0_54] : memref<6x6x16xf32, #tpu.memory_space<vmem>>, vector<4x4x16xf32>
      %35 = vector.shape_cast %34 : vector<4x4x16xf32> to vector<16x16xf32>
      %36 = arith.truncf %35 : vector<16x16xf32> to vector<16x16xbf16>
      %c0_55 = arith.constant 0 : index
      %c32 = arith.constant 32 : index
      %37 = vector.load %arg8[%c0_55, %c32] : memref<16x144xbf16, #tpu.memory_space<vmem>>, vector<16x16xbf16>
      tpu.vector_store %arg8[%c0_55, %c32], %36 {strides = array<i32>} : memref<16x144xbf16, #tpu.memory_space<vmem>>, vector<16x16xbf16>,
      %c1_56 = arith.constant 1 : index
      %c0_57 = arith.constant 0 : index
      %c0_58 = arith.constant 0 : index
      %38 = vector.load %arg7[%c1_56, %c0_57, %c0_58] : memref<6x6x16xf32, #tpu.memory_space<vmem>>, vector<4x4x16xf32>
      %39 = vector.shape_cast %38 : vector<4x4x16xf32> to vector<16x16xf32>
      %40 = arith.truncf %39 : vector<16x16xf32> to vector<16x16xbf16>
      %c0_59 = arith.constant 0 : index
      %c48 = arith.constant 48 : index
      %41 = vector.load %arg8[%c0_59, %c48] : memref<16x144xbf16, #tpu.memory_space<vmem>>, vector<16x16xbf16>
      tpu.vector_store %arg8[%c0_59, %c48], %40 {strides = array<i32>} : memref<16x144xbf16, #tpu.memory_space<vmem>>, vector<16x16xbf16>,
      %c1_60 = arith.constant 1 : index
      %c1_61 = arith.constant 1 : index
      %c0_62 = arith.constant 0 : index
      %42 = vector.load %arg7[%c1_60, %c1_61, %c0_62] : memref<6x6x16xf32, #tpu.memory_space<vmem>>, vector<4x4x16xf32>
      %43 = vector.shape_cast %42 : vector<4x4x16xf32> to vector<16x16xf32>
      %44 = arith.truncf %43 : vector<16x16xf32> to vector<16x16xbf16>
      %c0_63 = arith.constant 0 : index
      %c64 = arith.constant 64 : index
      %45 = vector.load %arg8[%c0_63, %c64] : memref<16x144xbf16, #tpu.memory_space<vmem>>, vector<16x16xbf16>
      tpu.vector_store %arg8[%c0_63, %c64], %44 {strides = array<i32>} : memref<16x144xbf16, #tpu.memory_space<vmem>>, vector<16x16xbf16>,
      %c1_64 = arith.constant 1 : index
      %c2_65 = arith.constant 2 : index
      %c0_66 = arith.constant 0 : index
      %46 = vector.load %arg7[%c1_64, %c2_65, %c0_66] : memref<6x6x16xf32, #tpu.memory_space<vmem>>, vector<4x4x16xf32>
      %47 = vector.shape_cast %46 : vector<4x4x16xf32> to vector<16x16xf32>
      %48 = arith.truncf %47 : vector<16x16xf32> to vector<16x16xbf16>
      %c0_67 = arith.constant 0 : index
      %c80 = arith.constant 80 : index
      %49 = vector.load %arg8[%c0_67, %c80] : memref<16x144xbf16, #tpu.memory_space<vmem>>, vector<16x16xbf16>
      tpu.vector_store %arg8[%c0_67, %c80], %48 {strides = array<i32>} : memref<16x144xbf16, #tpu.memory_space<vmem>>, vector<16x16xbf16>,
      %c2_68 = arith.constant 2 : index
      %c0_69 = arith.constant 0 : index
      %c0_70 = arith.constant 0 : index
      %50 = vector.load %arg7[%c2_68, %c0_69, %c0_70] : memref<6x6x16xf32, #tpu.memory_space<vmem>>, vector<4x4x16xf32>
      %51 = vector.shape_cast %50 : vector<4x4x16xf32> to vector<16x16xf32>
      %52 = arith.truncf %51 : vector<16x16xf32> to vector<16x16xbf16>
      %c0_71 = arith.constant 0 : index
      %c96 = arith.constant 96 : index
      %53 = vector.load %arg8[%c0_71, %c96] : memref<16x144xbf16, #tpu.memory_space<vmem>>, vector<16x16xbf16>
      tpu.vector_store %arg8[%c0_71, %c96], %52 {strides = array<i32>} : memref<16x144xbf16, #tpu.memory_space<vmem>>, vector<16x16xbf16>,
      %c2_72 = arith.constant 2 : index
      %c1_73 = arith.constant 1 : index
      %c0_74 = arith.constant 0 : index
      %54 = vector.load %arg7[%c2_72, %c1_73, %c0_74] : memref<6x6x16xf32, #tpu.memory_space<vmem>>, vector<4x4x16xf32>
      %55 = vector.shape_cast %54 : vector<4x4x16xf32> to vector<16x16xf32>
      %56 = arith.truncf %55 : vector<16x16xf32> to vector<16x16xbf16>
      %c0_75 = arith.constant 0 : index
      %c112 = arith.constant 112 : index
      %57 = vector.load %arg8[%c0_75, %c112] : memref<16x144xbf16, #tpu.memory_space<vmem>>, vector<16x16xbf16>
      tpu.vector_store %arg8[%c0_75, %c112], %56 {strides = array<i32>} : memref<16x144xbf16, #tpu.memory_space<vmem>>, vector<16x16xbf16>,
      %c2_76 = arith.constant 2 : index
      %c2_77 = arith.constant 2 : index
      %c0_78 = arith.constant 0 : index
      %58 = vector.load %arg7[%c2_76, %c2_77, %c0_78] : memref<6x6x16xf32, #tpu.memory_space<vmem>>, vector<4x4x16xf32>
      %59 = vector.shape_cast %58 : vector<4x4x16xf32> to vector<16x16xf32>
      %60 = arith.truncf %59 : vector<16x16xf32> to vector<16x16xbf16>
      %c0_79 = arith.constant 0 : index
      %c128 = arith.constant 128 : index
      %61 = vector.load %arg8[%c0_79, %c128] : memref<16x144xbf16, #tpu.memory_space<vmem>>, vector<16x16xbf16>
      tpu.vector_store %arg8[%c0_79, %c128], %60 {strides = array<i32>} : memref<16x144xbf16, #tpu.memory_space<vmem>>, vector<16x16xbf16>,
      %c0_80 = arith.constant 0 : index
      %c0_81 = arith.constant 0 : index
      %62 = vector.load %arg8[%c0_80, %c0_81] : memref<16x144xbf16, #tpu.memory_space<vmem>>, vector<16x144xbf16>
      %cst_82 = arith.constant dense<0.000000e+00> : vector<16x128xf32>
      %63 = tpu.matmul %62, %7, %cst_82 {dimension_numbers = #tpu.dot_dimension_numbers<[1], [0], [0], [1], [0, 0, 1, 1], [], []>} : vector<16x144xbf16>, vector<144x128xbf16>, vector<16x128xf32> -> vector<16x128xf32>
      %64 = arith.addf %63, %11 : vector<16x128xf32>
      %cst_83 = arith.constant 0.000000e+00 : f32
      %65 = vector.broadcast %cst_83 : f32 to vector<16x128xf32>
      %66 = arith.maximumf %64, %65 : vector<16x128xf32>
      %67 = arith.truncf %66 : vector<16x128xf32> to vector<16x128xbf16>
      %cst_84 = arith.constant dense<0.000000e+00> : vector<16x16xf32>
      %68 = tpu.matmul %67, %8, %cst_84 {dimension_numbers = #tpu.dot_dimension_numbers<[1], [0], [0], [1], [0, 0, 1, 1], [], []>} : vector<16x128xbf16>, vector<128x16xbf16>, vector<16x16xf32> -> vector<16x16xf32>
      %c-1640531527_i32 = arith.constant -1640531527 : i32
      %69 = vector.broadcast %c-1640531527_i32 : i32 to vector<16x1xi32>
      %70 = arith.muli %12, %69 : vector<16x1xi32>
      %71 = vector.broadcast %1 : i32 to vector<16x1xi32>
      %72 = arith.addi %71, %70 : vector<16x1xi32>
      %c-2048144789_i32 = arith.constant -2048144789 : i32
      %73 = arith.muli %arg9, %c-2048144789_i32 : i32
      %74 = vector.broadcast %73 : i32 to vector<16x1xi32>
      %75 = arith.addi %72, %74 : vector<16x1xi32>
      %c16_i32 = arith.constant 16 : i32
      %76 = vector.broadcast %c16_i32 : i32 to vector<16x1xi32>
      %77 = arith.shrui %75, %76 : vector<16x1xi32>
      %78 = arith.xori %75, %77 : vector<16x1xi32>
      %c2146121005_i32 = arith.constant 2146121005 : i32
      %79 = vector.broadcast %c2146121005_i32 : i32 to vector<16x1xi32>
      %80 = arith.muli %78, %79 : vector<16x1xi32>
      %c15_i32 = arith.constant 15 : i32
      %81 = vector.broadcast %c15_i32 : i32 to vector<16x1xi32>
      %82 = arith.shrui %80, %81 : vector<16x1xi32>
      %83 = arith.xori %80, %82 : vector<16x1xi32>
      %c-2073254261_i32 = arith.constant -2073254261 : i32
      %84 = vector.broadcast %c-2073254261_i32 : i32 to vector<16x1xi32>
      %85 = arith.muli %83, %84 : vector<16x1xi32>
      %c16_i32_85 = arith.constant 16 : i32
      %86 = vector.broadcast %c16_i32_85 : i32 to vector<16x1xi32>
      %87 = arith.shrui %85, %86 : vector<16x1xi32>
      %88 = arith.xori %85, %87 : vector<16x1xi32>
      %89 = vector.broadcast %c-2147483648_i32 : i32 to vector<16x1xi32>
      %90 = arith.cmpi ugt, %88, %89 : vector<16x1xi32>
      %cst_86 = arith.constant 0.000000e+00 : f32
      %91 = vector.shape_cast %90 : vector<16x1xi1> to vector<16x1xi1>
      %92 = vector.broadcast %91 : vector<16x1xi1> to vector<16x16xi1>
      %93 = vector.broadcast %cst_86 : f32 to vector<16x16xf32>
      %94 = arith.select %92, %68, %93 : vector<16x16xi1>, vector<16x16xf32>
      %c1_87 = arith.constant 1 : index
      %c1_88 = arith.constant 1 : index
      %c0_89 = arith.constant 0 : index
      %95 = vector.load %arg7[%c1_87, %c1_88, %c0_89] : memref<6x6x16xf32, #tpu.memory_space<vmem>>, vector<4x4x16xf32>
      %96 = vector.shape_cast %94 : vector<16x16xf32> to vector<4x4x16xf32>
      %97 = arith.addf %95, %96 : vector<4x4x16xf32>
      %c1_90 = arith.constant 1 : index
      %c1_91 = arith.constant 1 : index
      %c0_92 = arith.constant 0 : index
      %98 = vector.load %arg7[%c1_90, %c1_91, %c0_92] : memref<6x6x16xf32, #tpu.memory_space<vmem>>, vector<4x4x16xf32>
      tpu.vector_store %arg7[%c1_90, %c1_91, %c0_92], %97 {strides = array<i32>} : memref<6x6x16xf32, #tpu.memory_space<vmem>>, vector<4x4x16xf32>,
    }
    %c48_i32_14 = arith.constant 48 : i32
    %c1_15 = arith.constant 1 : index
    %c1_16 = arith.constant 1 : index
    %c0_17 = arith.constant 0 : index
    %14 = vector.load %arg7[%c1_15, %c1_16, %c0_17] : memref<6x6x16xf32, #tpu.memory_space<vmem>>, vector<4x4x16xf32>
    %c0_18 = arith.constant 0 : index
    %c0_19 = arith.constant 0 : index
    %c0_20 = arith.constant 0 : index
    %c0_21 = arith.constant 0 : index
    %15 = vector.load %arg6[%c0_18, %c0_19, %c0_20, %c0_21] : memref<1x4x4x16xf32, #tpu.memory_space<vmem>>, vector<1x4x4x16xf32>
    %16 = vector.shape_cast %15 : vector<1x4x4x16xf32> to vector<4x4x16xf32>
    %17 = vector.shape_cast %14 : vector<4x4x16xf32> to vector<1x4x4x16xf32>
    tpu.vector_store %arg6[%c0_18, %c0_19, %c0_20, %c0_21], %17 {strides = array<i32>} : memref<1x4x4x16xf32, #tpu.memory_space<vmem>>, vector<1x4x4x16xf32>,
    return
  }
  func.func @transform_0(%arg0: i32, %arg1: memref<2xi32, #tpu.memory_space<smem>>) -> (i32, i32, i32, i32) {
    %c0_i32 = arith.constant 0 : i32
    %c0_i32_0 = arith.constant 0 : i32
    %c0_i32_1 = arith.constant 0 : i32
    %c0_i32_2 = arith.constant 0 : i32
    return %arg0, %c0_i32, %c0_i32_0, %c0_i32_1 : i32, i32, i32, i32
  }
  func.func @transform_1(%arg0: i32, %arg1: memref<2xi32, #tpu.memory_space<smem>>) -> (i32, i32) {
    %c0_i32 = arith.constant 0 : i32
    %c0_i32_0 = arith.constant 0 : i32
    %c0_i32_1 = arith.constant 0 : i32
    return %c0_i32, %c0_i32_0 : i32, i32
  }
  func.func @transform_2(%arg0: i32, %arg1: memref<2xi32, #tpu.memory_space<smem>>) -> (i32, i32) {
    %c0_i32 = arith.constant 0 : i32
    %c0_i32_0 = arith.constant 0 : i32
    %c0_i32_1 = arith.constant 0 : i32
    return %c0_i32, %c0_i32_0 : i32, i32
  }
  func.func @transform_3(%arg0: i32, %arg1: memref<2xi32, #tpu.memory_space<smem>>) -> (i32, i32) {
    %c0_i32 = arith.constant 0 : i32
    %c0_i32_0 = arith.constant 0 : i32
    %c0_i32_1 = arith.constant 0 : i32
    return %c0_i32, %c0_i32_0 : i32, i32
  }
  func.func @transform_4(%arg0: i32, %arg1: memref<2xi32, #tpu.memory_space<smem>>) -> (i32, i32, i32, i32) {
    %c0_i32 = arith.constant 0 : i32
    %c0_i32_0 = arith.constant 0 : i32
    %c0_i32_1 = arith.constant 0 : i32
    %c0_i32_2 = arith.constant 0 : i32
    return %arg0, %c0_i32, %c0_i32_0, %c0_i32_1 : i32, i32, i32, i32
  }
}

module attributes {stable_mosaic.version = 11 : i64} {
  func.func @_nca_backbone_kernel(%arg0: i32, %arg1: memref<2xi32, #tpu.memory_space<smem>>, %arg2: memref<1x16x16x16xf32, #tpu.memory_space<vmem>>, %arg3: memref<144x128xbf16, #tpu.memory_space<vmem>>, %arg4: memref<1x128xf32, #tpu.memory_space<vmem>>, %arg5: memref<128x16xbf16, #tpu.memory_space<vmem>>, %arg6: memref<1x16x16x16xf32, #tpu.memory_space<vmem>>, %arg7: memref<18x18x16xf32, #tpu.memory_space<vmem>>, %arg8: memref<256x144xbf16, #tpu.memory_space<vmem>>) attributes {dimension_semantics = [#tpu.dimension_semantics<parallel>], iteration_bounds = array<i64: 2>, scalar_prefetch = 1 : i64, scratch_operands = 2 : i64, tpu.core_type = #tpu.core_type<tc>, window_params = [{transform_indices = @transform_0, window_bounds = array<i64: 1, 16, 16, 16>}, {pipeline_mode = #tpu.pipeline_mode<synchronous>, transform_indices = @transform_1, window_bounds = array<i64: 144, 128>}, {pipeline_mode = #tpu.pipeline_mode<synchronous>, transform_indices = @transform_2, window_bounds = array<i64: 1, 128>}, {pipeline_mode = #tpu.pipeline_mode<synchronous>, transform_indices = @transform_3, window_bounds = array<i64: 128, 16>}, {transform_indices = @transform_4, window_bounds = array<i64: 1, 16, 16, 16>}]} {
    %0 = arith.index_cast %arg0 : i32 to index
    %1 = memref.load %arg1[%0] : memref<2xi32, #tpu.memory_space<smem>>
    %cst = arith.constant 0.000000e+00 : f32
    %2 = vector.broadcast %cst : f32 to vector<18x18x16xf32>
    %c0 = arith.constant 0 : index
    %c0_0 = arith.constant 0 : index
    %c0_1 = arith.constant 0 : index
    %3 = vector.load %arg7[%c0, %c0_0, %c0_1] : memref<18x18x16xf32, #tpu.memory_space<vmem>>, vector<18x18x16xf32>
    tpu.vector_store %arg7[%c0, %c0_0, %c0_1], %2 {strides = array<i32>} : memref<18x18x16xf32, #tpu.memory_space<vmem>>, vector<18x18x16xf32>,
    %c0_2 = arith.constant 0 : index
    %c0_3 = arith.constant 0 : index
    %c0_4 = arith.constant 0 : index
    %c0_5 = arith.constant 0 : index
    %4 = vector.load %arg2[%c0_2, %c0_3, %c0_4, %c0_5] : memref<1x16x16x16xf32, #tpu.memory_space<vmem>>, vector<1x16x16x16xf32>
    %5 = vector.shape_cast %4 : vector<1x16x16x16xf32> to vector<16x16x16xf32>
    %c1 = arith.constant 1 : index
    %c1_6 = arith.constant 1 : index
    %c0_7 = arith.constant 0 : index
    %6 = vector.load %arg7[%c1, %c1_6, %c0_7] : memref<18x18x16xf32, #tpu.memory_space<vmem>>, vector<16x16x16xf32>
    tpu.vector_store %arg7[%c1, %c1_6, %c0_7], %5 {strides = array<i32>} : memref<18x18x16xf32, #tpu.memory_space<vmem>>, vector<16x16x16xf32>,
    %c0_8 = arith.constant 0 : index
    %c0_9 = arith.constant 0 : index
    %7 = vector.load %arg3[%c0_8, %c0_9] : memref<144x128xbf16, #tpu.memory_space<vmem>>, vector<144x128xbf16>
    %c0_10 = arith.constant 0 : index
    %c0_11 = arith.constant 0 : index
    %8 = vector.load %arg5[%c0_10, %c0_11] : memref<128x16xbf16, #tpu.memory_space<vmem>>, vector<128x16xbf16>
    %c0_12 = arith.constant 0 : index
    %c0_13 = arith.constant 0 : index
    %9 = vector.load %arg4[%c0_12, %c0_13] : memref<1x128xf32, #tpu.memory_space<vmem>>, vector<1x128xf32>
    %10 = vector.shape_cast %9 : vector<1x128xf32> to vector<1x128xf32>
    %11 = vector.broadcast %10 : vector<1x128xf32> to vector<256x128xf32>
    %12 = tpu.iota {dimensions = array<i32: 0>} : vector<256x1xi32>
    %c-2147483648_i32 = arith.constant -2147483648 : i32
    %c0_i32 = arith.constant 0 : i32
    %c48_i32 = arith.constant 48 : i32
    %13 = arith.addi %c0_i32, %c48_i32 : i32
    %c1_i32 = arith.constant 1 : i32
    scf.for %arg9 = %c0_i32 to %13 step %c1_i32  : i32 {
      %c2 = arith.constant 2 : index
      %c0_22 = arith.constant 0 : index
      %c0_23 = arith.constant 0 : index
      %18 = vector.load %arg7[%c2, %c0_22, %c0_23] : memref<18x18x16xf32, #tpu.memory_space<vmem>>, vector<1x18x16xf32>
      %c0_24 = arith.constant 0 : index
      %c0_25 = arith.constant 0 : index
      %c0_26 = arith.constant 0 : index
      %19 = vector.load %arg7[%c0_24, %c0_25, %c0_26] : memref<18x18x16xf32, #tpu.memory_space<vmem>>, vector<1x18x16xf32>
      tpu.vector_store %arg7[%c0_24, %c0_25, %c0_26], %18 {strides = array<i32>} : memref<18x18x16xf32, #tpu.memory_space<vmem>>, vector<1x18x16xf32>,
      %c15 = arith.constant 15 : index
      %c0_27 = arith.constant 0 : index
      %c0_28 = arith.constant 0 : index
      %20 = vector.load %arg7[%c15, %c0_27, %c0_28] : memref<18x18x16xf32, #tpu.memory_space<vmem>>, vector<1x18x16xf32>
      %c17 = arith.constant 17 : index
      %c0_29 = arith.constant 0 : index
      %c0_30 = arith.constant 0 : index
      %21 = vector.load %arg7[%c17, %c0_29, %c0_30] : memref<18x18x16xf32, #tpu.memory_space<vmem>>, vector<1x18x16xf32>
      tpu.vector_store %arg7[%c17, %c0_29, %c0_30], %20 {strides = array<i32>} : memref<18x18x16xf32, #tpu.memory_space<vmem>>, vector<1x18x16xf32>,
      %c0_31 = arith.constant 0 : index
      %c2_32 = arith.constant 2 : index
      %c0_33 = arith.constant 0 : index
      %22 = vector.load %arg7[%c0_31, %c2_32, %c0_33] : memref<18x18x16xf32, #tpu.memory_space<vmem>>, vector<18x1x16xf32>
      %c0_34 = arith.constant 0 : index
      %c0_35 = arith.constant 0 : index
      %c0_36 = arith.constant 0 : index
      %23 = vector.load %arg7[%c0_34, %c0_35, %c0_36] : memref<18x18x16xf32, #tpu.memory_space<vmem>>, vector<18x1x16xf32>
      tpu.vector_store %arg7[%c0_34, %c0_35, %c0_36], %22 {strides = array<i32>} : memref<18x18x16xf32, #tpu.memory_space<vmem>>, vector<18x1x16xf32>,
      %c0_37 = arith.constant 0 : index
      %c15_38 = arith.constant 15 : index
      %c0_39 = arith.constant 0 : index
      %24 = vector.load %arg7[%c0_37, %c15_38, %c0_39] : memref<18x18x16xf32, #tpu.memory_space<vmem>>, vector<18x1x16xf32>
      %c0_40 = arith.constant 0 : index
      %c17_41 = arith.constant 17 : index
      %c0_42 = arith.constant 0 : index
      %25 = vector.load %arg7[%c0_40, %c17_41, %c0_42] : memref<18x18x16xf32, #tpu.memory_space<vmem>>, vector<18x1x16xf32>
      tpu.vector_store %arg7[%c0_40, %c17_41, %c0_42], %24 {strides = array<i32>} : memref<18x18x16xf32, #tpu.memory_space<vmem>>, vector<18x1x16xf32>,
      %c0_43 = arith.constant 0 : index
      %c0_44 = arith.constant 0 : index
      %c0_45 = arith.constant 0 : index
      %26 = vector.load %arg7[%c0_43, %c0_44, %c0_45] : memref<18x18x16xf32, #tpu.memory_space<vmem>>, vector<16x16x16xf32>
      %27 = vector.shape_cast %26 : vector<16x16x16xf32> to vector<256x16xf32>
      %28 = arith.truncf %27 : vector<256x16xf32> to vector<256x16xbf16>
      %c0_46 = arith.constant 0 : index
      %c0_47 = arith.constant 0 : index
      %29 = vector.load %arg8[%c0_46, %c0_47] : memref<256x144xbf16, #tpu.memory_space<vmem>>, vector<256x16xbf16>
      tpu.vector_store %arg8[%c0_46, %c0_47], %28 {strides = array<i32>} : memref<256x144xbf16, #tpu.memory_space<vmem>>, vector<256x16xbf16>,
      %c0_48 = arith.constant 0 : index
      %c1_49 = arith.constant 1 : index
      %c0_50 = arith.constant 0 : index
      %30 = vector.load %arg7[%c0_48, %c1_49, %c0_50] : memref<18x18x16xf32, #tpu.memory_space<vmem>>, vector<16x16x16xf32>
      %31 = vector.shape_cast %30 : vector<16x16x16xf32> to vector<256x16xf32>
      %32 = arith.truncf %31 : vector<256x16xf32> to vector<256x16xbf16>
      %c0_51 = arith.constant 0 : index
      %c16 = arith.constant 16 : index
      %33 = vector.load %arg8[%c0_51, %c16] : memref<256x144xbf16, #tpu.memory_space<vmem>>, vector<256x16xbf16>
      tpu.vector_store %arg8[%c0_51, %c16], %32 {strides = array<i32>} : memref<256x144xbf16, #tpu.memory_space<vmem>>, vector<256x16xbf16>,
      %c0_52 = arith.constant 0 : index
      %c2_53 = arith.constant 2 : index
      %c0_54 = arith.constant 0 : index
      %34 = vector.load %arg7[%c0_52, %c2_53, %c0_54] : memref<18x18x16xf32, #tpu.memory_space<vmem>>, vector<16x16x16xf32>
      %35 = vector.shape_cast %34 : vector<16x16x16xf32> to vector<256x16xf32>
      %36 = arith.truncf %35 : vector<256x16xf32> to vector<256x16xbf16>
      %c0_55 = arith.constant 0 : index
      %c32 = arith.constant 32 : index
      %37 = vector.load %arg8[%c0_55, %c32] : memref<256x144xbf16, #tpu.memory_space<vmem>>, vector<256x16xbf16>
      tpu.vector_store %arg8[%c0_55, %c32], %36 {strides = array<i32>} : memref<256x144xbf16, #tpu.memory_space<vmem>>, vector<256x16xbf16>,
      %c1_56 = arith.constant 1 : index
      %c0_57 = arith.constant 0 : index
      %c0_58 = arith.constant 0 : index
      %38 = vector.load %arg7[%c1_56, %c0_57, %c0_58] : memref<18x18x16xf32, #tpu.memory_space<vmem>>, vector<16x16x16xf32>
      %39 = vector.shape_cast %38 : vector<16x16x16xf32> to vector<256x16xf32>
      %40 = arith.truncf %39 : vector<256x16xf32> to vector<256x16xbf16>
      %c0_59 = arith.constant 0 : index
      %c48 = arith.constant 48 : index
      %41 = vector.load %arg8[%c0_59, %c48] : memref<256x144xbf16, #tpu.memory_space<vmem>>, vector<256x16xbf16>
      tpu.vector_store %arg8[%c0_59, %c48], %40 {strides = array<i32>} : memref<256x144xbf16, #tpu.memory_space<vmem>>, vector<256x16xbf16>,
      %c1_60 = arith.constant 1 : index
      %c1_61 = arith.constant 1 : index
      %c0_62 = arith.constant 0 : index
      %42 = vector.load %arg7[%c1_60, %c1_61, %c0_62] : memref<18x18x16xf32, #tpu.memory_space<vmem>>, vector<16x16x16xf32>
      %43 = vector.shape_cast %42 : vector<16x16x16xf32> to vector<256x16xf32>
      %44 = arith.truncf %43 : vector<256x16xf32> to vector<256x16xbf16>
      %c0_63 = arith.constant 0 : index
      %c64 = arith.constant 64 : index
      %45 = vector.load %arg8[%c0_63, %c64] : memref<256x144xbf16, #tpu.memory_space<vmem>>, vector<256x16xbf16>
      tpu.vector_store %arg8[%c0_63, %c64], %44 {strides = array<i32>} : memref<256x144xbf16, #tpu.memory_space<vmem>>, vector<256x16xbf16>,
      %c1_64 = arith.constant 1 : index
      %c2_65 = arith.constant 2 : index
      %c0_66 = arith.constant 0 : index
      %46 = vector.load %arg7[%c1_64, %c2_65, %c0_66] : memref<18x18x16xf32, #tpu.memory_space<vmem>>, vector<16x16x16xf32>
      %47 = vector.shape_cast %46 : vector<16x16x16xf32> to vector<256x16xf32>
      %48 = arith.truncf %47 : vector<256x16xf32> to vector<256x16xbf16>
      %c0_67 = arith.constant 0 : index
      %c80 = arith.constant 80 : index
      %49 = vector.load %arg8[%c0_67, %c80] : memref<256x144xbf16, #tpu.memory_space<vmem>>, vector<256x16xbf16>
      tpu.vector_store %arg8[%c0_67, %c80], %48 {strides = array<i32>} : memref<256x144xbf16, #tpu.memory_space<vmem>>, vector<256x16xbf16>,
      %c2_68 = arith.constant 2 : index
      %c0_69 = arith.constant 0 : index
      %c0_70 = arith.constant 0 : index
      %50 = vector.load %arg7[%c2_68, %c0_69, %c0_70] : memref<18x18x16xf32, #tpu.memory_space<vmem>>, vector<16x16x16xf32>
      %51 = vector.shape_cast %50 : vector<16x16x16xf32> to vector<256x16xf32>
      %52 = arith.truncf %51 : vector<256x16xf32> to vector<256x16xbf16>
      %c0_71 = arith.constant 0 : index
      %c96 = arith.constant 96 : index
      %53 = vector.load %arg8[%c0_71, %c96] : memref<256x144xbf16, #tpu.memory_space<vmem>>, vector<256x16xbf16>
      tpu.vector_store %arg8[%c0_71, %c96], %52 {strides = array<i32>} : memref<256x144xbf16, #tpu.memory_space<vmem>>, vector<256x16xbf16>,
      %c2_72 = arith.constant 2 : index
      %c1_73 = arith.constant 1 : index
      %c0_74 = arith.constant 0 : index
      %54 = vector.load %arg7[%c2_72, %c1_73, %c0_74] : memref<18x18x16xf32, #tpu.memory_space<vmem>>, vector<16x16x16xf32>
      %55 = vector.shape_cast %54 : vector<16x16x16xf32> to vector<256x16xf32>
      %56 = arith.truncf %55 : vector<256x16xf32> to vector<256x16xbf16>
      %c0_75 = arith.constant 0 : index
      %c112 = arith.constant 112 : index
      %57 = vector.load %arg8[%c0_75, %c112] : memref<256x144xbf16, #tpu.memory_space<vmem>>, vector<256x16xbf16>
      tpu.vector_store %arg8[%c0_75, %c112], %56 {strides = array<i32>} : memref<256x144xbf16, #tpu.memory_space<vmem>>, vector<256x16xbf16>,
      %c2_76 = arith.constant 2 : index
      %c2_77 = arith.constant 2 : index
      %c0_78 = arith.constant 0 : index
      %58 = vector.load %arg7[%c2_76, %c2_77, %c0_78] : memref<18x18x16xf32, #tpu.memory_space<vmem>>, vector<16x16x16xf32>
      %59 = vector.shape_cast %58 : vector<16x16x16xf32> to vector<256x16xf32>
      %60 = arith.truncf %59 : vector<256x16xf32> to vector<256x16xbf16>
      %c0_79 = arith.constant 0 : index
      %c128 = arith.constant 128 : index
      %61 = vector.load %arg8[%c0_79, %c128] : memref<256x144xbf16, #tpu.memory_space<vmem>>, vector<256x16xbf16>
      tpu.vector_store %arg8[%c0_79, %c128], %60 {strides = array<i32>} : memref<256x144xbf16, #tpu.memory_space<vmem>>, vector<256x16xbf16>,
      %c0_80 = arith.constant 0 : index
      %c0_81 = arith.constant 0 : index
      %62 = vector.load %arg8[%c0_80, %c0_81] : memref<256x144xbf16, #tpu.memory_space<vmem>>, vector<256x144xbf16>
      %cst_82 = arith.constant dense<0.000000e+00> : vector<256x128xf32>
      %63 = tpu.matmul %62, %7, %cst_82 {dimension_numbers = #tpu.dot_dimension_numbers<[1], [0], [0], [1], [0, 0, 1, 1], [], []>} : vector<256x144xbf16>, vector<144x128xbf16>, vector<256x128xf32> -> vector<256x128xf32>
      %64 = arith.addf %63, %11 : vector<256x128xf32>
      %cst_83 = arith.constant 0.000000e+00 : f32
      %65 = vector.broadcast %cst_83 : f32 to vector<256x128xf32>
      %66 = arith.maximumf %64, %65 : vector<256x128xf32>
      %67 = arith.truncf %66 : vector<256x128xf32> to vector<256x128xbf16>
      %cst_84 = arith.constant dense<0.000000e+00> : vector<256x16xf32>
      %68 = tpu.matmul %67, %8, %cst_84 {dimension_numbers = #tpu.dot_dimension_numbers<[1], [0], [0], [1], [0, 0, 1, 1], [], []>} : vector<256x128xbf16>, vector<128x16xbf16>, vector<256x16xf32> -> vector<256x16xf32>
      %c-1640531527_i32 = arith.constant -1640531527 : i32
      %69 = vector.broadcast %c-1640531527_i32 : i32 to vector<256x1xi32>
      %70 = arith.muli %12, %69 : vector<256x1xi32>
      %71 = vector.broadcast %1 : i32 to vector<256x1xi32>
      %72 = arith.addi %71, %70 : vector<256x1xi32>
      %c-2048144789_i32 = arith.constant -2048144789 : i32
      %73 = arith.muli %arg9, %c-2048144789_i32 : i32
      %74 = vector.broadcast %73 : i32 to vector<256x1xi32>
      %75 = arith.addi %72, %74 : vector<256x1xi32>
      %c16_i32 = arith.constant 16 : i32
      %76 = vector.broadcast %c16_i32 : i32 to vector<256x1xi32>
      %77 = arith.shrui %75, %76 : vector<256x1xi32>
      %78 = arith.xori %75, %77 : vector<256x1xi32>
      %c2146121005_i32 = arith.constant 2146121005 : i32
      %79 = vector.broadcast %c2146121005_i32 : i32 to vector<256x1xi32>
      %80 = arith.muli %78, %79 : vector<256x1xi32>
      %c15_i32 = arith.constant 15 : i32
      %81 = vector.broadcast %c15_i32 : i32 to vector<256x1xi32>
      %82 = arith.shrui %80, %81 : vector<256x1xi32>
      %83 = arith.xori %80, %82 : vector<256x1xi32>
      %c-2073254261_i32 = arith.constant -2073254261 : i32
      %84 = vector.broadcast %c-2073254261_i32 : i32 to vector<256x1xi32>
      %85 = arith.muli %83, %84 : vector<256x1xi32>
      %c16_i32_85 = arith.constant 16 : i32
      %86 = vector.broadcast %c16_i32_85 : i32 to vector<256x1xi32>
      %87 = arith.shrui %85, %86 : vector<256x1xi32>
      %88 = arith.xori %85, %87 : vector<256x1xi32>
      %89 = vector.broadcast %c-2147483648_i32 : i32 to vector<256x1xi32>
      %90 = arith.cmpi ugt, %88, %89 : vector<256x1xi32>
      %cst_86 = arith.constant 0.000000e+00 : f32
      %91 = vector.shape_cast %90 : vector<256x1xi1> to vector<256x1xi1>
      %92 = vector.broadcast %91 : vector<256x1xi1> to vector<256x16xi1>
      %93 = vector.broadcast %cst_86 : f32 to vector<256x16xf32>
      %94 = arith.select %92, %68, %93 : vector<256x16xi1>, vector<256x16xf32>
      %c1_87 = arith.constant 1 : index
      %c1_88 = arith.constant 1 : index
      %c0_89 = arith.constant 0 : index
      %95 = vector.load %arg7[%c1_87, %c1_88, %c0_89] : memref<18x18x16xf32, #tpu.memory_space<vmem>>, vector<16x16x16xf32>
      %96 = vector.shape_cast %94 : vector<256x16xf32> to vector<16x16x16xf32>
      %97 = arith.addf %95, %96 : vector<16x16x16xf32>
      %c1_90 = arith.constant 1 : index
      %c1_91 = arith.constant 1 : index
      %c0_92 = arith.constant 0 : index
      %98 = vector.load %arg7[%c1_90, %c1_91, %c0_92] : memref<18x18x16xf32, #tpu.memory_space<vmem>>, vector<16x16x16xf32>
      tpu.vector_store %arg7[%c1_90, %c1_91, %c0_92], %97 {strides = array<i32>} : memref<18x18x16xf32, #tpu.memory_space<vmem>>, vector<16x16x16xf32>,
    }
    %c48_i32_14 = arith.constant 48 : i32
    %c1_15 = arith.constant 1 : index
    %c1_16 = arith.constant 1 : index
    %c0_17 = arith.constant 0 : index
    %14 = vector.load %arg7[%c1_15, %c1_16, %c0_17] : memref<18x18x16xf32, #tpu.memory_space<vmem>>, vector<16x16x16xf32>
    %c0_18 = arith.constant 0 : index
    %c0_19 = arith.constant 0 : index
    %c0_20 = arith.constant 0 : index
    %c0_21 = arith.constant 0 : index
    %15 = vector.load %arg6[%c0_18, %c0_19, %c0_20, %c0_21] : memref<1x16x16x16xf32, #tpu.memory_space<vmem>>, vector<1x16x16x16xf32>
    %16 = vector.shape_cast %15 : vector<1x16x16x16xf32> to vector<16x16x16xf32>
    %17 = vector.shape_cast %14 : vector<16x16x16xf32> to vector<1x16x16x16xf32>
    tpu.vector_store %arg6[%c0_18, %c0_19, %c0_20, %c0_21], %17 {strides = array<i32>} : memref<1x16x16x16xf32, #tpu.memory_space<vmem>>, vector<1x16x16x16xf32>,
    return
  }
  func.func @transform_0(%arg0: i32, %arg1: memref<2xi32, #tpu.memory_space<smem>>) -> (i32, i32, i32, i32) {
    %c0_i32 = arith.constant 0 : i32
    %c0_i32_0 = arith.constant 0 : i32
    %c0_i32_1 = arith.constant 0 : i32
    %c0_i32_2 = arith.constant 0 : i32
    return %arg0, %c0_i32, %c0_i32_0, %c0_i32_1 : i32, i32, i32, i32
  }
  func.func @transform_1(%arg0: i32, %arg1: memref<2xi32, #tpu.memory_space<smem>>) -> (i32, i32) {
    %c0_i32 = arith.constant 0 : i32
    %c0_i32_0 = arith.constant 0 : i32
    %c0_i32_1 = arith.constant 0 : i32
    return %c0_i32, %c0_i32_0 : i32, i32
  }
  func.func @transform_2(%arg0: i32, %arg1: memref<2xi32, #tpu.memory_space<smem>>) -> (i32, i32) {
    %c0_i32 = arith.constant 0 : i32
    %c0_i32_0 = arith.constant 0 : i32
    %c0_i32_1 = arith.constant 0 : i32
    return %c0_i32, %c0_i32_0 : i32, i32
  }
  func.func @transform_3(%arg0: i32, %arg1: memref<2xi32, #tpu.memory_space<smem>>) -> (i32, i32) {
    %c0_i32 = arith.constant 0 : i32
    %c0_i32_0 = arith.constant 0 : i32
    %c0_i32_1 = arith.constant 0 : i32
    return %c0_i32, %c0_i32_0 : i32, i32
  }
  func.func @transform_4(%arg0: i32, %arg1: memref<2xi32, #tpu.memory_space<smem>>) -> (i32, i32, i32, i32) {
    %c0_i32 = arith.constant 0 : i32
    %c0_i32_0 = arith.constant 0 : i32
    %c0_i32_1 = arith.constant 0 : i32
    %c0_i32_2 = arith.constant 0 : i32
    return %arg0, %c0_i32, %c0_i32_0, %c0_i32_1 : i32, i32, i32, i32
  }
}

</mosaic_0001>

<bundles_post_ra>
// kernel: mednca_highres_forward.32
= control target key start
LH: loop header
LB: loop body
LE: loop exit
PB: predicated region body
PF: predicated region fallthrough
CT: control target
= control target key end

     0   :  { %s1027_s21 = smov [#allocation5]   ;;  %s1373_s0 = inlined_call_operand.vmem [shape: s32[2], index: 0, kind: input, shape index: {}]   ;;  %s1374_s1 = inlined_call_operand.vmem [shape: f32[2,4,4,16], index: 1, kind: input, shape index: {}]   ;;  %s1375_s2 = inlined_call_operand.vmem [shape: bf16[144,128], index: 2, kind: input, shape index: {}]   ;;  %s1376_s3 = inlined_call_operand.vmem [shape: f32[1,128], index: 3, kind: input, shape index: {}]   ;;  %s1377_s4 = inlined_call_operand.vmem [shape: bf16[128,16], index: 4, kind: input, shape index: {}]   ;;  %s1378_s5 = inlined_call_operand.vmem [shape: f32[2,4,4,16], index: 5, kind: output, shape index: {}]  }
   0x1   :  { %s11_s20 = sshll.u32 %s1373_s0, 4  ;;  %s12_s20 = int_to_ptr.vmem [resolvable:$true] %s11_s20 }
   0x2   :  { %14 = dma.vmem_to_smem %s12_s20, 16, %s1027_s21, [#allocation4] }
   0x3   :  { %1017 = dma.done.wait [#allocation4], 16 }
   0x4   :  { %1018 = vsyncadd [#allocation4], 4294967280 }
   0x5   :  { %17 = sfence }
   0x6   :  { %s1069_s22 = smov 0  }
   0x7 LB: > { %s1075_s23 = sadd.s32 4294967295, %s1021_s22   ;;  %p864_p0 = scmp.ge.s32.totalorder %s1021_s22, 1  ;;  %s1021_s22 = sphi %s1069_s22, %s23_s22  }
   0x8   : > { %p171_p1 = scmp.lt.s32.totalorder %s1021_s22, 3 }
   0xa   : > { %p172_p2 = pnand %p864_p0, %p171_p1 }
   0xb   : > { %s1263_s20 = sld [smem:[#allocation5 + %s1075_s23]] (!%p172_p2)  ;;  %p197_p3 = scmp.lt.s32.totalorder (!%p172_p2), %s1075_s23, 1 }
   0xc   : > { %175 = sbr.rel (%p172_p2) target bundleno = 559 (0x22f), region = 36 }
  0x11   : > { %vm209_vm0 = vcmask 128000   ;;  %v1082_v0 = vld [vmem:[%s1375_s2] sm:$0xf]  ;;  %v1087_v1 = vld [vmem:[%s1375_s2] sm:$0xf0]  ;;  %v1028_v2 = vmov 0.0   ;;  %v264_v27 = vlaneseq }
  0x12   : > { %211 = vst.msk [vmem:[#allocation2 + $0x8] sm:$0x3f] %vm209_vm0, %v1028_v2  ;;  %v1093_v3 = vld [vmem:[%s1375_s2 + $0x8] sm:$0xf]  ;;  %v1098_v4 = vld [vmem:[%s1375_s2 + $0x8] sm:$0xf0] }
  0x13   : > { %210 = vst.msk [vmem:[#allocation2] sm:$0x3f] %vm209_vm0, %v1028_v2  ;;  %v1104_v5 = vld [vmem:[%s1375_s2 + $0x10] sm:$0xf]  ;;  %v1109_v6 = vld [vmem:[%s1375_s2 + $0x10] sm:$0xf0] }
  0x14   : > { %212 = vst.msk [vmem:[#allocation2 + $0x10] sm:$0x3f] %vm209_vm0, %v1028_v2  ;;  %v1115_v7 = vld [vmem:[%s1375_s2 + $0x18] sm:$0xf]  ;;  %v1120_v8 = vld [vmem:[%s1375_s2 + $0x18] sm:$0xf0] }
  0x15   : > { %213 = vst.msk [vmem:[#allocation2 + $0x18] sm:$0x3f] %vm209_vm0, %v1028_v2  ;;  %v1126_v9 = vld [vmem:[%s1375_s2 + $0x20] sm:$0xf]  ;;  %v1131_v10 = vld [vmem:[%s1375_s2 + $0x20] sm:$0xf0] }
  0x16   : > { %214 = vst.msk [vmem:[#allocation2 + $0x20] sm:$0x3f] %vm209_vm0, %v1028_v2  ;;  %v1137_v11 = vld [vmem:[%s1375_s2 + $0x28] sm:$0xf]  ;;  %v1142_v12 = vld [vmem:[%s1375_s2 + $0x28] sm:$0xf0] }
  0x17   : > { %215 = vst.msk [vmem:[#allocation2 + $0x28] sm:$0x3f] %vm209_vm0, %v1028_v2  ;;  %v1148_v13 = vld [vmem:[%s1375_s2 + $0x30] sm:$0xf]  ;;  %v1153_v14 = vld [vmem:[%s1375_s2 + $0x30] sm:$0xf0] }
  0x18   : > { %v1158_v15 = vld [vmem:[%s1375_s2 + $0x38] sm:$0xf]  ;;  %v1163_v16 = vld [vmem:[%s1375_s2 + $0x38] sm:$0xf0]  ;;  %v1168_v17 = vld [vmem:[%s1375_s2 + $0x40] sm:$0xf] }
  0x19   : > { %v1173_v18 = vld [vmem:[%s1375_s2 + $0x40] sm:$0xf0]  ;;  %v1178_v19 = vld [vmem:[%s1377_s4] sm:$0xf]  ;;  %v1188_v21 = vld [vmem:[%s1377_s4 + $0x8] sm:$0xf] }
  0x1a   : > { %v1183_v20 = vld [vmem:[%s1377_s4] sm:$0xf0]  ;;  %v1193_v22 = vld [vmem:[%s1377_s4 + $0x8] sm:$0xf0]  ;;  %v1198_v23 = vld [vmem:[%s1377_s4 + $0x10] sm:$0xf] }
  0x1b   : > { %v1203_v24 = vld [vmem:[%s1377_s4 + $0x10] sm:$0xf0]  ;;  %v1208_v25 = vld [vmem:[%s1377_s4 + $0x18] sm:$0xf]  ;;  %v1213_v26 = vld [vmem:[%s1377_s4 + $0x18] sm:$0xf0] }
  0x1c   : > { %v1218_v28 = vld [vmem:[%s1377_s4 + $0x20] sm:$0xf]  ;;  %v1223_v29 = vld [vmem:[%s1377_s4 + $0x20] sm:$0xf0]  ;;  %v1228_v30 = vld [vmem:[%s1377_s4 + $0x28] sm:$0xf] }
  0x1d   : > { %v1233_v31 = vld [vmem:[%s1377_s4 + $0x28] sm:$0xf0]  ;;  %v1238_v32 = vld [vmem:[%s1377_s4 + $0x30] sm:$0xf]  ;;  %v1243_v33 = vld [vmem:[%s1377_s4 + $0x30] sm:$0xf0] }
  0x1e   : > { %v1248_v34 = vld [vmem:[%s1377_s4 + $0x38] sm:$0xf]  ;;  %v1253_v35 = vld [vmem:[%s1377_s4 + $0x38] sm:$0xf0]  ;;  %v1258_v36 = vld [vmem:[%s1376_s3] ss:$0 sm:$0xff] }
  0x1f   : > { %v1260_v37 = vshrl.u32 %v264_v27, 7  ;;  %s1380_s23 = smov (!%p197_p3, %s1075_s23), 1  ;;  %vm221_vm1 = vcmask 125952  }
  0x20   : > { %s950_s21 = sshll.u32 %s1380_s23, 4  ;;  %s1282_s23 = smov 0  }
  0x21   : > { %v1267_v38 = vadd.s32 8, %v1260_v37  ;;  %s201_s25 = scalar_lea.vmem %s1374_s1, %s950_s21  ;;  %s1276_s28 = scalar_lea.vmem %s1378_s5, %s950_s21 }
  0x22   : > { %v216_v39 = vld [vmem:[%s201_s25] sm:$0xf]  ;;  %v217_v40 = vld [vmem:[%s201_s25 + $0x4] sm:$0xf]  ;;  %v218_v41 = vld [vmem:[%s201_s25 + $0x8] sm:$0xf] }
  0x23   : > { %222 = vst.msk [vmem:[#allocation2 + $0x9] sm:$0xf] %vm221_vm1, %v216_v39  ;;  %v219_v42 = vld [vmem:[%s201_s25 + $0xc] sm:$0xf] }
  0x24   : > { %223 = vst.msk [vmem:[#allocation2 + $0x11] sm:$0xf] %vm221_vm1, %v217_v40 }
  0x25   : > { %224 = vst.msk [vmem:[#allocation2 + $0x19] sm:$0xf] %vm221_vm1, %v218_v41 }
  0x26   : > { %225 = vst.msk [vmem:[#allocation2 + $0x21] sm:$0xf] %vm221_vm1, %v219_v42 }
  0x27 LB: >> { %vm286_vm2 = vcmask 122880   ;;  %s1029_s29 = smov 16   ;;  %s1030_s30 = smov 32   ;;  %vm357_vm3 = vcmask 257152   ;;  %vm389_vm4 = vcmask 388352   ;;  %vm421_vm5 = vcmask 519552   ;;  %s1025_s23 = sphi %s1282_s23, %s272_s23  }
  0x28   : >> { %s1031_s6 = smov 48   ;;  %s1032_s7 = smov 64   ;;  %vm453_vm6 = vcmask 650752   ;;  %vm485_vm7 = vcmask 781952   ;;  %vm640_vm8 = vcmask 130048   ;;  %vm517_vm9 = vcmask 913152  }
  0x29   : >> { %s1033_s8 = smov 80   ;;  %s1034_s9 = smov 96   ;;  %vm549_vm10 = vcmask 1044352  }
  0x2a   : >> { %v281_v49 = vld [vmem:[#allocation2 + $0xa] sm:$0x1]  ;;  %v294_v50 = vld [vmem:[#allocation2 + $0xb] sm:$0x1]  ;;  %s1035_s10 = smov 112  }
  0x2b   : >> { %v282_v44 = vld [vmem:[#allocation2 + $0x12] sm:$0x1]  ;;  %v295_v47 = vld [vmem:[#allocation2 + $0x13] sm:$0x1]  ;;  %288 = vst.msk [vmem:[#allocation2 + $0x8] sm:$0x1] %vm286_vm2, %v281_v49 }
  0x2c   : >> { %v277_v43 = vld [vmem:[#allocation2 + $0x18] sm:$0x3f]  ;;  %v274_v45 = vld [vmem:[#allocation2 + $0x10] sm:$0x3f]  ;;  %300 = vst.msk [vmem:[#allocation2 + $0xd] sm:$0x1] %vm286_vm2, %v294_v50 }
  0x2d   : >> { %v283_v46 = vld [vmem:[#allocation2 + $0x1a] sm:$0x1]  ;;  %289 = vst.msk [vmem:[#allocation2 + $0x10] sm:$0x1] %vm286_vm2, %v282_v44  ;;  %v296_v48 = vld [vmem:[#allocation2 + $0x1b] sm:$0x1] }
  0x2e   : >> { %290 = vst.msk [vmem:[#allocation2 + $0x18] sm:$0x1] %vm286_vm2, %v283_v46  ;;  %v284_v54 = vld [vmem:[#allocation2 + $0x22] sm:$0x1]  ;;  %v330_v57 = vld [vmem:[#allocation2 + $0x11] sm:$0xf] }
  0x2f   : >> { %275 = vst.msk [vmem:[#allocation2] sm:$0x3f] %vm209_vm0, %v274_v45  ;;  %v331_v58 = vld [vmem:[#allocation2 + $0x19] sm:$0xf]  ;;  %v297_v61 = vld [vmem:[#allocation2 + $0x23] sm:$0x1] }
  0x30   : >> { %279 = vst.msk [vmem:[#allocation2 + $0x28] sm:$0x3f] %vm209_vm0, %v277_v43  ;;  %v329_v2 = vld [vmem:[#allocation2 + $0x9] sm:$0xf]  ;;  %s742_s11 = smul.u32 2246822507, %s1025_s23 }
  0x31   : >> { %301 = vst.msk [vmem:[#allocation2 + $0x15] sm:$0x1] %vm286_vm2, %v295_v47  ;;  %s272_s23 = sadd.s32 1, %s1025_s23  }
  0x32   : >> { %302 = vst.msk [vmem:[#allocation2 + $0x1d] sm:$0x1] %vm286_vm2, %v296_v48  ;;  %v306_v56 = vld [vmem:[#allocation2 + $0x8] sm:$0xf]  ;;  %p269_p4 = scmp.ge.s32.totalorder %s272_s23, 48  }
  0x33   : >> { %291 = vst.msk [vmem:[#allocation2 + $0x20] sm:$0x1] %vm286_vm2, %v284_v54  ;;  %v361_v47 = vld [vmem:[#allocation2 + $0xa] sm:$0xf] }
  0x34   : >> { %v307_v51 = vld [vmem:[#allocation2 + $0x10] sm:$0xf]  ;;  %315 = vst [vmem:[#allocation1 + $0x1] ss:$2 sm:$0xff] %v306_v56  ;;  %v392_v54 = vld [vmem:[#allocation2 + $0x8] sm:$0xf] }
  0x35   : >> { %v308_v52 = vld [vmem:[#allocation2 + $0x18] sm:$0xf]  ;;  %317 = vst [vmem:[#allocation1 + $0x10] ss:$2 sm:$0xff] %v307_v51 }
  0x36   : >> { %319 = vst [vmem:[#allocation1 + $0x11] ss:$2 sm:$0xff] %v308_v52  ;;  %v280_v53 = vld [vmem:[#allocation2 + $0x2] sm:$0x1]  ;;  %v293_v55 = vld [vmem:[#allocation2 + $0x3] sm:$0x1] }
  0x37   : >> { %287 = vst.msk [vmem:[#allocation2] sm:$0x1] %vm286_vm2, %v280_v53  ;;  %v328_v39 = vld [vmem:[#allocation2 + $0x1] sm:$0xf]  ;;  %v394_v42 = vld [vmem:[#allocation2 + $0x18] sm:$0xf] }
  0x38   : >> { %299 = vst.msk [vmem:[#allocation2 + $0x5] sm:$0x1] %vm286_vm2, %v293_v55  ;;  %v362_v62 = vld [vmem:[#allocation2 + $0x12] sm:$0xf]  ;;  %v285_v48 = vld [vmem:[#allocation2 + $0x2a] sm:$0x1] }
  0x39   : >> { %303 = vst.msk [vmem:[#allocation2 + $0x25] sm:$0x1] %vm286_vm2, %v297_v61  ;;  %v363_v63 = vld [vmem:[#allocation2 + $0x1a] sm:$0xf]  ;;  %v427_v52 = vld [vmem:[#allocation2 + $0x21] sm:$0xf] }
  0x3a   : >> { %v395_v43 = vld [vmem:[#allocation2 + $0x20] sm:$0xf]  ;;  %292 = vst.msk [vmem:[#allocation2 + $0x28] sm:$0x1] %vm286_vm2, %v285_v48  ;;  %v426_v51 = vld [vmem:[#allocation2 + $0x19] sm:$0xf] }
  0x3b   : >> { %v393_v55 = vld [vmem:[#allocation2 + $0x10] sm:$0xf] }
  0x3d   : >> { %v1298_v59 = vld.sshfl [vmem:[#allocation1 + $0x10] sm:$0xff pattern:$0x75316420] }
  0x3e   : >> { %340 = vst [vmem:[#allocation1 + $0x10] ss:$2 sm:$0xff] %v330_v57  ;;  %v305_v60 = vld [vmem:[#allocation2] sm:$0xf] }
  0x3f   : >> { %342 = vst [vmem:[#allocation1 + $0x11] ss:$2 sm:$0xff] %v331_v58  ;;  %v360_v45 = vld [vmem:[#allocation2 + $0x2] sm:$0xf]  ;;  %v458_v58 = vld [vmem:[#allocation2 + $0x1a] sm:$0xf] }
  0x40   : >> { %313 = vst [vmem:[#allocation1] ss:$2 sm:$0xff] %v305_v60  ;;  %v459_v60 = vld [vmem:[#allocation2 + $0x22] sm:$0xf] }
  0x46   : >> { %v344_v27 = vld.sshfl [vmem:[#allocation1 + $0x10] sm:$0xff pattern:$0x75316420] }
  0x47   : >> { %v348_v40 = vpack.c.bf16 %v344_v27, %v344_v27  ;;  %372 = vst [vmem:[#allocation1 + $0x10] ss:$2 sm:$0xff] %v362_v62  ;;  %v1301_v41 = vld.sshfl [vmem:[#allocation1] sm:$0xff pattern:$0x75316420] }
  0x48   : >> { %374 = vst [vmem:[#allocation1 + $0x11] ss:$2 sm:$0xff] %v363_v63  ;;  %v424_v62 = vld [vmem:[#allocation2 + $0x9] sm:$0xf]  ;;  %v425_v27 = vld [vmem:[#allocation2 + $0x11] sm:$0xf] }
  0x49   : >> { %353 = vrot.lane.b32.xlu0 %v348_v40, %s1029_s29  ;;  %336 = vst [vmem:[#allocation1] ss:$2 sm:$0xff] %v328_v39  ;;  %v298_v39 = vld [vmem:[#allocation2 + $0x2b] sm:$0x1] }
  0x4a   : >> { %338 = vst [vmem:[#allocation1 + $0x1] ss:$2 sm:$0xff] %v329_v2 }
  0x4b   : >> { %304 = vst.msk [vmem:[#allocation2 + $0x2d] sm:$0x1] %vm286_vm2, %v298_v39 }
  0x4f   : >> { %v376_v44 = vld.sshfl [vmem:[#allocation1 + $0x10] sm:$0xff pattern:$0x75316420] }
  0x50   : >> { %v380_v46 = vpack.c.bf16 %v376_v44, %v376_v44  ;;  %404 = vst [vmem:[#allocation1 + $0x10] ss:$2 sm:$0xff] %v394_v42  ;;  %v490_v42 = vld [vmem:[#allocation2 + $0x20] sm:$0xf]  ;;  %v456_v44 = vld [vmem:[#allocation2 + $0xa] sm:$0xf] }
  0x51   : >> { %v343_v49 = vld.sshfl [vmem:[#allocation1] sm:$0xff pattern:$0x75316420]  ;;  %406 = vst [vmem:[#allocation1 + $0x11] ss:$2 sm:$0xff] %v395_v43 }
  0x52   : >> { %385 = vrot.lane.b32.xlu1 %v380_v46, %s1030_s30  ;;  %v347_v50 = vpack.c.bf16 %v343_v49, %v343_v49  ;;  %368 = vst [vmem:[#allocation1] ss:$2 sm:$0xff] %v360_v45  ;;  %v491_v43 = vld [vmem:[#allocation2 + $0x28] sm:$0xf] }
  0x53   : >> { %370 = vst [vmem:[#allocation1 + $0x1] ss:$2 sm:$0xff] %v361_v47  ;;  %v457_v47 = vld [vmem:[#allocation2 + $0x12] sm:$0xf] }
  0x54   : >> { %351 = vrot.lane.b32.xlu0 %v347_v50, %s1029_s29  ;;  %v522_v50 = vld [vmem:[#allocation2 + $0x21] sm:$0xf] }
  0x58   : >> { %v408_v53 = vld.sshfl [vmem:[#allocation1 + $0x10] sm:$0xff pattern:$0x75316420] }
  0x59   : >> { %436 = vst [vmem:[#allocation1 + $0x10] ss:$2 sm:$0xff] %v426_v51  ;;  %v412_v63 = vpack.c.bf16 %v408_v53, %v408_v53  ;;  %v523_v51 = vld [vmem:[#allocation2 + $0x29] sm:$0xf] }
  0x5a   : >> { %v375_v56 = vld.sshfl [vmem:[#allocation1] sm:$0xff pattern:$0x75316420]  ;;  %438 = vst [vmem:[#allocation1 + $0x11] ss:$2 sm:$0xff] %v427_v52 }
  0x5b   : >> { %v379_v57 = vpack.c.bf16 %v375_v56, %v375_v56  ;;  %400 = vst [vmem:[#allocation1] ss:$2 sm:$0xff] %v392_v54  ;;  %417 = vrot.lane.b32.xlu2 %v412_v63, %s1031_s6  ;;  %v488_v52 = vld [vmem:[#allocation2 + $0x10] sm:$0xf] }
  0x5c   : >> { %402 = vst [vmem:[#allocation1 + $0x1] ss:$2 sm:$0xff] %v393_v55  ;;  %v489_v55 = vld [vmem:[#allocation2 + $0x18] sm:$0xf] }
  0x5d   : >> { %383 = vrot.lane.b32.xlu1 %v379_v57, %s1030_s30 }
  0x61   : >> { %v440_v61 = vld.sshfl [vmem:[#allocation1 + $0x10] sm:$0xff pattern:$0x75316420] }
  0x62   : >> { %v444_v2 = vpack.c.bf16 %v440_v61, %v440_v61  ;;  %468 = vst [vmem:[#allocation1 + $0x10] ss:$2 sm:$0xff] %v458_v58  ;;  %v554_v58 = vld [vmem:[#allocation2 + $0x22] sm:$0xf]  ;;  %v520_v61 = vld [vmem:[#allocation2 + $0x11] sm:$0xf] }
  0x63   : >> { %470 = vst [vmem:[#allocation1 + $0x11] ss:$2 sm:$0xff] %v459_v60  ;;  %v407_v40 = vld.sshfl [vmem:[#allocation1] sm:$0xff pattern:$0x75316420] }
  0x64   : >> { %432 = vst [vmem:[#allocation1] ss:$2 sm:$0xff] %v424_v62  ;;  %v411_v46 = vpack.c.bf16 %v407_v40, %v407_v40  ;;  %v555_v60 = vld [vmem:[#allocation2 + $0x2a] sm:$0xf] }
  0x65   : >> { %449 = vrot.lane.b32.xlu1 %v444_v2, %s1032_s7  ;;  %434 = vst [vmem:[#allocation1 + $0x1] ss:$2 sm:$0xff] %v425_v27  ;;  %v521_v2 = vld [vmem:[#allocation2 + $0x19] sm:$0xf] }
  0x66   : >> { %415 = vrot.lane.b32.xlu2 %v411_v46, %s1031_s6  ;;  %v325_v46 = vpack.c.bf16 %v1298_v59, %v1298_v59  ;;  %v900_v59 = vor.u32 %v1142_v12, %v1137_v11 }
  0x68   : >> { %327 = vst.msk [vmem:[#allocation3 + $0x8] sm:$0xf] %vm221_vm1, %v325_v46  ;;  %v945_v46 = vor.u32 %v1253_v35, %v1248_v34 }
  0x6a   : >> { %v472_v45 = vld.sshfl [vmem:[#allocation1 + $0x10] sm:$0xff pattern:$0x75316420]  ;;  %723 = vmatpush.bf16.msra.mxu2 %v945_v46  ;;  %v737_v46 = vmul.u32 2654435769, %v1260_v37 }
  0x6b   : >> { %500 = vst [vmem:[#allocation1 + $0x10] ss:$2 sm:$0xff] %v490_v42  ;;  %v476_v53 = vpack.c.bf16 %v472_v45, %v472_v45  ;;  %v552_v42 = vld [vmem:[#allocation2 + $0x12] sm:$0xf] }
  0x6c   : >> { %v439_v48 = vld.sshfl [vmem:[#allocation1] sm:$0xff pattern:$0x75316420]  ;;  %502 = vst [vmem:[#allocation1 + $0x11] ss:$2 sm:$0xff] %v491_v43 }
  0x6d   : >> { %v443_v49 = vpack.c.bf16 %v439_v48, %v439_v48  ;;  %464 = vst [vmem:[#allocation1] ss:$2 sm:$0xff] %v456_v44  ;;  %v553_v43 = vld [vmem:[#allocation2 + $0x1a] sm:$0xf]  ;;  %v908_v48 = vor.u32 %v1163_v16, %v1158_v15 }
  0x6e   : >> { %466 = vst [vmem:[#allocation1 + $0x1] ss:$2 sm:$0xff] %v457_v47  ;;  %v324_v47 = vpack.c.bf16 %v1301_v41, %v1301_v41 }
  0x6f   : >> { %447 = vrot.lane.b32.xlu0 %v443_v49, %s1032_s7  ;;  %644 = vmatpush.bf16.msra.mxu0 %v908_v48  ;;  %v904_v49 = vor.u32 %v1153_v14, %v1148_v13 }
  0x70   : >> { %326 = vst.msk [vmem:[#allocation3] sm:$0xf] %vm221_vm1, %v324_v47 }
  0x73   : >> { %v504_v54 = vld.sshfl [vmem:[#allocation1 + $0x10] sm:$0xff pattern:$0x75316420]  ;;  %645 = vmatpush.bf16.msra.mxu0 %v904_v49  ;;  %v941_v49 = vor.u32 %v1243_v33, %v1238_v32 }
  0x74   : >> { %532 = vst [vmem:[#allocation1 + $0x10] ss:$2 sm:$0xff] %v522_v50  ;;  %v508_v63 = vpack.c.bf16 %v504_v54, %v504_v54 }
  0x75   : >> { %v471_v56 = vld.sshfl [vmem:[#allocation1] sm:$0xff pattern:$0x75316420]  ;;  %534 = vst [vmem:[#allocation1 + $0x11] ss:$2 sm:$0xff] %v523_v51  ;;  %724 = vmatpush.bf16.msra.mxu2 %v941_v49  ;;  %v743_v49 = vstv %s742_s11 }
  0x76   : >> { %496 = vst [vmem:[#allocation1] ss:$2 sm:$0xff] %v488_v52  ;;  %v475_v57 = vpack.c.bf16 %v471_v56, %v471_v56  ;;  %v896_v52 = vor.u32 %v1131_v10, %v1126_v9  ;;  %v892_v56 = vor.u32 %v1120_v8, %v1115_v7 }
  0x77   : >> { %498 = vst [vmem:[#allocation1 + $0x1] ss:$2 sm:$0xff] %v489_v55  ;;  %481 = vrot.lane.b32.xlu0 %v476_v53, %s1033_s8  ;;  %646 = vmatpush.bf16.msra.mxu0 %v900_v59 }
  0x78   : >> { %479 = vrot.lane.b32.xlu2 %v475_v57, %s1033_s8 }
  0x7b   : >> { %647 = vmatpush.bf16.msra.mxu0 %v896_v52 }
  0x7c   : >> { %v536_v62 = vld.sshfl [vmem:[#allocation1 + $0x10] sm:$0xff pattern:$0x75316420] }
  0x7d   : >> { %564 = vst [vmem:[#allocation1 + $0x10] ss:$2 sm:$0xff] %v554_v58  ;;  %v540_v40 = vpack.c.bf16 %v536_v62, %v536_v62 }
  0x7e   : >> { %v503_v27 = vld.sshfl [vmem:[#allocation1] sm:$0xff pattern:$0x75316420]  ;;  %566 = vst [vmem:[#allocation1 + $0x11] ss:$2 sm:$0xff] %v555_v60 }
  0x7f   : >> { %v507_v39 = vpack.c.bf16 %v503_v27, %v503_v27  ;;  %528 = vst [vmem:[#allocation1] ss:$2 sm:$0xff] %v520_v61  ;;  %648 = vmatpush.bf16.msra.mxu0 %v892_v56  ;;  %v888_v61 = vor.u32 %v1109_v6, %v1104_v5  ;;  %v884_v27 = vor.u32 %v1098_v4, %v1093_v3 }
  0x80   : >> { %530 = vst [vmem:[#allocation1 + $0x1] ss:$2 sm:$0xff] %v521_v2  ;;  %513 = vrot.lane.b32.xlu2 %v508_v63, %s1034_s9  ;;  %v912_v2 = vor.u32 %v1173_v18, %v1168_v17  ;;  %v929_v56 = vor.u32 %v1213_v26, %v1208_v25 }
  0x81   : >> { %511 = vrot.lane.b32.xlu1 %v507_v39, %s1034_s9 }
  0x82   : >> { %665 = vmatpush.bf16.msra.mxu1 %v912_v2 }
  0x83   : >> { %649 = vmatpush.bf16.msra.mxu0 %v888_v61 }
  0x85   : >> { %v568_v58 = vld.sshfl [vmem:[#allocation1 + $0x10] sm:$0xff pattern:$0x75316420] }
  0x86   : >> { %v572_v62 = vpack.c.bf16 %v568_v58, %v568_v58  ;;  %v921_v58 = vor.u32 %v1193_v22, %v1188_v21 }
  0x87   : >> { %v535_v44 = vld.sshfl [vmem:[#allocation1] sm:$0xff pattern:$0x75316420]  ;;  %650 = vmatpush.bf16.msra.mxu0 %v884_v27 }
  0x88   : >> { %v539_v45 = vpack.c.bf16 %v535_v44, %v535_v44  ;;  %560 = vst [vmem:[#allocation1] ss:$2 sm:$0xff] %v552_v42  ;;  %v880_v42 = vor.u32 %v1087_v1, %v1082_v0 }
  0x89   : >> { %545 = vrot.lane.b32.xlu1 %v540_v40, %s1035_s10  ;;  %562 = vst [vmem:[#allocation1 + $0x1] ss:$2 sm:$0xff] %v553_v43 }
  0x8a   : >> { %543 = vrot.lane.b32.xlu0 %v539_v45, %s1035_s10  ;;  %574 = vst.msk [vmem:[#allocation3 + $0xc] sm:$0xf] %vm221_vm1, %v572_v62 }
  0x8b   : >> { %651 = vmatpush.bf16.msra.mxu0 %v880_v42 }
  0x90   : >> { %v567_v57 = vld.sshfl [vmem:[#allocation1] sm:$0xff pattern:$0x75316420] }
  0x91   : >> { %v571_v60 = vpack.c.bf16 %v567_v57, %v567_v57  ;;  %v873_v43 = vld [vmem:[#allocation3 + $0x8] sm:$0xf0]  ;;  %v925_v57 = vor.u32 %v1203_v24, %v1198_v23 }
  0x93   : >> { %573 = vst.msk [vmem:[#allocation3 + $0x4] sm:$0xf] %vm221_vm1, %v571_v60  ;;  %v917_v60 = vor.u32 %v1183_v20, %v1178_v19 }
  0x9a   : >> { %v969_v40 = vld [vmem:[#allocation3 + $0x4] sm:$0xf] }
  0x9b   : >> { %v876_v45 = vor.u32 %v969_v40, %v873_v43 }
  0x9d   : >> { %913 = vmatmul.msk.bf16.vlgmr.msra.gmra.mxu1 %vm640_vm8, %v876_v45 }
  0xb5   : >> { %v418_v51 = vpop.permute.xlu2 %417 }
  0xbb   : >> { %v354_v50 = vpop.permute.xlu0 %353 }
  0xbc   : >> { %359 = vst.msk [vmem:[#allocation3 + $0x8] sm:$0xf] %vm357_vm3, %v354_v50 }
  0xc0   : >> { %v416_v54 = vpop.permute.xlu2 %415 }
  0xc4   : >> { %v386_v41 = vpop.permute.xlu1 %385 }
  0xc5   : >> { %391 = vst.msk [vmem:[#allocation3 + $0x8] sm:$0xf] %vm389_vm4, %v386_v41 }
  0xc6   : >> { %423 = vst.msk [vmem:[#allocation3 + $0x8] sm:$0xf] %vm421_vm5, %v418_v51  ;;  %v352_v53 = vpop.permute.xlu0 %351 }
  0xc7   : >> { %358 = vst.msk [vmem:[#allocation3] sm:$0xf] %vm357_vm3, %v352_v53 }
  0xcf   : >> { %v384_v55 = vpop.permute.xlu1 %383 }
  0xd0   : >> { %390 = vst.msk [vmem:[#allocation3] sm:$0xf] %vm389_vm4, %v384_v55  ;;  %v933_v55 = vor.u32 %v1223_v29, %v1218_v28 }
  0xd1   : >> { %422 = vst.msk [vmem:[#allocation3] sm:$0xf] %vm421_vm5, %v416_v54  ;;  %v937_v54 = vor.u32 %v1233_v31, %v1228_v30 }
  0xd2   : >> { %v480_v39 = vpop.permute.xlu2 %479 }
  0xd3   : >> { %725 = vmatpush.bf16.msra.mxu2 %v937_v54 }
  0xd7   : >> { %v450_v63 = vpop.permute.xlu1 %449  ;;  %726 = vmatpush.bf16.msra.mxu2 %v933_v55 }
  0xd8   : >> { %455 = vst.msk [vmem:[#allocation3 + $0x8] sm:$0xf] %vm453_vm6, %v450_v63 }
  0xda   : >> { %v514_v47 = vpop.permute.xlu2 %513 }
  0xdb   : >> { %727 = vmatpush.bf16.msra.mxu2 %v929_v56 }
  0xdf   : >> { %728 = vmatpush.bf16.msra.mxu2 %v925_v57 }
  0xe1   : >> { %v448_v44 = vpop.permute.xlu0 %447 }
  0xe2   : >> { %454 = vst.msk [vmem:[#allocation3] sm:$0xf] %vm453_vm6, %v448_v44 }
  0xe3   : >> { %486 = vst.msk [vmem:[#allocation3] sm:$0xf] %vm485_vm7, %v480_v39  ;;  %729 = vmatpush.bf16.msra.mxu2 %v921_v58 }
  0xe7   : >> { %730 = vmatpush.bf16.msra.mxu2 %v917_v60 }
  0xe9   : >> { %v482_v48 = vpop.permute.xlu0 %481 }
  0xea   : >> { %487 = vst.msk [vmem:[#allocation3 + $0x8] sm:$0xf] %vm485_vm7, %v482_v48 }
  0xeb   : >> { %519 = vst.msk [vmem:[#allocation3 + $0x8] sm:$0xf] %vm517_vm9, %v514_v47  ;;  %v739_v47 = vstv %s1263_s20 }
  0xec   : >> { %v740_v48 = vadd.s32 %v739_v47, %v737_v46 }
  0xf3   : >> { %v512_v50 = vpop.permute.xlu1 %511 }
  0xf4   : >> { %518 = vst.msk [vmem:[#allocation3] sm:$0xf] %vm517_vm9, %v512_v50  ;;  %v744_v50 = vadd.s32 %v743_v49, %v740_v48 }
  0xfb   : >> { %v546_v59 = vpop.permute.xlu1 %545 }
  0xfc   : >> { %551 = vst.msk [vmem:[#allocation3 + $0x8] sm:$0xf] %vm549_vm10, %v546_v59  ;;  %v544_v51 = vpop.permute.xlu0 %543  ;;  %v738_v59 = vmul.u32 2654435769, %v1267_v38 }
  0xfd   : >> { %550 = vst.msk [vmem:[#allocation3] sm:$0xf] %vm549_vm10, %v544_v51  ;;  %v746_v51 = vshrl.u32 %v744_v50, 16 }
 0x103   : >> { %v970_v41 = vld [vmem:[#allocation3 + $0x4] sm:$0xf0] }
 0x104   : >> { %v871_v52 = vld [vmem:[#allocation3] sm:$0xf] }
 0x105   : >> { %v872_v53 = vor.u32 %v970_v41, %v871_v52  ;;  %v741_v41 = vadd.s32 %v739_v47, %v738_v59  ;;  %v748_v52 = vxor.u32 %v746_v51, %v744_v50  ;;  %v775_v47 = vld [vmem:[#allocation2 + $0x11] sm:$0xf]  ;;  %v776_v51 = vld [vmem:[#allocation2 + $0x19] sm:$0xf] }
 0x107   : >> { %652 = vmatmul.bf16.vlgmr.msra.gmra.mxu0 %v872_v53  ;;  %v745_v53 = vadd.s32 %v743_v49, %v741_v41  ;;  %v750_v54 = vmul.u32 2146121005, %v748_v52 }
 0x109   : >> { %v747_v55 = vshrl.u32 %v745_v53, 16  ;;  %v752_v56 = vshrl.u32 %v750_v54, 15 }
 0x10b   : >> { %v749_v57 = vxor.u32 %v747_v55, %v745_v53  ;;  %v754_v58 = vxor.u32 %v752_v56, %v750_v54  ;;  %v777_v53 = vld [vmem:[#allocation2 + $0x21] sm:$0xf] }
 0x10d   : >> { %v751_v60 = vmul.u32 2146121005, %v749_v57 }
 0x11a   : >> { %v667_v61 = vpop.f32.mrf.mxu1 }
 0x122   : >> { %v669_v40 = vpop.f32.mrf.mxu1 }
 0x184   : >> { %v653_v62 = vpop.f32.mrf.mxu0 }
 0x185   : >> { %v654_v63 = vadd.f32 %v1258_v36, %v653_v62  ;;  %v753_v62 = vshrl.u32 %v751_v60, 15 }
 0x187   : >> { %v668_v27 = vadd.f32 %v667_v61, %v654_v63  ;;  %v756_v61 = vmul.u32 2221713035, %v754_v58 }
 0x189   : >> { %v672_v43 = vmax.f32 %v668_v27, 0.0  ;;  %v758_v63 = vshrl.u32 %v756_v61, 16 }
 0x18b   : >> { %v760_v27 = vxor.u32 %v758_v63, %v756_v61 }
 0x18c   : >> { %v655_v2 = vpop.f32.mrf.mxu0 }
 0x18d   : >> { %v656_v39 = vadd.f32 %v1258_v36, %v655_v2  ;;  %v755_v2 = vxor.u32 %v753_v62, %v751_v60 }
 0x18f   : >> { %v670_v42 = vadd.f32 %v669_v40, %v656_v39  ;;  %v757_v39 = vmul.u32 2221713035, %v755_v2  ;;  %v946_v40 = vxor.u32 2147483648, %v760_v27 }
 0x191   : >> { %v673_v44 = vmax.f32 %v670_v42, 0.0  ;;  %v759_v42 = vshrl.u32 %v757_v39, 16  ;;  %vm764_vm11 = vcmp.gt.s32.totalorder %v946_v40, 0 }
 0x193   : >> { %v674_v45 = vpack.c.bf16 %v673_v44, %v672_v43  ;;  %v761_v43 = vxor.u32 %v759_v42, %v757_v39  ;;  %v774_v44 = vld [vmem:[#allocation2 + $0x9] sm:$0xf] }
 0x195   : >> { %731 = vmatmul.bf16.vlgmr.msra.gmra.mxu2 %v674_v45  ;;  %v947_v50 = vxor.u32 2147483648, %v761_v43 }
 0x197   : >> { %vm767_vm12 = vcmp.gt.s32.totalorder %v947_v50, 0 }
 0x218   : >> { %v732_v45 = vpop.f32.mrf.mxu2 }
 0x219   : >> { %v772_v46 = vsel %vm764_vm11, %v732_v45, 0.0 }
 0x21a   : >> { %v780_v48 = vrot.slane %v772_v46, 4  ;;  %v784_v49 = vadd.f32 %v774_v44, %v772_v46 }
 0x21c   : >> { %v785_v59 = vadd.f32 %v780_v48, %v775_v47  ;;  %788 = vst.msk [vmem:[#allocation2 + $0x9] sm:$0xf] %vm221_vm1, %v784_v49 }
 0x21e   : >> { %789 = vst.msk [vmem:[#allocation2 + $0x11] sm:$0xf] %vm221_vm1, %v785_v59 }
 0x220   : >> { %v734_v41 = vpop.f32.mrf.mxu2 }
 0x221   : >> { %v773_v52 = vsel %vm767_vm12, %v734_v41, 0.0 }
 0x222   : >> { %v781_v54 = vrot.slane %v773_v52, 4  ;;  %v786_v55 = vadd.f32 %v776_v51, %v773_v52  ;;  %271 = sbr.rel (!%p269_p4) target bundleno = 39 (0x27), region = 104 }
 0x223   : > { %v792_v57 = vld [vmem:[#allocation2 + $0x9] sm:$0xf] (%p269_p4) }
 0x224   : >> { %v787_v56 = vadd.f32 %v781_v54, %v777_v53  ;;  %790 = vst.msk [vmem:[#allocation2 + $0x19] sm:$0xf] %vm221_vm1, %v786_v55 }
 0x225   : > { %v793_v58 = vld [vmem:[#allocation2 + $0x11] sm:$0xf] (%p269_p4)  ;;  %796 = vst.msk [vmem:[%s1276_s28] sm:$0xf] (%p269_p4), %vm221_vm1, %v792_v57 }
 0x226   : >> { %791 = vst.msk [vmem:[#allocation2 + $0x21] sm:$0xf] %vm221_vm1, %v787_v56 }
 0x227   : > { %797 = vst.msk [vmem:[%s1276_s28 + $0x4] sm:$0xf] %vm221_vm1, %v793_v58 }
 0x22b   : > { %v794_v60 = vld [vmem:[#allocation2 + $0x19] sm:$0xf] }
 0x22c   : > { %798 = vst.msk [vmem:[%s1276_s28 + $0x8] sm:$0xf] %vm221_vm1, %v794_v60 }
 0x22d   : > { %v795_v61 = vld [vmem:[#allocation2 + $0x21] sm:$0xf] }
 0x22e   : > { %799 = vst.msk [vmem:[%s1276_s28 + $0xc] sm:$0xf] %vm221_vm1, %v795_v61 }
 0x22f PF: > { %s23_s22 = sadd.s32 1, %s1021_s22  }
 0x230   : > { %p20_p5 = scmp.ge.s32.totalorder %s23_s22, 4  }
 0x232   :  { %22 = sbr.rel (!%p20_p5) target bundleno = 7 (0x7), region = 115 }

// kernel: mednca_highres_forward.33
= control target key start
LH: loop header
LB: loop body
LE: loop exit
PB: predicated region body
PF: predicated region fallthrough
CT: control target
= control target key end

     0   :  { %s4050_s21 = smov [#allocation5]   ;;  %s5999_s0 = inlined_call_operand.vmem [shape: s32[2], index: 0, kind: input, shape index: {}]   ;;  %s6000_s1 = inlined_call_operand.vmem [shape: f32[2,16,16,16], index: 1, kind: input, shape index: {}]   ;;  %s6001_s2 = inlined_call_operand.vmem [shape: bf16[144,128], index: 2, kind: input, shape index: {}]   ;;  %s6002_s3 = inlined_call_operand.vmem [shape: f32[1,128], index: 3, kind: input, shape index: {}]   ;;  %s6003_s4 = inlined_call_operand.vmem [shape: bf16[128,16], index: 4, kind: input, shape index: {}]   ;;  %s6004_s5 = inlined_call_operand.vmem [shape: f32[2,16,16,16], index: 5, kind: output, shape index: {}]  }
   0x1   :  { %s11_s20 = sshll.u32 %s5999_s0, 4  ;;  %s12_s20 = int_to_ptr.vmem [resolvable:$true] %s11_s20 }
   0x2   :  { %14 = dma.vmem_to_smem %s12_s20, 16, %s4050_s21, [#allocation4] }
   0x3   :  { %4040 = dma.done.wait [#allocation4], 16 }
   0x4   :  { %4041 = vsyncadd [#allocation4], 4294967280 }
   0x5   :  { %17 = sfence }
   0x6   :  { %s4092_s22 = smov 0  }
   0x7 LB: > { %s3671_s23 = sadd.s32 4294967295, %s4044_s22   ;;  %p3675_p0 = scmp.ge.s32.totalorder %s4044_s22, 1  ;;  %s4044_s22 = sphi %s4092_s22, %s23_s22  }
   0x8   : > { %p171_p1 = scmp.lt.s32.totalorder %s4044_s22, 3 }
   0xa   : > { %p172_p2 = pnand %p3675_p0, %p171_p1 }
   0xc   : > { %175 = sbr.rel (%p172_p2) target bundleno = 1176 (0x498), region = 36 }
  0x11   : > { %vm209_vm0 = vcmask 130048   ;;  %v368_v0 = vlaneseq  ;;  %s4100_s0 = sld [smem:[#allocation5 + %s3671_s23]]  ;;  %p197_p3 = scmp.lt.s32.totalorder %s3671_s23, 1  ;;  %v4051_v1 = vmov 0.0   ;;  %v4117_v3 = vld [vmem:[%s6001_s2] sm:$0xf] }
  0x12   : > { %214 = vst.msk [vmem:[#allocation2 + $0x18] sm:$0xff] %vm209_vm0, %v4051_v1  ;;  %v4122_v4 = vld [vmem:[%s6001_s2] sm:$0xf0]  ;;  %v4132_v6 = vld [vmem:[%s6001_s2 + $0x8] sm:$0xf]  ;;  %vm212_vm1 = vcmask 123904  }
  0x13   : > { %210 = vst.msk [vmem:[#allocation2] sm:$0xff] %vm209_vm0, %v4051_v1  ;;  %v4106_v2 = vshrl.u32 %v368_v0, 7  ;;  %s6125_s23 = smov (!%p197_p3, %s3671_s23), 1  ;;  %v4137_v7 = vld [vmem:[%s6001_s2 + $0x8] sm:$0xf0] }
  0x14   : > { %211 = vst.msk [vmem:[#allocation2 + $0x8] sm:$0xff] %vm209_vm0, %v4051_v1  ;;  %v4147_v9 = vld [vmem:[%s6001_s2 + $0x10] sm:$0xf]  ;;  %v4152_v10 = vld [vmem:[%s6001_s2 + $0x10] sm:$0xf0]  ;;  %s3926_s25 = sshll.u32 %s6125_s23, 8 }
  0x15   : > { %6014 = vst [vmem:[#allocation7_spill] sm:$0xff] %v4106_v2  ;;  %v4125_v5 = vadd.s32 8, %v4106_v2  ;;  %v4140_v8 = vadd.s32 16, %v4106_v2  ;;  %v4155_v11 = vadd.s32 24, %v4106_v2  ;;  %v4162_v12 = vld [vmem:[%s6001_s2 + $0x18] sm:$0xf]  ;;  %s4417_s28 = scalar_lea.vmem %s6004_s5, %s3926_s25  ;;  %s4485_s6 = scalar_lea.vmem %s6000_s1, %s3926_s25 }
  0x16   : > { %215 = vst.msk [vmem:[#allocation2 + $0x20] sm:$0xff] %vm209_vm0, %v4051_v1  ;;  %v4167_v13 = vld [vmem:[%s6001_s2 + $0x18] sm:$0xf0]  ;;  %v4170_v14 = vadd.s32 32, %v4106_v2  ;;  %v4177_v15 = vld [vmem:[%s6001_s2 + $0x20] sm:$0xf] }
  0x17   : > { %6015 = vst [vmem:[#allocation8_spill] sm:$0xff] %v4125_v5  ;;  %v4182_v16 = vld [vmem:[%s6001_s2 + $0x20] sm:$0xf0]  ;;  %v4185_v17 = vadd.s32 40, %v4106_v2  ;;  %v4192_v18 = vld [vmem:[%s6001_s2 + $0x28] sm:$0xf] }
  0x18   : > { %217 = vst.msk [vmem:[#allocation2 + $0x30] sm:$0xff] %vm209_vm0, %v4051_v1  ;;  %v4197_v19 = vld [vmem:[%s6001_s2 + $0x28] sm:$0xf0]  ;;  %v4200_v20 = vadd.s32 48, %v4106_v2  ;;  %v4207_v21 = vld [vmem:[%s6001_s2 + $0x30] sm:$0xf] }
  0x19   : > { %6016 = vst [vmem:[#allocation9_spill] sm:$0xff] %v4140_v8  ;;  %v4212_v22 = vld [vmem:[%s6001_s2 + $0x30] sm:$0xf0]  ;;  %v4215_v23 = vadd.s32 56, %v4106_v2  ;;  %v4222_v24 = vld [vmem:[%s6001_s2 + $0x38] sm:$0xf] }
  0x1a   : > { %218 = vst.msk [vmem:[#allocation2 + $0x38] sm:$0xff] %vm209_vm0, %v4051_v1  ;;  %v4227_v25 = vld [vmem:[%s6001_s2 + $0x38] sm:$0xf0]  ;;  %v4230_v26 = vadd.s32 64, %v4106_v2  ;;  %v4237_v27 = vld [vmem:[%s6001_s2 + $0x40] sm:$0xf] }
  0x1b   : > { %6017 = vst [vmem:[#allocation10_spill] sm:$0xff] %v4155_v11  ;;  %v4242_v28 = vld [vmem:[%s6001_s2 + $0x40] sm:$0xf0]  ;;  %v4245_v29 = vadd.s32 72, %v4106_v2  ;;  %v4252_v30 = vld [vmem:[%s6003_s4] sm:$0xf] }
  0x1c   : > { %220 = vst.msk [vmem:[#allocation2 + $0x48] sm:$0xff] %vm209_vm0, %v4051_v1  ;;  %v4257_v31 = vld [vmem:[%s6003_s4] sm:$0xf0]  ;;  %v4260_v32 = vadd.s32 80, %v4106_v2  ;;  %v4267_v33 = vld [vmem:[%s6003_s4 + $0x8] sm:$0xf] }
  0x1d   : > { %6018 = vst [vmem:[#allocation11_spill] sm:$0xff] %v4170_v14  ;;  %v4272_v34 = vld [vmem:[%s6003_s4 + $0x8] sm:$0xf0]  ;;  %v4275_v35 = vadd.s32 88, %v4106_v2  ;;  %v4282_v36 = vld [vmem:[%s6003_s4 + $0x10] sm:$0xf] }
  0x1e   : > { %221 = vst.msk [vmem:[#allocation2 + $0x50] sm:$0xff] %vm209_vm0, %v4051_v1  ;;  %v4287_v37 = vld [vmem:[%s6003_s4 + $0x10] sm:$0xf0]  ;;  %v4290_v38 = vadd.s32 96, %v4106_v2  ;;  %v4297_v39 = vld [vmem:[%s6003_s4 + $0x18] sm:$0xf] }
  0x1f   : > { %6019 = vst [vmem:[#allocation12_spill] sm:$0xff] %v4185_v17  ;;  %v4302_v40 = vld [vmem:[%s6003_s4 + $0x18] sm:$0xf0]  ;;  %v4305_v41 = vadd.s32 104, %v4106_v2  ;;  %v4312_v42 = vld [vmem:[%s6003_s4 + $0x20] sm:$0xf] }
  0x20   : > { %223 = vst.msk [vmem:[#allocation2 + $0x60] sm:$0xff] %vm209_vm0, %v4051_v1  ;;  %v4317_v43 = vld [vmem:[%s6003_s4 + $0x20] sm:$0xf0]  ;;  %v4320_v44 = vadd.s32 112, %v4106_v2  ;;  %v4327_v45 = vld [vmem:[%s6003_s4 + $0x28] sm:$0xf] }
  0x21   : > { %6020 = vst [vmem:[#allocation13_spill] sm:$0xff] %v4200_v20  ;;  %v4332_v46 = vld [vmem:[%s6003_s4 + $0x28] sm:$0xf0]  ;;  %v4335_v47 = vadd.s32 120, %v4106_v2  ;;  %v4342_v48 = vld [vmem:[%s6003_s4 + $0x30] sm:$0xf] }
  0x22   : > { %224 = vst.msk [vmem:[#allocation2 + $0x68] sm:$0xff] %vm209_vm0, %v4051_v1  ;;  %v4347_v49 = vld [vmem:[%s6003_s4 + $0x30] sm:$0xf0]  ;;  %v4350_v50 = vadd.s32 128, %v4106_v2  ;;  %v4357_v51 = vld [vmem:[%s6003_s4 + $0x38] sm:$0xf] }
  0x23   : > { %6021 = vst [vmem:[#allocation14_spill] sm:$0xff] %v4215_v23  ;;  %v4362_v52 = vld [vmem:[%s6003_s4 + $0x38] sm:$0xf0]  ;;  %v4365_v53 = vadd.s32 136, %v4106_v2  ;;  %v4372_v54 = vld [vmem:[%s6002_s3] ss:$0 sm:$0xff] }
  0x24   : > { %226 = vst.msk [vmem:[#allocation2 + $0x78] sm:$0xff] %vm209_vm0, %v4051_v1  ;;  %v4375_v55 = vadd.s32 144, %v4106_v2  ;;  %v4378_v56 = vadd.s32 152, %v4106_v2  ;;  %v4381_v57 = vadd.s32 160, %v4106_v2  ;;  %v4386_v58 = vadd.s32 168, %v4106_v2  ;;  %s4561_s23 = smov 0  }
  0x25   : > { %6022 = vst [vmem:[#allocation15_spill] sm:$0xff] %v4230_v26  ;;  %v4389_v59 = vadd.s32 176, %v4106_v2  ;;  %v4392_v60 = vadd.s32 184, %v4106_v2  ;;  %v4395_v61 = vadd.s32 192, %v4106_v2  ;;  %v4401_v62 = vadd.s32 200, %v4106_v2 }
  0x26   : > { %227 = vst.msk [vmem:[#allocation2 + $0x80] sm:$0xff] %vm209_vm0, %v4051_v1  ;;  %v4404_v63 = vadd.s32 208, %v4106_v2  ;;  %v4407_v0 = vadd.s32 216, %v4106_v2 }
  0x27   : > { %6023 = vst [vmem:[#allocation16_spill] sm:$0xff] %v4245_v29 }
  0x28   : > { %229 = vst.msk [vmem:[#allocation2 + $0x90] sm:$0xff] %vm209_vm0, %v4051_v1 }
  0x29   : > { %6024 = vst [vmem:[#allocation17_spill] sm:$0xff] %v4252_v30 }
  0x2a   : > { %6025 = vst [vmem:[#allocation18_spill] sm:$0xff] %v4257_v31 }
  0x2b   : > { %6026 = vst [vmem:[#allocation19_spill] sm:$0xff] %v4260_v32 }
  0x2c   : > { %230 = vst.msk [vmem:[#allocation2 + $0x98] sm:$0xff] %vm209_vm0, %v4051_v1 }
  0x2d   : > { %6027 = vst [vmem:[#allocation20_spill] sm:$0xff] %v4267_v33 }
  0x2e   : > { %6028 = vst [vmem:[#allocation21_spill] sm:$0xff] %v4272_v34 }
  0x2f   : > { %6029 = vst [vmem:[#allocation22_spill] sm:$0xff] %v4275_v35 }
  0x30   : > { %232 = vst.msk [vmem:[#allocation2 + $0xa8] sm:$0xff] %vm209_vm0, %v4051_v1 }
  0x31   : > { %6030 = vst [vmem:[#allocation23_spill] sm:$0xff] %v4282_v36 }
  0x32   : > { %6031 = vst [vmem:[#allocation24_spill] sm:$0xff] %v4287_v37 }
  0x33   : > { %6032 = vst [vmem:[#allocation25_spill] sm:$0xff] %v4290_v38 }
  0x34   : > { %233 = vst.msk [vmem:[#allocation2 + $0xb0] sm:$0xff] %vm209_vm0, %v4051_v1 }
  0x35   : > { %6033 = vst [vmem:[#allocation26_spill] sm:$0xff] %v4297_v39 }
  0x36   : > { %6034 = vst [vmem:[#allocation27_spill] sm:$0xff] %v4302_v40 }
  0x37   : > { %6035 = vst [vmem:[#allocation28_spill] sm:$0xff] %v4305_v41 }
  0x38   : > { %235 = vst.msk [vmem:[#allocation2 + $0xc0] sm:$0xff] %vm209_vm0, %v4051_v1 }
  0x39   : > { %6036 = vst [vmem:[#allocation29_spill] sm:$0xff] %v4312_v42 }
  0x3a   : > { %6037 = vst [vmem:[#allocation30_spill] sm:$0xff] %v4317_v43 }
  0x3b   : > { %6038 = vst [vmem:[#allocation31_spill] sm:$0xff] %v4320_v44 }
  0x3c   : > { %236 = vst.msk [vmem:[#allocation2 + $0xc8] sm:$0xff] %vm209_vm0, %v4051_v1 }
  0x3d   : > { %6039 = vst [vmem:[#allocation32_spill] sm:$0xff] %v4327_v45 }
  0x3e   : > { %6040 = vst [vmem:[#allocation33_spill] sm:$0xff] %v4332_v46 }
  0x3f   : > { %6041 = vst [vmem:[#allocation34_spill] sm:$0xff] %v4335_v47 }
  0x40   : > { %238 = vst.msk [vmem:[#allocation2 + $0xd8] sm:$0xff] %vm209_vm0, %v4051_v1 }
  0x41   : > { %6042 = vst [vmem:[#allocation35_spill] sm:$0xff] %v4342_v48 }
  0x42   : > { %6043 = vst [vmem:[#allocation36_spill] sm:$0xff] %v4347_v49 }
  0x43   : > { %6044 = vst [vmem:[#allocation37_spill] sm:$0xff] %v4350_v50  ;;  %v291_v50 = vld [vmem:[%s4485_s6 + $0xd0] sm:$0xff] }
  0x44   : > { %239 = vst.msk [vmem:[#allocation2 + $0xe0] sm:$0xff] %vm209_vm0, %v4051_v1 }
  0x45   : > { %6045 = vst [vmem:[#allocation38_spill] sm:$0xff] %v4357_v51 }
  0x46   : > { %6046 = vst [vmem:[#allocation39_spill] sm:$0xff] %v4362_v52 }
  0x47   : > { %6047 = vst [vmem:[#allocation40_spill] sm:$0xff] %v4365_v53  ;;  %v271_v53 = vld [vmem:[%s4485_s6 + $0x30] sm:$0xff] }
  0x48   : > { %241 = vst.msk [vmem:[#allocation2 + $0xf0] sm:$0xff] %vm209_vm0, %v4051_v1 }
  0x49   : > { %6048 = vst [vmem:[#allocation41_spill] sm:$0xff] %v4372_v54 }
  0x4a   : > { %6049 = vst [vmem:[#allocation42_spill] sm:$0xff] %v4375_v55  ;;  %v270_v55 = vld [vmem:[%s4485_s6 + $0x28] sm:$0xff] }
  0x4b   : > { %6050 = vst [vmem:[#allocation43_spill] sm:$0xff] %v4378_v56  ;;  %v268_v56 = vld [vmem:[%s4485_s6 + $0x18] sm:$0xff] }
  0x4c   : > { %6051 = vst [vmem:[#allocation44_spill] sm:$0xff] %v4381_v57  ;;  %v4428_v57 = vadd.s32 248, %v4106_v2 }
  0x4d   : > { %242 = vst.msk [vmem:[#allocation2 + $0xf8] sm:$0xff] %vm209_vm0, %v4051_v1 }
  0x4e   : > { %6052 = vst [vmem:[#allocation45_spill] sm:$0xff] %v4386_v58  ;;  %v4425_v58 = vadd.s32 240, %v4106_v2 }
  0x4f   : > { %6053 = vst [vmem:[#allocation46_spill] sm:$0xff] %v4389_v59  ;;  %v4410_v59 = vadd.s32 224, %v4106_v2 }
  0x50   : > { %6054 = vst [vmem:[#allocation47_spill] sm:$0xff] %v4392_v60  ;;  %v4422_v60 = vadd.s32 232, %v4106_v2 }
  0x51   : > { %6055 = vst [vmem:[#allocation48_spill] sm:$0xff] %v4395_v61 }
  0x52   : > { %244 = vst.msk [vmem:[#allocation2 + $0x108] sm:$0xff] %vm209_vm0, %v4051_v1 }
  0x53   : > { %6056 = vst [vmem:[#allocation49_spill] sm:$0xff] %v4401_v62 }
  0x54   : > { %6057 = vst [vmem:[#allocation50_spill] sm:$0xff] %v4404_v63 }
  0x55   : > { %6058 = vst [vmem:[#allocation51_spill] sm:$0xff] %v4407_v0  ;;  %v295_v0 = vld [vmem:[%s4485_s6 + $0xf0] sm:$0xff] }
  0x56   : > { %6059 = vst [vmem:[#allocation52_spill] sm:$0xff] %v4410_v59  ;;  %v269_v59 = vld [vmem:[%s4485_s6 + $0x20] sm:$0xff] }
  0x57   : > { %245 = vst.msk [vmem:[#allocation2 + $0x110] sm:$0xff] %vm209_vm0, %v4051_v1 }
  0x58   : > { %6060 = vst [vmem:[#allocation53_spill] sm:$0xff] %v4422_v60  ;;  %v267_v60 = vld [vmem:[%s4485_s6 + $0x10] sm:$0xff] }
  0x59   : > { %6061 = vst [vmem:[#allocation54_spill] sm:$0xff] %v4425_v58  ;;  %v266_v58 = vld [vmem:[%s4485_s6 + $0x8] sm:$0xff] }
  0x5a   : > { %6062 = vst [vmem:[#allocation55_spill] sm:$0xff] %v4428_v57  ;;  %v265_v57 = vld [vmem:[%s4485_s6] sm:$0xff] }
  0x5b   : > { %247 = vst.msk [vmem:[#allocation2 + $0x120] sm:$0xff] %vm209_vm0, %v4051_v1 }
  0x5c   : > { %248 = vst.msk [vmem:[#allocation2 + $0x128] sm:$0xff] %vm209_vm0, %v4051_v1 }
  0x5d   : > { %250 = vst.msk [vmem:[#allocation2 + $0x138] sm:$0xff] %vm209_vm0, %v4051_v1 }
  0x5e   : > { %251 = vst.msk [vmem:[#allocation2 + $0x140] sm:$0xff] %vm209_vm0, %v4051_v1 }
  0x5f   : > { %253 = vst.msk [vmem:[#allocation2 + $0x150] sm:$0xff] %vm209_vm0, %v4051_v1 }
  0x60   : > { %254 = vst.msk [vmem:[#allocation2 + $0x158] sm:$0xff] %vm209_vm0, %v4051_v1 }
  0x61   : > { %256 = vst.msk [vmem:[#allocation2 + $0x168] sm:$0xff] %vm209_vm0, %v4051_v1 }
  0x62   : > { %257 = vst.msk [vmem:[#allocation2 + $0x170] sm:$0xff] %vm209_vm0, %v4051_v1 }
  0x63   : > { %259 = vst.msk [vmem:[#allocation2 + $0x180] sm:$0xff] %vm209_vm0, %v4051_v1 }
  0x64   : > { %260 = vst.msk [vmem:[#allocation2 + $0x188] sm:$0xff] %vm209_vm0, %v4051_v1 }
  0x65   : > { %262 = vst.msk [vmem:[#allocation2 + $0x198] sm:$0xff] %vm209_vm0, %v4051_v1 }
  0x66   : > { %263 = vst.msk [vmem:[#allocation2 + $0x1a0] sm:$0xff] %vm209_vm0, %v4051_v1 }
  0x67   : > { %216 = vst.msk [vmem:[#allocation2 + $0x28] sm:$0x3] %vm212_vm1, %v4051_v1 }
  0x68   : > { %213 = vst.msk [vmem:[#allocation2 + $0x10] sm:$0x3] %vm212_vm1, %v4051_v1 }
  0x69   : > { %219 = vst.msk [vmem:[#allocation2 + $0x40] sm:$0x3] %vm212_vm1, %v4051_v1 }
  0x6a   : > { %222 = vst.msk [vmem:[#allocation2 + $0x58] sm:$0x3] %vm212_vm1, %v4051_v1 }
  0x6b   : > { %225 = vst.msk [vmem:[#allocation2 + $0x70] sm:$0x3] %vm212_vm1, %v4051_v1 }
  0x6c   : > { %228 = vst.msk [vmem:[#allocation2 + $0x88] sm:$0x3] %vm212_vm1, %v4051_v1 }
  0x6d   : > { %231 = vst.msk [vmem:[#allocation2 + $0xa0] sm:$0x3] %vm212_vm1, %v4051_v1 }
  0x6e   : > { %234 = vst.msk [vmem:[#allocation2 + $0xb8] sm:$0x3] %vm212_vm1, %v4051_v1 }
  0x6f   : > { %237 = vst.msk [vmem:[#allocation2 + $0xd0] sm:$0x3] %vm212_vm1, %v4051_v1 }
  0x70   : > { %240 = vst.msk [vmem:[#allocation2 + $0xe8] sm:$0x3] %vm212_vm1, %v4051_v1 }
  0x71   : > { %243 = vst.msk [vmem:[#allocation2 + $0x100] sm:$0x3] %vm212_vm1, %v4051_v1 }
  0x72   : > { %246 = vst.msk [vmem:[#allocation2 + $0x118] sm:$0x3] %vm212_vm1, %v4051_v1 }
  0x73   : > { %249 = vst.msk [vmem:[#allocation2 + $0x130] sm:$0x3] %vm212_vm1, %v4051_v1 }
  0x74   : > { %252 = vst.msk [vmem:[#allocation2 + $0x148] sm:$0x3] %vm212_vm1, %v4051_v1 }
  0x75   : > { %255 = vst.msk [vmem:[#allocation2 + $0x160] sm:$0x3] %vm212_vm1, %v4051_v1 }
  0x76   : > { %258 = vst.msk [vmem:[#allocation2 + $0x178] sm:$0x3] %vm212_vm1, %v4051_v1 }
  0x77   : > { %261 = vst.msk [vmem:[#allocation2 + $0x190] sm:$0x3] %vm212_vm1, %v4051_v1 }
  0x78   : > { %264 = vst.msk [vmem:[#allocation2 + $0x1a8] sm:$0x3] %vm212_vm1, %v4051_v1  ;;  %v272_v1 = vld [vmem:[%s4485_s6 + $0x38] sm:$0xff] }
  0x79   : > { %298 = vst.msk [vmem:[#allocation2 + $0x19] sm:$0xff] %vm209_vm0, %v265_v57  ;;  %v273_v57 = vld [vmem:[%s4485_s6 + $0x40] sm:$0xff] }
  0x7a   : > { %299 = vst.msk [vmem:[#allocation2 + $0x21] sm:$0xff] %vm209_vm0, %v266_v58  ;;  %v274_v58 = vld [vmem:[%s4485_s6 + $0x48] sm:$0xff] }
  0x7b   : > { %300 = vst.msk [vmem:[#allocation2 + $0x31] sm:$0xff] %vm209_vm0, %v267_v60  ;;  %v275_v60 = vld [vmem:[%s4485_s6 + $0x50] sm:$0xff] }
  0x7c   : > { %301 = vst.msk [vmem:[#allocation2 + $0x39] sm:$0xff] %vm209_vm0, %v268_v56  ;;  %v276_v56 = vld [vmem:[%s4485_s6 + $0x58] sm:$0xff] }
  0x7d   : > { %302 = vst.msk [vmem:[#allocation2 + $0x49] sm:$0xff] %vm209_vm0, %v269_v59  ;;  %v277_v59 = vld [vmem:[%s4485_s6 + $0x60] sm:$0xff] }
  0x7e   : > { %303 = vst.msk [vmem:[#allocation2 + $0x51] sm:$0xff] %vm209_vm0, %v270_v55  ;;  %v278_v55 = vld [vmem:[%s4485_s6 + $0x68] sm:$0xff] }
  0x7f   : > { %304 = vst.msk [vmem:[#allocation2 + $0x61] sm:$0xff] %vm209_vm0, %v271_v53  ;;  %v279_v53 = vld [vmem:[%s4485_s6 + $0x70] sm:$0xff] }
  0x80   : > { %305 = vst.msk [vmem:[#allocation2 + $0x69] sm:$0xff] %vm209_vm0, %v272_v1  ;;  %v280_v1 = vld [vmem:[%s4485_s6 + $0x78] sm:$0xff] }
  0x81   : > { %306 = vst.msk [vmem:[#allocation2 + $0x79] sm:$0xff] %vm209_vm0, %v273_v57  ;;  %v281_v57 = vld [vmem:[%s4485_s6 + $0x80] sm:$0xff] }
  0x82   : > { %307 = vst.msk [vmem:[#allocation2 + $0x81] sm:$0xff] %vm209_vm0, %v274_v58  ;;  %v282_v58 = vld [vmem:[%s4485_s6 + $0x88] sm:$0xff] }
  0x83   : > { %308 = vst.msk [vmem:[#allocation2 + $0x91] sm:$0xff] %vm209_vm0, %v275_v60  ;;  %v283_v60 = vld [vmem:[%s4485_s6 + $0x90] sm:$0xff] }
  0x84   : > { %309 = vst.msk [vmem:[#allocation2 + $0x99] sm:$0xff] %vm209_vm0, %v276_v56  ;;  %v284_v56 = vld [vmem:[%s4485_s6 + $0x98] sm:$0xff] }
  0x85   : > { %310 = vst.msk [vmem:[#allocation2 + $0xa9] sm:$0xff] %vm209_vm0, %v277_v59  ;;  %v285_v59 = vld [vmem:[%s4485_s6 + $0xa0] sm:$0xff] }
  0x86   : > { %311 = vst.msk [vmem:[#allocation2 + $0xb1] sm:$0xff] %vm209_vm0, %v278_v55  ;;  %v286_v55 = vld [vmem:[%s4485_s6 + $0xa8] sm:$0xff] }
  0x87   : > { %312 = vst.msk [vmem:[#allocation2 + $0xc1] sm:$0xff] %vm209_vm0, %v279_v53  ;;  %v287_v53 = vld [vmem:[%s4485_s6 + $0xb0] sm:$0xff] }
  0x88   : > { %313 = vst.msk [vmem:[#allocation2 + $0xc9] sm:$0xff] %vm209_vm0, %v280_v1  ;;  %v288_v1 = vld [vmem:[%s4485_s6 + $0xb8] sm:$0xff] }
  0x89   : > { %314 = vst.msk [vmem:[#allocation2 + $0xd9] sm:$0xff] %vm209_vm0, %v281_v57  ;;  %v289_v57 = vld [vmem:[%s4485_s6 + $0xc0] sm:$0xff] }
  0x8a   : > { %315 = vst.msk [vmem:[#allocation2 + $0xe1] sm:$0xff] %vm209_vm0, %v282_v58  ;;  %v290_v58 = vld [vmem:[%s4485_s6 + $0xc8] sm:$0xff] }
  0x8b   : > { %316 = vst.msk [vmem:[#allocation2 + $0xf1] sm:$0xff] %vm209_vm0, %v283_v60  ;;  %v292_v60 = vld [vmem:[%s4485_s6 + $0xd8] sm:$0xff] }
  0x8c   : > { %317 = vst.msk [vmem:[#allocation2 + $0xf9] sm:$0xff] %vm209_vm0, %v284_v56  ;;  %v293_v56 = vld [vmem:[%s4485_s6 + $0xe0] sm:$0xff] }
  0x8d   : > { %318 = vst.msk [vmem:[#allocation2 + $0x109] sm:$0xff] %vm209_vm0, %v285_v59  ;;  %v294_v59 = vld [vmem:[%s4485_s6 + $0xe8] sm:$0xff] }
  0x8e   : > { %319 = vst.msk [vmem:[#allocation2 + $0x111] sm:$0xff] %vm209_vm0, %v286_v55  ;;  %v296_v55 = vld [vmem:[%s4485_s6 + $0xf8] sm:$0xff] }
  0x8f   : > { %320 = vst.msk [vmem:[#allocation2 + $0x121] sm:$0xff] %vm209_vm0, %v287_v53 }
  0x90   : > { %321 = vst.msk [vmem:[#allocation2 + $0x129] sm:$0xff] %vm209_vm0, %v288_v1 }
  0x91   : > { %322 = vst.msk [vmem:[#allocation2 + $0x139] sm:$0xff] %vm209_vm0, %v289_v57 }
  0x92   : > { %323 = vst.msk [vmem:[#allocation2 + $0x141] sm:$0xff] %vm209_vm0, %v290_v58 }
  0x93   : > { %324 = vst.msk [vmem:[#allocation2 + $0x151] sm:$0xff] %vm209_vm0, %v291_v50 }
  0x94   : > { %325 = vst.msk [vmem:[#allocation2 + $0x159] sm:$0xff] %vm209_vm0, %v292_v60 }
  0x95   : > { %326 = vst.msk [vmem:[#allocation2 + $0x169] sm:$0xff] %vm209_vm0, %v293_v56 }
  0x96   : > { %327 = vst.msk [vmem:[#allocation2 + $0x171] sm:$0xff] %vm209_vm0, %v294_v59 }
  0x97   : > { %328 = vst.msk [vmem:[#allocation2 + $0x181] sm:$0xff] %vm209_vm0, %v295_v0 }
  0x98   : > { %329 = vst.msk [vmem:[#allocation2 + $0x189] sm:$0xff] %vm209_vm0, %v296_v55 }
  0x99 LB: >> { %v594_v50 = vld [vmem:[#allocation2 + $0x19] sm:$0xff]  ;;  %v408_v53 = vld [vmem:[#allocation2 + $0x30] sm:$0xff]  ;;  %vm440_vm2 = vcmask 122880   ;;  %s4052_s7 = smov 16   ;;  %v595_v59 = vld [vmem:[#allocation2 + $0x21] sm:$0xff]  ;;  %s4053_s8 = smov 32   ;;  %s4048_s23 = sphi %s4561_s23, %s406_s23  }
  0x9a   : >> { %v4566_v1 = vld [vmem:[#allocation2 + $0x38] sm:$0xff]  ;;  %v4568_v57 = vpack.c.bf16 %v594_v50, %v594_v50  ;;  %411 = vst.msk [vmem:[#allocation2] sm:$0xff] %vm209_vm0, %v408_v53  ;;  %v424_v58 = vld [vmem:[#allocation2 + $0x32] sm:$0x1]  ;;  %v410_v60 = vld [vmem:[#allocation2 + $0x40] sm:$0x3]  ;;  %v4581_v50 = vpack.c.bf16 %v595_v59, %v595_v59 }
  0x9b   : >> { %412 = vst.msk [vmem:[#allocation2 + $0x8] sm:$0xff] %vm209_vm0, %v4566_v1  ;;  %v596_v0 = vld [vmem:[#allocation2 + $0x31] sm:$0xff]  ;;  %v597_v55 = vld [vmem:[#allocation2 + $0x39] sm:$0xff]  ;;  %v609_v32 = vld [vmem:[#allocation2 + $0xc9] sm:$0xff]  ;;  %vm559_vm3 = vcmask 125952   ;;  %vm784_vm4 = vcmask 257152  }
  0x9c   : >> { %692 = vrot.lane.b32.xlu1 %v4568_v57, %s4052_s7  ;;  %443 = vst.msk [vmem:[#allocation2 + $0x30] sm:$0x1] %vm440_vm2, %v424_v58  ;;  %v4576_v56 = vpack.c.bf16 %v596_v0, %v596_v0  ;;  %v4583_v63 = vpack.c.bf16 %v597_v55, %v597_v55  ;;  %v599_v58 = vld [vmem:[#allocation2 + $0x51] sm:$0xff]  ;;  %v602_v55 = vld [vmem:[#allocation2 + $0x79] sm:$0xff]  ;;  %v641_v23 = vpack.c.bf16 %v609_v32, %v609_v32  ;;  %v426_v5 = vld [vmem:[#allocation2 + $0x62] sm:$0x1] }
  0x9d   : >> { %413 = vst.msk [vmem:[#allocation2 + $0x10] sm:$0x3] %vm212_vm1, %v410_v60  ;;  %v600_v60 = vld [vmem:[#allocation2 + $0x61] sm:$0xff]  ;;  %v4590_v47 = vpack.c.bf16 %v599_v58, %v599_v58  ;;  %v4599_v44 = vpack.c.bf16 %v602_v55, %v602_v55  ;;  %v615_v32 = vld [vmem:[#allocation2 + $0x111] sm:$0xff]  ;;  %s4054_s9 = smov 48   ;;  %s4055_s10 = smov 64  }
  0x9e   : >> { %696 = vrot.lane.b32.xlu2 %v4576_v56, %s4052_s7  ;;  %v4592_v59 = vpack.c.bf16 %v600_v60, %v600_v60  ;;  %v606_v60 = vld [vmem:[#allocation2 + $0xa9] sm:$0xff]  ;;  %445 = vst.msk [vmem:[#allocation2 + $0x60] sm:$0x1] %vm440_vm2, %v426_v5  ;;  %v506_v30 = vld [vmem:[#allocation2 + $0x80] sm:$0xff]  ;;  %s4056_s11 = smov 80   ;;  %s4057_s12 = smov 96  }
  0x9f   : >> { %v638_v55 = vpack.c.bf16 %v606_v60, %v606_v60  ;;  %v502_v2 = vld [vmem:[#allocation2 + $0x50] sm:$0xff]  ;;  %v4720_v33 = vpack.c.bf16 %v506_v30, %v506_v30  ;;  %v827_v36 = vld [vmem:[#allocation2 + $0x7a] sm:$0xff]  ;;  %v512_v48 = vld [vmem:[#allocation2 + $0xc8] sm:$0xff]  ;;  %s4058_s13 = smov 112   ;;  %vm1009_vm5 = vcmask 388352   ;;  %vm1234_vm6 = vcmask 519552  }
  0xa0   : >> { %v4696_v54 = vpack.c.bf16 %v502_v2, %v502_v2  ;;  %v831_v30 = vld [vmem:[#allocation2 + $0xaa] sm:$0xff]  ;;  %v4745_v46 = vpack.c.bf16 %v827_v36, %v827_v36  ;;  %vm1459_vm7 = vcmask 650752   ;;  %vm1684_vm8 = vcmask 781952   ;;  %s2969_s14 = smul.u32 2246822507, %s4048_s23  ;;  %s406_s23 = sadd.s32 1, %s4048_s23  }
  0xa1   : >> { %571 = vst.msk [vmem:[#allocation3 + $0x58] sm:$0xf] %vm559_vm3, %v4720_v33  ;;  %v863_v43 = vpack.c.bf16 %v831_v30, %v831_v30  ;;  %vm1909_vm9 = vcmask 913152   ;;  %vm2134_vm10 = vcmask 1044352   ;;  %p403_p4 = scmp.ge.s32.totalorder %s406_s23, 48  }
  0xa2   : >> { %v592_v53 = vld [vmem:[#allocation2 + $0x1] sm:$0xff]  ;;  %v459_v14 = vld [vmem:[#allocation2 + $0xf] sm:$0x1]  ;;  %567 = vst.msk [vmem:[#allocation3 + $0x38] sm:$0xf] %vm559_vm3, %v4696_v54 }
  0xa3   : >> { %v624_v62 = vpack.c.bf16 %v592_v53, %v592_v53  ;;  %v598_v53 = vld [vmem:[#allocation2 + $0x49] sm:$0xff]  ;;  %477 = vst.msk [vmem:[#allocation2 + $0x11] sm:$0x1] %vm440_vm2, %v459_v14  ;;  %v620_v14 = vld [vmem:[#allocation2 + $0x151] sm:$0xff] }
  0xa4   : >> { %694 = vrot.lane.b32.xlu1 %v4581_v50, %s4052_s7  ;;  %v593_v0 = vld [vmem:[#allocation2 + $0x9] sm:$0xff]  ;;  %v4601_v41 = vpack.c.bf16 %v598_v53, %v598_v53  ;;  %v608_v53 = vld [vmem:[#allocation2 + $0xc1] sm:$0xff] }
  0xa5   : >> { %688 = vrot.lane.b32.xlu0 %v624_v62, %s4052_s7  ;;  %v625_v61 = vpack.c.bf16 %v593_v0, %v593_v0  ;;  %v603_v62 = vld [vmem:[#allocation2 + $0x81] sm:$0xff]  ;;  %v605_v0 = vld [vmem:[#allocation2 + $0x99] sm:$0xff]  ;;  %v640_v29 = vpack.c.bf16 %v608_v53, %v608_v53  ;;  %v499_v11 = vld [vmem:[#allocation2 + $0x30] sm:$0xff] }
  0xa6   : >> { %698 = vrot.lane.b32.xlu2 %v4583_v63, %s4052_s7  ;;  %v4603_v58 = vpack.c.bf16 %v603_v62, %v603_v62  ;;  %v637_v38 = vpack.c.bf16 %v605_v0, %v605_v0  ;;  %v604_v62 = vld [vmem:[#allocation2 + $0x91] sm:$0xff]  ;;  %v611_v0 = vld [vmem:[#allocation2 + $0xe1] sm:$0xff]  ;;  %v610_v53 = vld [vmem:[#allocation2 + $0xd9] sm:$0xff] }
  0xa7   : >> { %v636_v26 = vpack.c.bf16 %v604_v62, %v604_v62  ;;  %v643_v60 = vpack.c.bf16 %v611_v0, %v611_v0  ;;  %v642_v62 = vpack.c.bf16 %v610_v53, %v610_v53  ;;  %v617_v0 = vld [vmem:[#allocation2 + $0x129] sm:$0xff]  ;;  %v621_v53 = vld [vmem:[#allocation2 + $0x159] sm:$0xff] }
  0xa8   : >> { %6063 = vst [vmem:[#allocation56_spill] sm:$0xff] %v4603_v58 }
  0xac   : >> { %702 = vrot.lane.b32.xlu1 %v4590_v47, %s4052_s7 }
  0xad   : >> { %690 = vrot.lane.b32.xlu0 %v625_v61, %s4052_s7  ;;  %v601_v61 = vld [vmem:[#allocation2 + $0x69] sm:$0xff] }
  0xae   : >> { %704 = vrot.lane.b32.xlu2 %v4592_v59, %s4052_s7  ;;  %v4611_v35 = vpack.c.bf16 %v601_v61, %v601_v61  ;;  %v607_v61 = vld [vmem:[#allocation2 + $0xb1] sm:$0xff] }
  0xaf   : >> { %v639_v20 = vpack.c.bf16 %v607_v61, %v607_v61  ;;  %v618_v61 = vld [vmem:[#allocation2 + $0x139] sm:$0xff] }
  0xb4   : >> { %708 = vrot.lane.b32.xlu1 %v4599_v44, %s4052_s7 }
  0xb5   : >> { %700 = vrot.lane.b32.xlu0 %v4601_v41, %s4052_s7 }
  0xb6   : >> { %710 = vrot.lane.b32.xlu2 %v4603_v58, %s4052_s7 }
  0xbc   : >> { %714 = vrot.lane.b32.xlu1 %v637_v38, %s4052_s7  ;;  %v612_v38 = vld [vmem:[#allocation2 + $0xf1] sm:$0xff] }
  0xbd   : >> { %706 = vrot.lane.b32.xlu0 %v4611_v35, %s4052_s7  ;;  %v644_v17 = vpack.c.bf16 %v612_v38, %v612_v38 }
  0xbe   : >> { %716 = vrot.lane.b32.xlu2 %v638_v55, %s4052_s7  ;;  %v614_v55 = vld [vmem:[#allocation2 + $0x109] sm:$0xff] }
  0xc4   : >> { %720 = vrot.lane.b32.xlu1 %v640_v29, %s4052_s7  ;;  %v646_v29 = vpack.c.bf16 %v614_v55, %v614_v55  ;;  %v616_v55 = vld [vmem:[#allocation2 + $0x121] sm:$0xff] }
  0xc5   : >> { %712 = vrot.lane.b32.xlu0 %v636_v26, %s4052_s7  ;;  %v647_v26 = vpack.c.bf16 %v615_v32, %v615_v32  ;;  %v652_v32 = vpack.c.bf16 %v620_v14, %v620_v14  ;;  %v821_v14 = vld [vmem:[#allocation2 + $0x32] sm:$0xff] }
  0xc6   : >> { %722 = vrot.lane.b32.xlu2 %v641_v23, %s4052_s7  ;;  %v461_v23 = vld [vmem:[#allocation2 + $0x3f] sm:$0x1] }
  0xc7   : >> { %479 = vst.msk [vmem:[#allocation2 + $0x41] sm:$0x1] %vm440_vm2, %v461_v23  ;;  %v462_v23 = vld [vmem:[#allocation2 + $0x57] sm:$0x1] }
  0xc8   : >> { %480 = vst.msk [vmem:[#allocation2 + $0x59] sm:$0x1] %vm440_vm2, %v462_v23  ;;  %v422_v23 = vld [vmem:[#allocation2 + $0x2] sm:$0x1] }
  0xc9   : >> { %441 = vst.msk [vmem:[#allocation2] sm:$0x1] %vm440_vm2, %v422_v23  ;;  %v463_v23 = vld [vmem:[#allocation2 + $0x6f] sm:$0x1] }
  0xca   : >> { %481 = vst.msk [vmem:[#allocation2 + $0x71] sm:$0x1] %vm440_vm2, %v463_v23 }
  0xcc   : >> { %726 = vrot.lane.b32.xlu1 %v643_v60, %s4052_s7  ;;  %v650_v60 = vpack.c.bf16 %v618_v61, %v618_v61  ;;  %v619_v61 = vld [vmem:[#allocation2 + $0x141] sm:$0xff] }
  0xcd   : >> { %718 = vrot.lane.b32.xlu0 %v639_v20, %s4052_s7  ;;  %v613_v20 = vld [vmem:[#allocation2 + $0xf9] sm:$0xff] }
  0xce   : >> { %728 = vrot.lane.b32.xlu2 %v644_v17, %s4052_s7  ;;  %v649_v17 = vpack.c.bf16 %v617_v0, %v617_v0  ;;  %v645_v38 = vpack.c.bf16 %v613_v20, %v613_v20  ;;  %v460_v0 = vld [vmem:[#allocation2 + $0x27] sm:$0x1]  ;;  %v623_v20 = vld [vmem:[#allocation2 + $0x171] sm:$0xff] }
  0xcf   : >> { %478 = vst.msk [vmem:[#allocation2 + $0x29] sm:$0x1] %vm440_vm2, %v460_v0  ;;  %v622_v0 = vld [vmem:[#allocation2 + $0x169] sm:$0xff]  ;;  %v824_v5 = vld [vmem:[#allocation2 + $0x52] sm:$0xff] }
  0xd0   : >> { %v4718_v34 = vpack.c.bf16 %v824_v5, %v824_v5  ;;  %v428_v5 = vld [vmem:[#allocation2 + $0x92] sm:$0x1] }
  0xd1   : >> { %447 = vst.msk [vmem:[#allocation2 + $0x90] sm:$0x1] %vm440_vm2, %v428_v5  ;;  %v430_v5 = vld [vmem:[#allocation2 + $0xc2] sm:$0x1] }
  0xd2   : >> { %449 = vst.msk [vmem:[#allocation2 + $0xc0] sm:$0x1] %vm440_vm2, %v430_v5  ;;  %v544_v5 = vpack.c.bf16 %v512_v48, %v512_v48 }
  0xd4   : >> { %732 = vrot.lane.b32.xlu1 %v646_v29, %s4052_s7  ;;  %v648_v29 = vpack.c.bf16 %v616_v55, %v616_v55  ;;  %577 = vst.msk [vmem:[#allocation3 + $0x88] sm:$0xf] %vm559_vm3, %v544_v5 }
  0xd5   : >> { %724 = vrot.lane.b32.xlu0 %v642_v62, %s4052_s7  ;;  %v653_v62 = vpack.c.bf16 %v621_v53, %v621_v53  ;;  %v822_v53 = vld [vmem:[#allocation2 + $0x3a] sm:$0xff] }
  0xd6   : >> { %734 = vrot.lane.b32.xlu2 %v647_v26, %s4052_s7  ;;  %v464_v26 = vld [vmem:[#allocation2 + $0x87] sm:$0x1] }
  0xd7   : >> { %482 = vst.msk [vmem:[#allocation2 + $0x89] sm:$0x1] %vm440_vm2, %v464_v26  ;;  %v819_v26 = vld [vmem:[#allocation2 + $0x1a] sm:$0xff] }
  0xd8   : >> { %v507_v30 = vld [vmem:[#allocation2 + $0x90] sm:$0xff] }
  0xdc   : >> { %738 = vrot.lane.b32.xlu1 %v649_v17, %s4052_s7  ;;  %v817_v17 = vld [vmem:[#allocation2 + $0x2] sm:$0xff] }
  0xdd   : >> { %730 = vrot.lane.b32.xlu0 %v645_v38, %s4052_s7  ;;  %v655_v38 = vpack.c.bf16 %v623_v20, %v623_v20  ;;  %v849_v55 = vpack.c.bf16 %v817_v17, %v817_v17  ;;  %v4646_v20 = vpack.c.bf16 %v822_v53, %v822_v53  ;;  %v4650_v17 = vpack.c.bf16 %v819_v26, %v819_v26 }
  0xde   : >> { %740 = vrot.lane.b32.xlu2 %v650_v60, %s4052_s7  ;;  %v651_v60 = vpack.c.bf16 %v619_v61, %v619_v61  ;;  %v820_v61 = vld [vmem:[#allocation2 + $0x22] sm:$0xff] }
  0xdf   : >> { %2232 = vst.msk [vmem:[#allocation3 + $0xc] sm:$0xf] %vm559_vm3, %v4646_v20  ;;  %v828_v2 = vld [vmem:[#allocation2 + $0x82] sm:$0xff] }
  0xe0   : >> { %v4716_v31 = vpack.c.bf16 %v828_v2, %v828_v2  ;;  %v504_v2 = vld [vmem:[#allocation2 + $0x68] sm:$0xff] }
  0xe1   : >> { %v4739_v40 = vpack.c.bf16 %v504_v2, %v504_v2 }
  0xe3   : >> { %569 = vst.msk [vmem:[#allocation3 + $0x48] sm:$0xf] %vm559_vm3, %v4739_v40 }
  0xe4   : >> { %744 = vrot.lane.b32.xlu1 %v652_v32, %s4052_s7  ;;  %v423_v32 = vld [vmem:[#allocation2 + $0x1a] sm:$0x1] }
  0xe5   : >> { %736 = vrot.lane.b32.xlu0 %v648_v29, %s4052_s7  ;;  %v4639_v29 = vpack.c.bf16 %v821_v14, %v821_v14  ;;  %442 = vst.msk [vmem:[#allocation2 + $0x18] sm:$0x1] %vm440_vm2, %v423_v32  ;;  %v823_v14 = vld [vmem:[#allocation2 + $0x4a] sm:$0xff] }
  0xe6   : >> { %746 = vrot.lane.b32.xlu2 %v653_v62, %s4052_s7  ;;  %v4643_v62 = vpack.c.bf16 %v499_v11, %v499_v11  ;;  %v4656_v11 = vpack.c.bf16 %v820_v61, %v820_v61  ;;  %v4661_v32 = vpack.c.bf16 %v823_v14, %v823_v14  ;;  %v818_v61 = vld [vmem:[#allocation2 + $0xa] sm:$0xff] }
  0xe7   : >> { %2231 = vst.msk [vmem:[#allocation3 + $0x4] sm:$0xf] %vm559_vm3, %v4639_v29 }
  0xe8   : >> { %564 = vst.msk [vmem:[#allocation3 + $0x20] sm:$0xf] %vm559_vm3, %v4643_v62 }
  0xe9   : >> { %2233 = vst.msk [vmem:[#allocation3 + $0x14] sm:$0xf] %vm559_vm3, %v4661_v32 }
  0xec   : >> { %750 = vrot.lane.b32.xlu1 %v655_v38, %s4052_s7  ;;  %v654_v38 = vpack.c.bf16 %v622_v0, %v622_v0  ;;  %v497_v53 = vld [vmem:[#allocation2 + $0x18] sm:$0xff]  ;;  %v495_v0 = vld [vmem:[#allocation2] sm:$0xff] }
  0xed   : >> { %742 = vrot.lane.b32.xlu0 %v651_v60, %s4052_s7  ;;  %v465_v60 = vld [vmem:[#allocation2 + $0x9f] sm:$0x1]  ;;  %v4665_v26 = vpack.c.bf16 %v497_v53, %v497_v53  ;;  %v850_v53 = vpack.c.bf16 %v818_v61, %v818_v61  ;;  %v826_v61 = vld [vmem:[#allocation2 + $0x6a] sm:$0xff] }
  0xee   : >> { %913 = vrot.lane.b32.xlu2 %v849_v55, %s4053_s8  ;;  %483 = vst.msk [vmem:[#allocation2 + $0xa1] sm:$0x1] %vm440_vm2, %v465_v60  ;;  %v467_v55 = vld [vmem:[#allocation2 + $0xcf] sm:$0x1]  ;;  %v527_v60 = vpack.c.bf16 %v495_v0, %v495_v0 }
  0xef   : >> { %485 = vst.msk [vmem:[#allocation2 + $0xd1] sm:$0x1] %vm440_vm2, %v467_v55  ;;  %v498_v55 = vld [vmem:[#allocation2 + $0x20] sm:$0xff]  ;;  %v496_v0 = vld [vmem:[#allocation2 + $0x8] sm:$0xff] }
  0xf0   : >> { %562 = vst.msk [vmem:[#allocation3 + $0x10] sm:$0xf] %vm559_vm3, %v4665_v26  ;;  %v4680_v23 = vpack.c.bf16 %v498_v55, %v498_v55  ;;  %v528_v8 = vpack.c.bf16 %v496_v0, %v496_v0  ;;  %v468_v0 = vld [vmem:[#allocation2 + $0xe7] sm:$0x1] }
  0xf1   : >> { %560 = vst.msk [vmem:[#allocation3] sm:$0xf] %vm559_vm3, %v527_v60  ;;  %v425_v60 = vld [vmem:[#allocation2 + $0x4a] sm:$0x1] }
  0xf2   : >> { %563 = vst.msk [vmem:[#allocation3 + $0x18] sm:$0xf] %vm559_vm3, %v4680_v23 }
  0xf3   : >> { %444 = vst.msk [vmem:[#allocation2 + $0x48] sm:$0x1] %vm440_vm2, %v425_v60  ;;  %v466_v60 = vld [vmem:[#allocation2 + $0xb7] sm:$0x1] }
  0xf4   : >> { %917 = vrot.lane.b32.xlu1 %v4650_v17, %s4053_s8  ;;  %561 = vst.msk [vmem:[#allocation3 + $0x8] sm:$0xf] %vm559_vm3, %v528_v8 }
  0xf5   : >> { %748 = vrot.lane.b32.xlu0 %v654_v38, %s4052_s7  ;;  %v4677_v38 = vpack.c.bf16 %v4566_v1, %v4566_v1  ;;  %v825_v1 = vld [vmem:[#allocation2 + $0x62] sm:$0xff]  ;;  %486 = vst.msk [vmem:[#allocation2 + $0xe9] sm:$0x1] %vm440_vm2, %v468_v0 }
  0xf6   : >> { %919 = vrot.lane.b32.xlu2 %v4656_v11, %s4053_s8  ;;  %484 = vst.msk [vmem:[#allocation2 + $0xb9] sm:$0x1] %vm440_vm2, %v466_v60  ;;  %v834_v36 = vld [vmem:[#allocation2 + $0xca] sm:$0xff] }
  0xf7   : >> { %565 = vst.msk [vmem:[#allocation3 + $0x28] sm:$0xf] %vm559_vm3, %v4677_v38 }
  0xf8   : >> { %v697_v14 = vpop.permute.xlu2 %696 }
  0xf9   : >> { %789 = vst.msk [vmem:[#allocation3 + $0x20] sm:$0xf] %vm784_vm4, %v697_v14  ;;  %v4693_v14 = vpack.c.bf16 %v825_v1, %v825_v1  ;;  %v427_v1 = vld [vmem:[#allocation2 + $0x7a] sm:$0x1] }
  0xfa   : >> { %v501_v8 = vld [vmem:[#allocation2 + $0x48] sm:$0xff]  ;;  %446 = vst.msk [vmem:[#allocation2 + $0x78] sm:$0x1] %vm440_vm2, %v427_v1 }
  0xfc   : >> { %923 = vrot.lane.b32.xlu1 %v4646_v20, %s4053_s8 }
  0xfd   : >> { %915 = vrot.lane.b32.xlu0 %v850_v53, %s4053_s8  ;;  %v4698_v53 = vpack.c.bf16 %v826_v61, %v826_v61  ;;  %v4708_v61 = vpack.c.bf16 %v501_v8, %v501_v8  ;;  %v503_v8 = vld [vmem:[#allocation2 + $0x60] sm:$0xff]  ;;  %v832_v39 = vld [vmem:[#allocation2 + $0xb2] sm:$0xff] }
  0xfe   : >> { %925 = vrot.lane.b32.xlu2 %v4661_v32, %s4053_s8  ;;  %v4722_v1 = vpack.c.bf16 %v503_v8, %v503_v8  ;;  %v864_v2 = vpack.c.bf16 %v832_v39, %v832_v39  ;;  %v830_v39 = vld [vmem:[#allocation2 + $0x9a] sm:$0xff] }
  0xff   : >> { %566 = vst.msk [vmem:[#allocation3 + $0x30] sm:$0xf] %vm559_vm3, %v4708_v61  ;;  %v4764_v52 = vpack.c.bf16 %v830_v39, %v830_v39 }
 0x100   : >> { %v699_v55 = vpop.permute.xlu2 %698  ;;  %568 = vst.msk [vmem:[#allocation3 + $0x40] sm:$0xf] %vm559_vm3, %v4722_v1 }
 0x101   : >> { %790 = vst.msk [vmem:[#allocation3 + $0x28] sm:$0xf] %vm784_vm4, %v699_v55  ;;  %v829_v55 = vld [vmem:[#allocation2 + $0x92] sm:$0xff] }
 0x102   : >> { %v4724_v37 = vpack.c.bf16 %v829_v55, %v829_v55  ;;  %v505_v60 = vld [vmem:[#allocation2 + $0x78] sm:$0xff]  ;;  %6066 = vst [vmem:[#allocation59_spill] sm:$0xff] %v4764_v52 }
 0x103   : >> { %v4735_v55 = vpack.c.bf16 %v505_v60, %v505_v60  ;;  %v508_v60 = vld [vmem:[#allocation2 + $0x98] sm:$0xff] }
 0x104   : >> { %929 = vrot.lane.b32.xlu1 %v4693_v14, %s4053_s8  ;;  %6064 = vst [vmem:[#allocation57_spill] sm:$0xff] %v4724_v37  ;;  %v4748_v45 = vpack.c.bf16 %v508_v60, %v508_v60  ;;  %v866_v60 = vpack.c.bf16 %v834_v36, %v834_v36  ;;  %v837_v36 = vld [vmem:[#allocation2 + $0xf2] sm:$0xff] }
 0x105   : >> { %921 = vrot.lane.b32.xlu0 %v4639_v29, %s4053_s8  ;;  %570 = vst.msk [vmem:[#allocation3 + $0x50] sm:$0xf] %vm559_vm3, %v4735_v55 }
 0x106   : >> { %931 = vrot.lane.b32.xlu2 %v4698_v53, %s4053_s8  ;;  %573 = vst.msk [vmem:[#allocation3 + $0x68] sm:$0xf] %vm559_vm3, %v4748_v45 }
 0x108   : >> { %v705_v0 = vpop.permute.xlu2 %704 }
 0x109   : >> { %793 = vst.msk [vmem:[#allocation3 + $0x40] sm:$0xf] %vm784_vm4, %v705_v0  ;;  %v429_v0 = vld [vmem:[#allocation2 + $0xaa] sm:$0x1] }
 0x10a   : >> { %448 = vst.msk [vmem:[#allocation2 + $0xa8] sm:$0x1] %vm440_vm2, %v429_v0 }
 0x10c   : >> { %935 = vrot.lane.b32.xlu1 %v4716_v31, %s4053_s8 }
 0x10d   : >> { %927 = vrot.lane.b32.xlu0 %v4718_v34, %s4053_s8 }
 0x10e   : >> { %v693_v8 = vpop.permute.xlu1 %692  ;;  %937 = vrot.lane.b32.xlu2 %v4724_v37, %s4053_s8 }
 0x10f   : >> { %787 = vst.msk [vmem:[#allocation3 + $0x10] sm:$0xf] %vm784_vm4, %v693_v8  ;;  %v4760_v8 = vpack.c.bf16 %v507_v30, %v507_v30  ;;  %v511_v30 = vld [vmem:[#allocation2 + $0xc0] sm:$0xff] }
 0x110   : >> { %v711_v42 = vpop.permute.xlu2 %710  ;;  %v543_v48 = vpack.c.bf16 %v511_v30, %v511_v30  ;;  %v836_v30 = vld [vmem:[#allocation2 + $0xe2] sm:$0xff] }
 0x111   : >> { %796 = vst.msk [vmem:[#allocation3 + $0x58] sm:$0xf] %vm784_vm4, %v711_v42  ;;  %v509_v51 = vld [vmem:[#allocation2 + $0xa8] sm:$0xff] }
 0x112   : >> { %6065 = vst [vmem:[#allocation58_spill] sm:$0xff] %v4760_v8 }
 0x113   : >> { %572 = vst.msk [vmem:[#allocation3 + $0x60] sm:$0xf] %vm559_vm3, %v4760_v8 }
 0x114   : >> { %941 = vrot.lane.b32.xlu1 %v863_v43, %s4053_s8  ;;  %v835_v43 = vld [vmem:[#allocation2 + $0xda] sm:$0xff]  ;;  %576 = vst.msk [vmem:[#allocation3 + $0x80] sm:$0xf] %vm559_vm3, %v543_v48 }
 0x115   : >> { %933 = vrot.lane.b32.xlu0 %v4745_v46, %s4053_s8  ;;  %v867_v37 = vpack.c.bf16 %v835_v43, %v835_v43 }
 0x116   : >> { %v695_v42 = vpop.permute.xlu1 %694  ;;  %943 = vrot.lane.b32.xlu2 %v864_v2, %s4053_s8  ;;  %v4768_v2 = vpack.c.bf16 %v509_v51, %v509_v51 }
 0x117   : >> { %v689_v0 = vpop.permute.xlu0 %688  ;;  %788 = vst.msk [vmem:[#allocation3 + $0x18] sm:$0xf] %vm784_vm4, %v695_v42  ;;  %v510_v42 = vld [vmem:[#allocation2 + $0xb0] sm:$0xff] }
 0x118   : >> { %785 = vst.msk [vmem:[#allocation3] sm:$0xf] %vm784_vm4, %v689_v0  ;;  %v717_v49 = vpop.permute.xlu2 %716  ;;  %v833_v0 = vld [vmem:[#allocation2 + $0xc2] sm:$0xff]  ;;  %v4779_v43 = vpack.c.bf16 %v510_v42, %v510_v42 }
 0x119   : >> { %6067 = vst [vmem:[#allocation60_spill] sm:$0xff] %v4768_v2  ;;  %v865_v8 = vpack.c.bf16 %v833_v0, %v833_v0  ;;  %v434_v0 = vld [vmem:[#allocation2 + $0x122] sm:$0x1] }
 0x11a   : >> { %574 = vst.msk [vmem:[#allocation3 + $0x70] sm:$0xf] %vm559_vm3, %v4768_v2  ;;  %v432_v2 = vld [vmem:[#allocation2 + $0xf2] sm:$0x1] }
 0x11b   : >> { %799 = vst.msk [vmem:[#allocation3 + $0x70] sm:$0xf] %vm784_vm4, %v717_v49 }
 0x11c   : >> { %947 = vrot.lane.b32.xlu1 %v866_v60, %s4053_s8  ;;  %v869_v60 = vpack.c.bf16 %v837_v36, %v837_v36  ;;  %575 = vst.msk [vmem:[#allocation3 + $0x78] sm:$0xf] %vm559_vm3, %v4779_v43 }
 0x11d   : >> { %939 = vrot.lane.b32.xlu0 %v4764_v52, %s4053_s8  ;;  %v514_v52 = vld [vmem:[#allocation2 + $0xe0] sm:$0xff]  ;;  %451 = vst.msk [vmem:[#allocation2 + $0xf0] sm:$0x1] %vm440_vm2, %v432_v2  ;;  %v518_v2 = vld [vmem:[#allocation2 + $0x110] sm:$0xff] }
 0x11e   : >> { %v703_v39 = vpop.permute.xlu1 %702  ;;  %949 = vrot.lane.b32.xlu2 %v867_v37, %s4053_s8  ;;  %v546_v58 = vpack.c.bf16 %v514_v52, %v514_v52  ;;  %v431_v37 = vld [vmem:[#allocation2 + $0xda] sm:$0x1]  ;;  %v433_v52 = vld [vmem:[#allocation2 + $0x10a] sm:$0x1]  ;;  %453 = vst.msk [vmem:[#allocation2 + $0x120] sm:$0x1] %vm440_vm2, %v434_v0 }
 0x11f   : >> { %v691_v51 = vpop.permute.xlu0 %690  ;;  %792 = vst.msk [vmem:[#allocation3 + $0x38] sm:$0xf] %vm784_vm4, %v703_v39  ;;  %v868_v39 = vpack.c.bf16 %v836_v30, %v836_v30  ;;  %v436_v0 = vld [vmem:[#allocation2 + $0x152] sm:$0x1] }
 0x120   : >> { %786 = vst.msk [vmem:[#allocation3 + $0x8] sm:$0xf] %vm784_vm4, %v691_v51  ;;  %v723_v5 = vpop.permute.xlu2 %722 }
 0x121   : >> { %802 = vst.msk [vmem:[#allocation3 + $0x88] sm:$0xf] %vm784_vm4, %v723_v5  ;;  %v516_v5 = vld [vmem:[#allocation2 + $0xf8] sm:$0xff] }
 0x122   : >> { %579 = vst.msk [vmem:[#allocation3 + $0x98] sm:$0xf] %vm559_vm3, %v546_v58 }
 0x123   : >> { %450 = vst.msk [vmem:[#allocation2 + $0xd8] sm:$0x1] %vm440_vm2, %v431_v37 }
 0x124   : >> { %953 = vrot.lane.b32.xlu1 %v869_v60, %s4053_s8  ;;  %452 = vst.msk [vmem:[#allocation2 + $0x108] sm:$0x1] %vm440_vm2, %v433_v52  ;;  %v515_v58 = vld [vmem:[#allocation2 + $0xf0] sm:$0xff]  ;;  %v548_v52 = vpack.c.bf16 %v516_v5, %v516_v5  ;;  %v522_v5 = vld [vmem:[#allocation2 + $0x140] sm:$0xff] }
 0x125   : >> { %945 = vrot.lane.b32.xlu0 %v865_v8, %s4053_s8  ;;  %v550_v8 = vpack.c.bf16 %v518_v2, %v518_v2  ;;  %v435_v2 = vld [vmem:[#allocation2 + $0x13a] sm:$0x1]  ;;  %455 = vst.msk [vmem:[#allocation2 + $0x150] sm:$0x1] %vm440_vm2, %v436_v0 }
 0x126   : >> { %v709_v49 = vpop.permute.xlu1 %708  ;;  %1138 = vrot.lane.b32.xlu2 %v4665_v26, %s4054_s9  ;;  %v547_v26 = vpack.c.bf16 %v515_v58, %v515_v58  ;;  %581 = vst.msk [vmem:[#allocation3 + $0xa8] sm:$0xf] %vm559_vm3, %v548_v52  ;;  %v4839_v52 = vpack.c.bf16 %v522_v5, %v522_v5 }
 0x127   : >> { %v701_v42 = vpop.permute.xlu0 %700  ;;  %795 = vst.msk [vmem:[#allocation3 + $0x50] sm:$0xf] %vm784_vm4, %v709_v49 }
 0x128   : >> { %791 = vst.msk [vmem:[#allocation3 + $0x30] sm:$0xf] %vm784_vm4, %v701_v42  ;;  %v729_v36 = vpop.permute.xlu2 %728  ;;  %v520_v42 = vld [vmem:[#allocation2 + $0x128] sm:$0xff] }
 0x129   : >> { %583 = vst.msk [vmem:[#allocation3 + $0xb8] sm:$0xf] %vm559_vm3, %v550_v8 }
 0x12a   : >> { %v513_v48 = vld [vmem:[#allocation2 + $0xd8] sm:$0xff]  ;;  %580 = vst.msk [vmem:[#allocation3 + $0xa0] sm:$0xf] %vm559_vm3, %v547_v26 }
 0x12b   : >> { %v545_v60 = vpack.c.bf16 %v513_v48, %v513_v48  ;;  %v517_v49 = vld [vmem:[#allocation2 + $0x108] sm:$0xff]  ;;  %805 = vst.msk [vmem:[#allocation3 + $0xa0] sm:$0xf] %vm784_vm4, %v729_v36  ;;  %v552_v36 = vpack.c.bf16 %v520_v42, %v520_v42  ;;  %v524_v26 = vld [vmem:[#allocation2 + $0x158] sm:$0xff] }
 0x12c   : >> { %1363 = vrot.lane.b32.xlu1 %v4568_v57, %s4055_s10  ;;  %v549_v30 = vpack.c.bf16 %v517_v49, %v517_v49  ;;  %454 = vst.msk [vmem:[#allocation2 + $0x138] sm:$0x1] %vm440_vm2, %v435_v2  ;;  %v415_v48 = vld [vmem:[#allocation2 + $0x168] sm:$0xff]  ;;  %v523_v2 = vld [vmem:[#allocation2 + $0x150] sm:$0xff] }
 0x12d   : >> { %951 = vrot.lane.b32.xlu0 %v868_v39, %s4053_s8  ;;  %578 = vst.msk [vmem:[#allocation3 + $0x90] sm:$0xf] %vm559_vm3, %v545_v60 }
 0x12e   : >> { %v715_v51 = vpop.permute.xlu1 %714  ;;  %1365 = vrot.lane.b32.xlu2 %v4581_v50, %s4055_s10  ;;  %582 = vst.msk [vmem:[#allocation3 + $0xb0] sm:$0xf] %vm559_vm3, %v549_v30  ;;  %v519_v50 = vld [vmem:[#allocation2 + $0x120] sm:$0xff] }
 0x12f   : >> { %v707_v37 = vpop.permute.xlu0 %706  ;;  %798 = vst.msk [vmem:[#allocation3 + $0x68] sm:$0xf] %vm784_vm4, %v715_v51  ;;  %v551_v8 = vpack.c.bf16 %v519_v50, %v519_v50  ;;  %v437_v51 = vld [vmem:[#allocation2 + $0x16a] sm:$0x1]  ;;  %v4849_v50 = vpack.c.bf16 %v523_v2, %v523_v2  ;;  %v1949_v2 = vld [vmem:[#allocation2 + $0x81] sm:$0xff] }
 0x130   : >> { %794 = vst.msk [vmem:[#allocation3 + $0x48] sm:$0xf] %vm784_vm4, %v707_v37  ;;  %v735_v57 = vpop.permute.xlu2 %734 }
 0x131   : >> { %808 = vst.msk [vmem:[#allocation3 + $0xb8] sm:$0xf] %vm784_vm4, %v735_v57 }
 0x132   : >> { %585 = vst.msk [vmem:[#allocation3 + $0xc8] sm:$0xf] %vm559_vm3, %v552_v36 }
 0x133   : >> { %584 = vst.msk [vmem:[#allocation3 + $0xc0] sm:$0xf] %vm559_vm3, %v551_v8  ;;  %v521_v60 = vld [vmem:[#allocation2 + $0x138] sm:$0xff] }
 0x134   : >> { %1590 = vrot.lane.b32.xlu1 %v4656_v11, %s4056_s11  ;;  %456 = vst.msk [vmem:[#allocation2 + $0x168] sm:$0x1] %vm440_vm2, %v437_v51  ;;  %v4832_v57 = vpack.c.bf16 %v521_v60, %v521_v60 }
 0x135   : >> { %1140 = vrot.lane.b32.xlu0 %v4680_v23, %s4054_s9  ;;  %v4821_v23 = vpack.c.bf16 %v524_v26, %v524_v26  ;;  %419 = vst.msk [vmem:[#allocation2 + $0x198] sm:$0xff] %vm209_vm0, %v415_v48 }
 0x136   : >> { %v721_v39 = vpop.permute.xlu1 %720  ;;  %1813 = vrot.lane.b32.xlu2 %v4643_v62, %s4057_s12  ;;  %586 = vst.msk [vmem:[#allocation3 + $0xd0] sm:$0xf] %vm559_vm3, %v4832_v57 }
 0x137   : >> { %v713_v58 = vpop.permute.xlu0 %712  ;;  %801 = vst.msk [vmem:[#allocation3 + $0x80] sm:$0xf] %vm784_vm4, %v721_v39 }
 0x138   : >> { %797 = vst.msk [vmem:[#allocation3 + $0x60] sm:$0xf] %vm784_vm4, %v713_v58  ;;  %v741_v11 = vpop.permute.xlu2 %740 }
 0x139   : >> { %589 = vst.msk [vmem:[#allocation3 + $0xe8] sm:$0xf] %vm559_vm3, %v4821_v23 }
 0x13a   : >> { %811 = vst.msk [vmem:[#allocation3 + $0xd0] sm:$0xf] %vm784_vm4, %v741_v11 }
 0x13b   : >> { %587 = vst.msk [vmem:[#allocation3 + $0xd8] sm:$0xf] %vm559_vm3, %v4839_v52  ;;  %v525_v36 = vld [vmem:[#allocation2 + $0x168] sm:$0xff] }
 0x13c   : >> { %2038 = vrot.lane.b32.xlu1 %v4576_v56, %s4058_s13  ;;  %588 = vst.msk [vmem:[#allocation3 + $0xe0] sm:$0xf] %vm559_vm3, %v4849_v50  ;;  %v4861_v8 = vpack.c.bf16 %v525_v36, %v525_v36 }
 0x13d   : >> { %1588 = vrot.lane.b32.xlu0 %v4650_v17, %s4056_s11  ;;  %v526_v17 = vld [vmem:[#allocation2 + $0x170] sm:$0xff] }
 0x13e   : >> { %v727_v37 = vpop.permute.xlu1 %726  ;;  %2040 = vrot.lane.b32.xlu2 %v4583_v63, %s4058_s13  ;;  %v4843_v42 = vpack.c.bf16 %v526_v17, %v526_v17  ;;  %590 = vst.msk [vmem:[#allocation3 + $0xf0] sm:$0xf] %vm559_vm3, %v4861_v8 }
 0x13f   : >> { %v719_v49 = vpop.permute.xlu0 %718  ;;  %804 = vst.msk [vmem:[#allocation3 + $0x98] sm:$0xf] %vm784_vm4, %v727_v37 }
 0x140   : >> { %800 = vst.msk [vmem:[#allocation3 + $0x78] sm:$0xf] %vm784_vm4, %v719_v49  ;;  %v747_v30 = vpop.permute.xlu2 %746 }
 0x141   : >> { %814 = vst.msk [vmem:[#allocation3 + $0xe8] sm:$0xf] %vm784_vm4, %v747_v30  ;;  %v3839_v30 = vor.u32 %v4227_v25, %v4222_v24 }
 0x142   : >> { %591 = vst.msk [vmem:[#allocation3 + $0xf8] sm:$0xf] %vm559_vm3, %v4843_v42 }
 0x143   : >> { %2541 = vmatpush.bf16.msra.mxu0 %v3839_v30  ;;  %3977 = vmatpush.bf16.msra.mxu3 %v3839_v30 }
 0x144   : >> { %1144 = vrot.lane.b32.xlu1 %v4677_v38, %s4054_s9 }
 0x145   : >> { %1815 = vrot.lane.b32.xlu0 %v4677_v38, %s4057_s12 }
 0x146   : >> { %v733_v39 = vpop.permute.xlu1 %732  ;;  %1367 = vrot.lane.b32.xlu2 %v4576_v56, %s4055_s10 }
 0x147   : >> { %v725_v58 = vpop.permute.xlu0 %724  ;;  %807 = vst.msk [vmem:[#allocation3 + $0xb0] sm:$0xf] %vm784_vm4, %v733_v39 }
 0x148   : >> { %803 = vst.msk [vmem:[#allocation3 + $0x90] sm:$0xf] %vm784_vm4, %v725_v58  ;;  %v914_v11 = vpop.permute.xlu2 %913  ;;  %v3827_v58 = vor.u32 %v4182_v16, %v4177_v15 }
 0x149   : >> { %1010 = vst.msk [vmem:[#allocation3] sm:$0xf] %vm1009_vm5, %v914_v11 }
 0x14c   : >> { %1592 = vrot.lane.b32.xlu1 %v4639_v29, %s4056_s11 }
 0x14d   : >> { %1142 = vrot.lane.b32.xlu0 %v4643_v62, %s4054_s9 }
 0x14e   : >> { %v739_v56 = vpop.permute.xlu1 %738  ;;  %1594 = vrot.lane.b32.xlu2 %v4646_v20, %s4056_s11 }
 0x14f   : >> { %v731_v38 = vpop.permute.xlu0 %730  ;;  %810 = vst.msk [vmem:[#allocation3 + $0xc8] sm:$0xf] %vm784_vm4, %v739_v56  ;;  %v1275_v56 = vld [vmem:[#allocation2 + $0x79] sm:$0xff] }
 0x150   : >> { %806 = vst.msk [vmem:[#allocation3 + $0xa8] sm:$0xf] %vm784_vm4, %v731_v38  ;;  %v920_v26 = vpop.permute.xlu2 %919 }
 0x151   : >> { %1013 = vst.msk [vmem:[#allocation3 + $0x18] sm:$0xf] %vm1009_vm5, %v920_v26  ;;  %v3843_v26 = vor.u32 %v4242_v28, %v4237_v27 }
 0x153   : >> { %2637 = vmatpush.bf16.msra.mxu1 %v3843_v26 }
 0x154   : >> { %1819 = vrot.lane.b32.xlu1 %v4696_v54, %s4057_s12 }
 0x155   : >> { %1369 = vrot.lane.b32.xlu0 %v4583_v63, %s4055_s10 }
 0x156   : >> { %v745_v29 = vpop.permute.xlu1 %744  ;;  %2042 = vrot.lane.b32.xlu2 %v4601_v41, %s4058_s13 }
 0x157   : >> { %v737_v62 = vpop.permute.xlu0 %736  ;;  %813 = vst.msk [vmem:[#allocation3 + $0xe0] sm:$0xf] %vm784_vm4, %v745_v29 }
 0x158   : >> { %809 = vst.msk [vmem:[#allocation3 + $0xc0] sm:$0xf] %vm784_vm4, %v737_v62  ;;  %v926_v20 = vpop.permute.xlu2 %925  ;;  %v3819_v62 = vor.u32 %v4152_v10, %v4147_v9 }
 0x159   : >> { %1016 = vst.msk [vmem:[#allocation3 + $0x30] sm:$0xf] %vm1009_vm5, %v926_v20 }
 0x15c   : >> { %1146 = vrot.lane.b32.xlu1 %v4708_v61, %s4054_s9 }
 0x15d   : >> { %1817 = vrot.lane.b32.xlu0 %v4708_v61, %s4057_s12 }
 0x15e   : >> { %v751_v0 = vpop.permute.xlu1 %750  ;;  %1148 = vrot.lane.b32.xlu2 %v4696_v54, %s4054_s9 }
 0x15f   : >> { %v743_v63 = vpop.permute.xlu0 %742  ;;  %816 = vst.msk [vmem:[#allocation3 + $0xf8] sm:$0xf] %vm784_vm4, %v751_v0  ;;  %v3945_v0 = vld [vmem:[#allocation3 + $0x4] sm:$0xf] }
 0x160   : >> { %812 = vst.msk [vmem:[#allocation3 + $0xd8] sm:$0xf] %vm784_vm4, %v743_v63  ;;  %v932_v48 = vpop.permute.xlu2 %931  ;;  %v3684_v63 = vld [vmem:[#allocation3 + $0x8] sm:$0xf0] }
 0x161   : >> { %1019 = vst.msk [vmem:[#allocation3 + $0x48] sm:$0xf] %vm1009_vm5, %v932_v48 }
 0x164   : >> { %1373 = vrot.lane.b32.xlu1 %v4590_v47, %s4055_s10 }
 0x165   : >> { %2044 = vrot.lane.b32.xlu0 %v4590_v47, %s4058_s13 }
 0x166   : >> { %v918_v51 = vpop.permute.xlu1 %917  ;;  %1596 = vrot.lane.b32.xlu2 %v4661_v32, %s4056_s11 }
 0x167   : >> { %v749_v61 = vpop.permute.xlu0 %748  ;;  %1012 = vst.msk [vmem:[#allocation3 + $0x10] sm:$0xf] %vm1009_vm5, %v918_v51  ;;  %v3815_v51 = vor.u32 %v4137_v7, %v4132_v6 }
 0x168   : >> { %815 = vst.msk [vmem:[#allocation3 + $0xf0] sm:$0xf] %vm784_vm4, %v749_v61  ;;  %v938_v54 = vpop.permute.xlu2 %937  ;;  %v2170_v61 = vld [vmem:[#allocation2 + $0x52] sm:$0xff] }
 0x169   : >> { %1022 = vst.msk [vmem:[#allocation3 + $0x60] sm:$0xf] %vm1009_vm5, %v938_v54 }
 0x16c   : >> { %1821 = vrot.lane.b32.xlu1 %v4722_v1, %s4057_s12 }
 0x16d   : >> { %1371 = vrot.lane.b32.xlu0 %v4601_v41, %s4055_s10 }
 0x16e   : >> { %v924_v60 = vpop.permute.xlu1 %923  ;;  %1823 = vrot.lane.b32.xlu2 %v4739_v40, %s4057_s12 }
 0x16f   : >> { %v916_v47 = vpop.permute.xlu0 %915  ;;  %1015 = vst.msk [vmem:[#allocation3 + $0x28] sm:$0xf] %vm1009_vm5, %v924_v60  ;;  %v3811_v60 = vor.u32 %v4122_v4, %v4117_v3 }
 0x170   : >> { %1011 = vst.msk [vmem:[#allocation3 + $0x8] sm:$0xf] %vm1009_vm5, %v916_v47  ;;  %v944_v32 = vpop.permute.xlu2 %943  ;;  %v2202_v47 = vpack.c.bf16 %v2170_v61, %v2170_v61 }
 0x171   : >> { %1025 = vst.msk [vmem:[#allocation3 + $0x78] sm:$0xf] %vm1009_vm5, %v944_v32 }
 0x172   : >> { %2234 = vst.msk [vmem:[#allocation3 + $0x1c] sm:$0xf] %vm559_vm3, %v2202_v47  ;;  %v2174_v47 = vld [vmem:[#allocation2 + $0x82] sm:$0xff] }
 0x174   : >> { %2048 = vrot.lane.b32.xlu1 %v4611_v35, %s4058_s13 }
 0x175   : >> { %1598 = vrot.lane.b32.xlu0 %v4718_v34, %s4056_s11 }
 0x176   : >> { %v930_v5 = vpop.permute.xlu1 %929  ;;  %1150 = vrot.lane.b32.xlu2 %v4722_v1, %s4054_s9 }
 0x177   : >> { %v922_v41 = vpop.permute.xlu0 %921  ;;  %1018 = vst.msk [vmem:[#allocation3 + $0x40] sm:$0xf] %vm1009_vm5, %v930_v5  ;;  %v1277_v5 = vld [vmem:[#allocation2 + $0x91] sm:$0xff] }
 0x178   : >> { %1014 = vst.msk [vmem:[#allocation3 + $0x20] sm:$0xf] %vm1009_vm5, %v922_v41  ;;  %v950_v37 = vpop.permute.xlu2 %949 }
 0x179   : >> { %1028 = vst.msk [vmem:[#allocation3 + $0x90] sm:$0xf] %vm1009_vm5, %v950_v37 }
 0x17c   : >> { %1375 = vrot.lane.b32.xlu1 %v4592_v59, %s4055_s10 }
 0x17d   : >> { %2046 = vrot.lane.b32.xlu0 %v4592_v59, %s4058_s13  ;;  %v3835_v59 = vor.u32 %v4212_v22, %v4207_v21 }
 0x17e   : >> { %v936_v49 = vpop.permute.xlu1 %935  ;;  %1377 = vrot.lane.b32.xlu2 %v4611_v35, %s4055_s10 }
 0x17f   : >> { %v928_v34 = vpop.permute.xlu0 %927  ;;  %1021 = vst.msk [vmem:[#allocation3 + $0x58] sm:$0xf] %vm1009_vm5, %v936_v49  ;;  %2542 = vmatpush.bf16.msra.mxu0 %v3835_v59  ;;  %3978 = vmatpush.bf16.msra.mxu3 %v3835_v59  ;;  %v3947_v49 = vld [vmem:[#allocation3 + $0x14] sm:$0xf]  ;;  %v6069_v59 = vld [vmem:[#allocation58_spill] sm:$0xff] }
 0x180   : >> { %1017 = vst.msk [vmem:[#allocation3 + $0x38] sm:$0xf] %vm1009_vm5, %v928_v34  ;;  %v1139_v1 = vpop.permute.xlu2 %1138 }
 0x181   : >> { %1235 = vst.msk [vmem:[#allocation3] sm:$0xf] %vm1234_vm6, %v1139_v1  ;;  %v3692_v1 = vld [vmem:[#allocation3 + $0x18] sm:$0xf0] }
 0x182   : >> { %v3695_v30 = vor.u32 %v3947_v49, %v3692_v1  ;;  %v2206_v49 = vpack.c.bf16 %v2174_v47, %v2174_v47 }
 0x184   : >> { %1602 = vrot.lane.b32.xlu1 %v4698_v53, %s4056_s11  ;;  %v1981_v53 = vpack.c.bf16 %v1949_v2, %v1949_v2  ;;  %v2171_v2 = vld [vmem:[#allocation2 + $0x62] sm:$0xff]  ;;  %2238 = vst.msk [vmem:[#allocation3 + $0x3c] sm:$0xf] %vm559_vm3, %v2206_v49 }
 0x185   : >> { %1152 = vrot.lane.b32.xlu0 %v4739_v40, %s4054_s9  ;;  %v3831_v40 = vor.u32 %v4197_v19, %v4192_v18 }
 0x186   : >> { %v942_v35 = vpop.permute.xlu1 %941  ;;  %1825 = vrot.lane.b32.xlu2 %v4735_v55, %s4057_s12 }
 0x187   : >> { %v934_v17 = vpop.permute.xlu0 %933  ;;  %1024 = vst.msk [vmem:[#allocation3 + $0x70] sm:$0xf] %vm1009_vm5, %v942_v35  ;;  %2543 = vmatpush.bf16.msra.mxu0 %v3831_v40  ;;  %3979 = vmatpush.bf16.msra.mxu3 %v3831_v40  ;;  %v471_v35 = vld [vmem:[#allocation2 + $0x12f] sm:$0x1] }
 0x188   : >> { %1020 = vst.msk [vmem:[#allocation3 + $0x50] sm:$0xf] %vm1009_vm5, %v934_v17  ;;  %v4943_v36 = vpop.permute.xlu2 %1365  ;;  %v1951_v17 = vld [vmem:[#allocation2 + $0x99] sm:$0xff] }
 0x189   : >> { %489 = vst.msk [vmem:[#allocation2 + $0x131] sm:$0x1] %vm440_vm2, %v471_v35 }
 0x18b   : >> { %2544 = vmatpush.bf16.msra.mxu0 %v3827_v58  ;;  %3980 = vmatpush.bf16.msra.mxu3 %v3827_v58  ;;  %v1983_v58 = vpack.c.bf16 %v1951_v17, %v1951_v17  ;;  %v1952_v17 = vld [vmem:[#allocation2 + $0xa9] sm:$0xff] }
 0x18c   : >> { %2050 = vrot.lane.b32.xlu1 %v4599_v44, %s4058_s13  ;;  %v1307_v44 = vpack.c.bf16 %v1275_v56, %v1275_v56 }
 0x18d   : >> { %1600 = vrot.lane.b32.xlu0 %v4693_v14, %s4056_s11  ;;  %v3823_v14 = vor.u32 %v4167_v13, %v4162_v12 }
 0x18e   : >> { %v948_v39 = vpop.permute.xlu1 %947  ;;  %2052 = vrot.lane.b32.xlu2 %v1981_v53, %s4058_s13  ;;  %v2172_v53 = vld [vmem:[#allocation2 + $0x6a] sm:$0xff] }
 0x18f   : >> { %v940_v11 = vpop.permute.xlu0 %939  ;;  %1027 = vst.msk [vmem:[#allocation3 + $0x88] sm:$0xf] %vm1009_vm5, %v948_v39  ;;  %2545 = vmatpush.bf16.msra.mxu0 %v3823_v14  ;;  %3981 = vmatpush.bf16.msra.mxu3 %v3823_v14  ;;  %v2203_v39 = vpack.c.bf16 %v2171_v2, %v2171_v2  ;;  %v2204_v56 = vpack.c.bf16 %v2172_v53, %v2172_v53 }
 0x190   : >> { %1023 = vst.msk [vmem:[#allocation3 + $0x68] sm:$0xf] %vm1009_vm5, %v940_v11  ;;  %v4956_v38 = vpop.permute.xlu2 %1813 }
 0x191   : >> { %2235 = vst.msk [vmem:[#allocation3 + $0x24] sm:$0xf] %vm559_vm3, %v2203_v39  ;;  %v3708_v39 = vld [vmem:[#allocation3 + $0x38] sm:$0xf0] }
 0x192   : >> { %2236 = vst.msk [vmem:[#allocation3 + $0x2c] sm:$0xf] %vm559_vm3, %v2204_v56 }
 0x193   : >> { %2546 = vmatpush.bf16.msra.mxu0 %v3819_v62  ;;  %3982 = vmatpush.bf16.msra.mxu3 %v3819_v62 }
 0x194   : >> { %1156 = vrot.lane.b32.xlu1 %v4720_v33, %s4054_s9 }
 0x195   : >> { %1827 = vrot.lane.b32.xlu0 %v4720_v33, %s4057_s12  ;;  %v3687_v33 = vor.u32 %v3945_v0, %v3684_v63  ;;  %v841_v63 = vld [vmem:[#allocation2 + $0x122] sm:$0xff] }
 0x196   : >> { %v954_v29 = vpop.permute.xlu1 %953  ;;  %1379 = vrot.lane.b32.xlu2 %v1307_v44, %s4055_s10  ;;  %v842_v44 = vld [vmem:[#allocation2 + $0x12a] sm:$0xff]  ;;  %v873_v61 = vpack.c.bf16 %v841_v63, %v841_v63 }
 0x197   : >> { %v946_v20 = vpop.permute.xlu0 %945  ;;  %1030 = vst.msk [vmem:[#allocation3 + $0xa0] sm:$0xf] %vm1009_vm5, %v954_v29  ;;  %3844 = vmatmul.msk.bf16.vlgmr.msra.gmra.mxu1 %vm209_vm0, %v3687_v33  ;;  %2547 = vmatpush.bf16.msra.mxu0 %v3815_v51  ;;  %v5014_v14 = vpack.c.bf16 %v842_v44, %v842_v44  ;;  %v6071_v33 = vld [vmem:[#allocation60_spill] sm:$0xff] }
 0x198   : >> { %1026 = vst.msk [vmem:[#allocation3 + $0x80] sm:$0xf] %vm1009_vm5, %v946_v20  ;;  %v4971_v48 = vpop.permute.xlu2 %2040  ;;  %3983 = vmatpush.bf16.msra.mxu3 %v3815_v51  ;;  %v3949_v62 = vld [vmem:[#allocation3 + $0x24] sm:$0xf]  ;;  %v472_v20 = vld [vmem:[#allocation2 + $0x147] sm:$0x1] }
 0x199   : >> { %2252 = vst.msk [vmem:[#allocation3 + $0xac] sm:$0xf] %vm559_vm3, %v5014_v14  ;;  %v3700_v0 = vld [vmem:[#allocation3 + $0x28] sm:$0xf0] }
 0x19a   : >> { %490 = vst.msk [vmem:[#allocation2 + $0x149] sm:$0x1] %vm440_vm2, %v472_v20  ;;  %v3703_v51 = vor.u32 %v3949_v62, %v3700_v0 }
 0x19b   : >> { %2548 = vmatpush.bf16.msra.mxu0 %v3811_v60  ;;  %2251 = vst.msk [vmem:[#allocation3 + $0xa4] sm:$0xf] %vm559_vm3, %v873_v61 }
 0x19c   : >> { %1604 = vrot.lane.b32.xlu1 %v4745_v46, %s4056_s11  ;;  %3984 = vmatpush.bf16.msra.mxu3 %v3811_v60  ;;  %v2173_v60 = vld [vmem:[#allocation2 + $0x7a] sm:$0xff] }
 0x19d   : >> { %1154 = vrot.lane.b32.xlu0 %v4735_v55, %s4054_s9  ;;  %v1309_v55 = vpack.c.bf16 %v1277_v5, %v1277_v5 }
 0x19e   : >> { %v1364_v54 = vpop.permute.xlu1 %1363  ;;  %1606 = vrot.lane.b32.xlu2 %v4716_v31, %s4056_s11  ;;  %v6068_v31 = vld [vmem:[#allocation56_spill] sm:$0xff] }
 0x19f   : >> { %v952_v32 = vpop.permute.xlu0 %951  ;;  %1460 = vst.msk [vmem:[#allocation3] sm:$0xf] %vm1459_vm7, %v1364_v54  ;;  %v1953_v54 = vld [vmem:[#allocation2 + $0xb1] sm:$0xff] }
 0x1a0   : >> { %1029 = vst.msk [vmem:[#allocation3 + $0x98] sm:$0xf] %vm1009_vm5, %v952_v32  ;;  %v4986_v46 = vpop.permute.xlu2 %1367  ;;  %3985 = vmatpush.bf16.msrb.mxu3 %v3843_v26  ;;  %v6070_v26 = vld [vmem:[#allocation57_spill] sm:$0xff] }
 0x1a4   : >> { %1831 = vrot.lane.b32.xlu1 %v4748_v45, %s4057_s12 }
 0x1a5   : >> { %1381 = vrot.lane.b32.xlu0 %v6068_v31, %s4055_s10  ;;  %v2205_v31 = vpack.c.bf16 %v2173_v60, %v2173_v60 }
 0x1a6   : >> { %v1591_v41 = vpop.permute.xlu1 %1590  ;;  %2054 = vrot.lane.b32.xlu2 %v1309_v55, %s4058_s13 }
 0x1a7   : >> { %v1141_v37 = vpop.permute.xlu0 %1140  ;;  %3845 = vmatmul.msk.bf16.gmra.mxu1 %vm209_vm0, %v3695_v30  ;;  %v1517_v30 = vld [vmem:[#allocation2 + $0x142] sm:$0xff]  ;;  %2237 = vst.msk [vmem:[#allocation3 + $0x34] sm:$0xf] %vm559_vm3, %v2205_v31 }
 0x1a8   : >> { %1236 = vst.msk [vmem:[#allocation3 + $0x8] sm:$0xf] %vm1234_vm6, %v1141_v37  ;;  %v4995_v34 = vpop.permute.xlu2 %1594  ;;  %v5038_v37 = vpack.c.bf16 %v1953_v54, %v1953_v54  ;;  %v5045_v35 = vpack.c.bf16 %v1517_v30, %v1517_v30  ;;  %v1966_v30 = vld [vmem:[#allocation2 + $0x151] sm:$0xff] }
 0x1a9   : >> { %1461 = vst.msk [vmem:[#allocation3 + $0x8] sm:$0xf] %vm1459_vm7, %v4943_v36 }
 0x1aa   : >> { %1686 = vst.msk [vmem:[#allocation3 + $0x8] sm:$0xf] %vm1684_vm8, %v1591_v41 }
 0x1ab   : >> { %2254 = vst.msk [vmem:[#allocation3 + $0xbc] sm:$0xf] %vm559_vm3, %v5045_v35 }
 0x1ac   : >> { %1158 = vrot.lane.b32.xlu1 %v6069_v59, %s4054_s9 }
 0x1ad   : >> { %1829 = vrot.lane.b32.xlu0 %v6069_v59, %s4057_s12  ;;  %v6072_v59 = vld [vmem:[#allocation59_spill] sm:$0xff] }
 0x1ae   : >> { %v2039_v40 = vpop.permute.xlu1 %2038  ;;  %1160 = vrot.lane.b32.xlu2 %v4748_v45, %s4054_s9 }
 0x1af   : >> { %v1589_v36 = vpop.permute.xlu0 %1588 }
 0x1b0   : >> { %1685 = vst.msk [vmem:[#allocation3] sm:$0xf] %vm1684_vm8, %v1589_v36  ;;  %v5009_v11 = vpop.permute.xlu2 %2042  ;;  %v3951_v36 = vld [vmem:[#allocation3 + $0x34] sm:$0xf] }
 0x1b1   : >> { %1910 = vst.msk [vmem:[#allocation3] sm:$0xf] %vm1909_vm9, %v4956_v38  ;;  %v3711_v56 = vor.u32 %v3951_v36, %v3708_v39 }
 0x1b2   : >> { %2135 = vst.msk [vmem:[#allocation3] sm:$0xf] %vm2134_vm10, %v2039_v40  ;;  %v5061_v40 = vpack.c.bf16 %v1952_v17, %v1952_v17  ;;  %v5111_v17 = vpack.c.bf16 %v1966_v30, %v1966_v30 }
 0x1b4   : >> { %1385 = vrot.lane.b32.xlu1 %v1983_v58, %s4055_s10 }
 0x1b5   : >> { %2056 = vrot.lane.b32.xlu0 %v1983_v58, %s4058_s13  ;;  %v1516_v58 = vld [vmem:[#allocation2 + $0x13a] sm:$0xff] }
 0x1b6   : >> { %v1145_v45 = vpop.permute.xlu1 %1144  ;;  %1608 = vrot.lane.b32.xlu2 %v6070_v26, %s4056_s11  ;;  %v5066_v44 = vpack.c.bf16 %v1516_v58, %v1516_v58  ;;  %v2175_v26 = vld [vmem:[#allocation2 + $0x92] sm:$0xff] }
 0x1b7   : >> { %v1816_v38 = vpop.permute.xlu0 %1815  ;;  %1238 = vst.msk [vmem:[#allocation3 + $0x18] sm:$0xf] %vm1234_vm6, %v1145_v45  ;;  %3846 = vmatmul.msk.bf16.gmra.mxu1 %vm209_vm0, %v3703_v51  ;;  %v1292_v45 = vld [vmem:[#allocation2 + $0x141] sm:$0xff] }
 0x1b8   : >> { %1911 = vst.msk [vmem:[#allocation3 + $0x8] sm:$0xf] %vm1909_vm9, %v1816_v38  ;;  %v1149_v29 = vpop.permute.xlu2 %1148  ;;  %v2176_v38 = vld [vmem:[#allocation2 + $0x9a] sm:$0xff]  ;;  %v1324_v62 = vpack.c.bf16 %v1292_v45, %v1292_v45  ;;  %v2179_v45 = vld [vmem:[#allocation2 + $0xc2] sm:$0xff] }
 0x1b9   : >> { %2136 = vst.msk [vmem:[#allocation3 + $0x8] sm:$0xf] %vm2134_vm10, %v4971_v48  ;;  %v3682_v48 = vld [vmem:[#allocation3] sm:$0xf]  ;;  %v2208_v0 = vpack.c.bf16 %v2176_v38, %v2176_v38 }
 0x1ba   : >> { %1240 = vst.msk [vmem:[#allocation3 + $0x28] sm:$0xf] %vm1234_vm6, %v1149_v29 }
 0x1bb   : >> { %2253 = vst.msk [vmem:[#allocation3 + $0xb4] sm:$0xf] %vm559_vm3, %v5066_v44 }
 0x1bc   : >> { %1833 = vrot.lane.b32.xlu1 %v6071_v33, %s4057_s12  ;;  %2240 = vst.msk [vmem:[#allocation3 + $0x4c] sm:$0xf] %vm559_vm3, %v2208_v0 }
 0x1bd   : >> { %1383 = vrot.lane.b32.xlu0 %v1309_v55, %s4055_s10 }
 0x1be   : >> { %v1593_v32 = vpop.permute.xlu1 %1592  ;;  %1835 = vrot.lane.b32.xlu2 %v4779_v43, %s4057_s12 }
 0x1bf   : >> { %v1143_v5 = vpop.permute.xlu0 %1142 }
 0x1c0   : >> { %1237 = vst.msk [vmem:[#allocation3 + $0x10] sm:$0xf] %vm1234_vm6, %v1143_v5  ;;  %v3946_v41 = vld [vmem:[#allocation3 + $0x4] sm:$0xf0]  ;;  %v5040_v55 = vpop.permute.xlu2 %1596 }
 0x1c1   : >> { %1462 = vst.msk [vmem:[#allocation3 + $0x10] sm:$0xf] %vm1459_vm7, %v4986_v46  ;;  %v3683_v1 = vor.u32 %v3946_v41, %v3682_v48 }
 0x1c2   : >> { %1687 = vst.msk [vmem:[#allocation3 + $0x10] sm:$0xf] %vm1684_vm8, %v1593_v32  ;;  %v1504_v32 = vld [vmem:[#allocation2 + $0xaa] sm:$0xff] }
 0x1c3   : >> { %2549 = vmatmul.bf16.vlgmr.msra.gmra.mxu0 %v3683_v1  ;;  %v3716_v48 = vld [vmem:[#allocation3 + $0x48] sm:$0xf0] }
 0x1c4   : >> { %2060 = vrot.lane.b32.xlu1 %v5038_v37, %s4058_s13 }
 0x1c5   : >> { %1610 = vrot.lane.b32.xlu0 %v6072_v59, %s4056_s11 }
 0x1c6   : >> { %v1820_v46 = vpop.permute.xlu1 %1819  ;;  %961 = vrot.lane.b32.xlu2 %v873_v61, %s4053_s8  ;;  %v1291_v61 = vld [vmem:[#allocation2 + $0x139] sm:$0xff] }
 0x1c7   : >> { %v1370_v2 = vpop.permute.xlu0 %1369  ;;  %3847 = vmatmul.msk.bf16.gmra.mxu1 %vm209_vm0, %v3711_v56  ;;  %v1323_v60 = vpack.c.bf16 %v1291_v61, %v1291_v61  ;;  %v473_v56 = vld [vmem:[#allocation2 + $0x15f] sm:$0x1] }
 0x1c8   : >> { %1463 = vst.msk [vmem:[#allocation3 + $0x18] sm:$0xf] %vm1459_vm7, %v1370_v2  ;;  %v5057_v53 = vpop.permute.xlu2 %1823 }
 0x1c9   : >> { %1688 = vst.msk [vmem:[#allocation3 + $0x18] sm:$0xf] %vm1684_vm8, %v4995_v34 }
 0x1ca   : >> { %1913 = vst.msk [vmem:[#allocation3 + $0x18] sm:$0xf] %vm1909_vm9, %v1820_v46 }
 0x1cb   : >> { %491 = vst.msk [vmem:[#allocation2 + $0x161] sm:$0x1] %vm440_vm2, %v473_v56 }
 0x1cc   : >> { %1186 = vrot.lane.b32.xlu1 %v4832_v57, %s4054_s9  ;;  %v2207_v57 = vpack.c.bf16 %v2175_v26, %v2175_v26  ;;  %v2180_v26 = vld [vmem:[#allocation2 + $0xca] sm:$0xff] }
 0x1cd   : >> { %2058 = vrot.lane.b32.xlu0 %v5061_v40, %s4058_s13 }
 0x1ce   : >> { %v1147_v34 = vpop.permute.xlu1 %1146  ;;  %1188 = vrot.lane.b32.xlu2 %v4839_v52, %s4054_s9  ;;  %v1505_v52 = vld [vmem:[#allocation2 + $0xb2] sm:$0xff]  ;;  %2239 = vst.msk [vmem:[#allocation3 + $0x44] sm:$0xf] %vm559_vm3, %v2207_v57 }
 0x1cf   : >> { %v1818_v29 = vpop.permute.xlu0 %1817  ;;  %1239 = vst.msk [vmem:[#allocation3 + $0x20] sm:$0xf] %vm1234_vm6, %v1147_v34  ;;  %v5082_v63 = vpack.c.bf16 %v1505_v52, %v1505_v52  ;;  %v1967_v34 = vld [vmem:[#allocation2 + $0x159] sm:$0xff] }
 0x1d0   : >> { %1912 = vst.msk [vmem:[#allocation3 + $0x10] sm:$0xf] %vm1909_vm9, %v1818_v29  ;;  %v1151_v20 = vpop.permute.xlu2 %1150  ;;  %v5135_v29 = vpack.c.bf16 %v2180_v26, %v2180_v26 }
 0x1d1   : >> { %2137 = vst.msk [vmem:[#allocation3 + $0x10] sm:$0xf] %vm2134_vm10, %v5009_v11 }
 0x1d2   : >> { %1241 = vst.msk [vmem:[#allocation3 + $0x30] sm:$0xf] %vm1234_vm6, %v1151_v20  ;;  %v1519_v20 = vld [vmem:[#allocation2 + $0x15a] sm:$0xff] }
 0x1d3   : >> { %2242 = vst.msk [vmem:[#allocation3 + $0x5c] sm:$0xf] %vm559_vm3, %v5082_v63  ;;  %v5151_v0 = vpack.c.bf16 %v1519_v20, %v1519_v20 }
 0x1d4   : >> { %1413 = vrot.lane.b32.xlu1 %v1324_v62, %s4055_s10  ;;  %v5141_v62 = vpack.c.bf16 %v1967_v34, %v1967_v34  ;;  %2244 = vst.msk [vmem:[#allocation3 + $0x6c] sm:$0xf] %vm559_vm3, %v5135_v29 }
 0x1d5   : >> { %963 = vrot.lane.b32.xlu0 %v5014_v14, %s4053_s8  ;;  %v3953_v47 = vld [vmem:[#allocation3 + $0x44] sm:$0xf]  ;;  %v5095_v14 = vpack.c.bf16 %v1504_v32, %v1504_v32  ;;  %2256 = vst.msk [vmem:[#allocation3 + $0xcc] sm:$0xf] %vm559_vm3, %v5151_v0 }
 0x1d6   : >> { %v1374_v51 = vpop.permute.xlu1 %1373  ;;  %1636 = vrot.lane.b32.xlu2 %v5066_v44, %s4056_s11  ;;  %v3719_v5 = vor.u32 %v3953_v47, %v3716_v48  ;;  %v1955_v47 = vld [vmem:[#allocation2 + $0xc9] sm:$0xff] }
 0x1d7   : >> { %v2045_v11 = vpop.permute.xlu0 %2044  ;;  %1465 = vst.msk [vmem:[#allocation3 + $0x28] sm:$0xf] %vm1459_vm7, %v1374_v51  ;;  %v1954_v51 = vld [vmem:[#allocation2 + $0xc1] sm:$0xff] }
 0x1d8   : >> { %2138 = vst.msk [vmem:[#allocation3 + $0x18] sm:$0xf] %vm2134_vm10, %v2045_v11  ;;  %v5093_v54 = vpop.permute.xlu2 %1377  ;;  %v3690_v31 = vld [vmem:[#allocation3 + $0x10] sm:$0xf]  ;;  %3848 = vmatmul.msk.bf16.gmra.mxu1 %vm209_vm0, %v3719_v5  ;;  %v5160_v32 = vpack.c.bf16 %v1954_v51, %v1954_v51 }
 0x1d9   : >> { %2241 = vst.msk [vmem:[#allocation3 + $0x54] sm:$0xf] %vm559_vm3, %v5095_v14 }
 0x1da   : >> { %v3724_v58 = vld [vmem:[#allocation3 + $0x58] sm:$0xf0] }
 0x1dc   : >> { %1861 = vrot.lane.b32.xlu1 %v4849_v50, %s4057_s12 }
 0x1dd   : >> { %1411 = vrot.lane.b32.xlu0 %v1323_v60, %s4055_s10 }
 0x1de   : >> { %v1822_v41 = vpop.permute.xlu1 %1821  ;;  %1863 = vrot.lane.b32.xlu2 %v4821_v23, %s4057_s12 }
 0x1df   : >> { %v1372_v49 = vpop.permute.xlu0 %1371  ;;  %v3948_v1 = vld [vmem:[#allocation3 + $0x14] sm:$0xf0] }
 0x1e0   : >> { %1464 = vst.msk [vmem:[#allocation3 + $0x20] sm:$0xf] %vm1459_vm7, %v1372_v49  ;;  %v3691_v59 = vor.u32 %v3948_v1, %v3690_v31  ;;  %v5106_v46 = vpop.permute.xlu2 %1825  ;;  %v3955_v39 = vld [vmem:[#allocation3 + $0x54] sm:$0xf]  ;;  %v3732_v31 = vld [vmem:[#allocation3 + $0x68] sm:$0xf0] }
 0x1e1   : >> { %1689 = vst.msk [vmem:[#allocation3 + $0x20] sm:$0xf] %vm1684_vm8, %v5040_v55  ;;  %v1518_v1 = vld [vmem:[#allocation2 + $0x152] sm:$0xff] }
 0x1e2   : >> { %1914 = vst.msk [vmem:[#allocation3 + $0x20] sm:$0xf] %vm1909_vm9, %v1822_v41  ;;  %2554 = vmatmul.bf16.gmra.mxu0 %v3691_v59  ;;  %v5167_v41 = vpack.c.bf16 %v1955_v47, %v1955_v47  ;;  %v5169_v30 = vpack.c.bf16 %v1518_v1, %v1518_v1  ;;  %v2181_v59 = vld [vmem:[#allocation2 + $0xda] sm:$0xff] }
 0x1e4   : >> { %1164 = vrot.lane.b32.xlu1 %v4779_v43, %s4054_s9  ;;  %v3727_v43 = vor.u32 %v3955_v39, %v3724_v58  ;;  %2255 = vst.msk [vmem:[#allocation3 + $0xc4] sm:$0xf] %vm559_vm3, %v5169_v30  ;;  %v5180_v58 = vpack.c.bf16 %v2181_v59, %v2181_v59 }
 0x1e5   : >> { %1638 = vrot.lane.b32.xlu0 %v5045_v35, %s4056_s11 }
 0x1e6   : >> { %v2049_v2 = vpop.permute.xlu1 %2048  ;;  %2086 = vrot.lane.b32.xlu2 %v5111_v17, %s4058_s13  ;;  %2245 = vst.msk [vmem:[#allocation3 + $0x74] sm:$0xf] %vm559_vm3, %v5180_v58 }
 0x1e7   : >> { %v1599_v36 = vpop.permute.xlu0 %1598 }
 0x1e8   : >> { %1690 = vst.msk [vmem:[#allocation3 + $0x28] sm:$0xf] %vm1684_vm8, %v1599_v36  ;;  %v5120_v55 = vpop.permute.xlu2 %2052  ;;  %3849 = vmatmul.msk.bf16.gmra.mxu1 %vm209_vm0, %v3727_v43  ;;  %v1730_v36 = vld [vmem:[#allocation2 + $0xc8] sm:$0xff] }
 0x1e9   : >> { %1915 = vst.msk [vmem:[#allocation3 + $0x28] sm:$0xf] %vm1909_vm9, %v5057_v53  ;;  %v5133_v53 = vpack.c.bf16 %v2179_v45, %v2179_v45  ;;  %v5189_v56 = vpack.c.bf16 %v1730_v36, %v1730_v36  ;;  %v469_v45 = vld [vmem:[#allocation2 + $0xff] sm:$0x1] }
 0x1ea   : >> { %2140 = vst.msk [vmem:[#allocation3 + $0x28] sm:$0xf] %vm2134_vm10, %v2049_v2  ;;  %v2182_v2 = vld [vmem:[#allocation2 + $0xe2] sm:$0xff] }
 0x1eb   : >> { %2243 = vst.msk [vmem:[#allocation3 + $0x64] sm:$0xf] %vm559_vm3, %v5133_v53 }
 0x1ec   : >> { %1387 = vrot.lane.b32.xlu1 %v5061_v40, %s4055_s10  ;;  %v1729_v40 = vld [vmem:[#allocation2 + $0xc0] sm:$0xff]  ;;  %487 = vst.msk [vmem:[#allocation2 + $0x101] sm:$0x1] %vm440_vm2, %v469_v45 }
 0x1ed   : >> { %1162 = vrot.lane.b32.xlu0 %v6071_v33, %s4054_s9  ;;  %v6079_v45 = vld [vmem:[#allocation29_spill] sm:$0xff] }
 0x1ee   : >> { %v1376_v38 = vpop.permute.xlu1 %1375  ;;  %1389 = vrot.lane.b32.xlu2 %v5038_v37, %s4055_s10  ;;  %v5145_v37 = vpack.c.bf16 %v1729_v40, %v1729_v40 }
 0x1ef   : >> { %v2047_v57 = vpop.permute.xlu0 %2046  ;;  %1466 = vst.msk [vmem:[#allocation3 + $0x30] sm:$0xf] %vm1459_vm7, %v1376_v38 }
 0x1f0   : >> { %2139 = vst.msk [vmem:[#allocation3 + $0x20] sm:$0xf] %vm2134_vm10, %v2047_v57  ;;  %v5139_v33 = vpop.permute.xlu2 %1379 }
 0x1f1   : >> { %v3950_v52 = vld [vmem:[#allocation3 + $0x24] sm:$0xf0] }
 0x1f2   : >> { %v3957_v5 = vld [vmem:[#allocation3 + $0x64] sm:$0xf] }
 0x1f3   : >> { %v3735_v49 = vor.u32 %v3957_v5, %v3732_v31  ;;  %v2184_v40 = vld [vmem:[#allocation2 + $0xfa] sm:$0xff] }
 0x1f4   : >> { %1614 = vrot.lane.b32.xlu1 %v5082_v63, %s4056_s11  ;;  %v5224_v47 = vpack.c.bf16 %v2184_v40, %v2184_v40  ;;  %v6076_v5 = vld [vmem:[#allocation36_spill] sm:$0xff] }
 0x1f5   : >> { %2088 = vrot.lane.b32.xlu0 %v5141_v62, %s4058_s13 }
 0x1f6   : >> { %v1603_v61 = vpop.permute.xlu1 %1602  ;;  %1837 = vrot.lane.b32.xlu2 %v5145_v37, %s4057_s12  ;;  %2248 = vst.msk [vmem:[#allocation3 + $0x8c] sm:$0xf] %vm559_vm3, %v5224_v47 }
 0x1f7   : >> { %v1153_v11 = vpop.permute.xlu0 %1152  ;;  %v3698_v60 = vld [vmem:[#allocation3 + $0x20] sm:$0xf] }
 0x1f8   : >> { %1242 = vst.msk [vmem:[#allocation3 + $0x38] sm:$0xf] %vm1234_vm6, %v1153_v11  ;;  %v3699_v63 = vor.u32 %v3950_v52, %v3698_v60  ;;  %v5162_v48 = vpop.permute.xlu2 %1606  ;;  %3850 = vmatmul.msk.bf16.gmra.mxu1 %vm209_vm0, %v3735_v49  ;;  %v6073_v11 = vld [vmem:[#allocation38_spill] sm:$0xff]  ;;  %v6074_v60 = vld [vmem:[#allocation39_spill] sm:$0xff] }
 0x1f9   : >> { %1467 = vst.msk [vmem:[#allocation3 + $0x38] sm:$0xf] %vm1459_vm7, %v5093_v54 }
 0x1fa   : >> { %1692 = vst.msk [vmem:[#allocation3 + $0x38] sm:$0xf] %vm1684_vm8, %v1603_v61  ;;  %2559 = vmatmul.bf16.gmra.mxu0 %v3699_v63  ;;  %v6075_v63 = vld [vmem:[#allocation35_spill] sm:$0xff] }
 0x1fb   : >> { %v5236_v31 = vor.u32 %v6076_v5, %v6075_v63  ;;  %v1968_v63 = vld [vmem:[#allocation2 + $0x169] sm:$0xff] }
 0x1fc   : >> { %2062 = vrot.lane.b32.xlu1 %v5160_v32, %s4058_s13 }
 0x1fd   : >> { %1612 = vrot.lane.b32.xlu0 %v5095_v14, %s4056_s11  ;;  %v5185_v14 = vpack.c.bf16 %v2182_v2, %v2182_v2  ;;  %v6077_v2 = vld [vmem:[#allocation32_spill] sm:$0xff] }
 0x1fe   : >> { %v2051_v54 = vpop.permute.xlu1 %2050  ;;  %2064 = vrot.lane.b32.xlu2 %v5167_v41, %s4058_s13 }
 0x1ff   : >> { %v1601_v39 = vpop.permute.xlu0 %1600  ;;  %2246 = vst.msk [vmem:[#allocation3 + $0x7c] sm:$0xf] %vm559_vm3, %v5185_v14 }
 0x200   : >> { %1691 = vst.msk [vmem:[#allocation3 + $0x30] sm:$0xf] %vm1684_vm8, %v1601_v39  ;;  %v5183_v43 = vpop.permute.xlu2 %2054 }
 0x201   : >> { %1916 = vst.msk [vmem:[#allocation3 + $0x30] sm:$0xf] %vm1909_vm9, %v5106_v46 }
 0x202   : >> { %2141 = vst.msk [vmem:[#allocation3 + $0x30] sm:$0xf] %vm2134_vm10, %v2051_v54  ;;  %v6078_v54 = vld [vmem:[#allocation33_spill] sm:$0xff] }
 0x203   : >> { %v5251_v36 = vor.u32 %v6078_v54, %v6077_v2  ;;  %v5312_v2 = vpack.c.bf16 %v1968_v63, %v1968_v63  ;;  %v1731_v63 = vld [vmem:[#allocation2 + $0xd8] sm:$0xff] }
 0x204   : >> { %967 = vrot.lane.b32.xlu1 %v5045_v35, %s4053_s8  ;;  %v3959_v35 = vld [vmem:[#allocation3 + $0x74] sm:$0xf] }
 0x205   : >> { %1839 = vrot.lane.b32.xlu0 %v5189_v56, %s4057_s12 }
 0x206   : >> { %v1157_v26 = vpop.permute.xlu1 %1156  ;;  %1190 = vrot.lane.b32.xlu2 %v4849_v50, %s4054_s9  ;;  %v3740_v34 = vld [vmem:[#allocation3 + $0x78] sm:$0xf0]  ;;  %v2183_v50 = vld [vmem:[#allocation2 + $0xf2] sm:$0xff] }
 0x207   : >> { %v1828_v46 = vpop.permute.xlu0 %1827  ;;  %1244 = vst.msk [vmem:[#allocation3 + $0x48] sm:$0xf] %vm1234_vm6, %v1157_v26  ;;  %v3743_v57 = vor.u32 %v3959_v35, %v3740_v34  ;;  %v5215_v51 = vpack.c.bf16 %v2183_v50, %v2183_v50  ;;  %v6080_v26 = vld [vmem:[#allocation30_spill] sm:$0xff] }
 0x208   : >> { %1917 = vst.msk [vmem:[#allocation3 + $0x38] sm:$0xf] %vm1909_vm9, %v1828_v46  ;;  %v1161_v38 = vpop.permute.xlu2 %1160  ;;  %v5261_v46 = vor.u32 %v6080_v26, %v6079_v45  ;;  %v2185_v35 = vld [vmem:[#allocation2 + $0x10a] sm:$0xff] }
 0x209   : >> { %2142 = vst.msk [vmem:[#allocation3 + $0x38] sm:$0xf] %vm2134_vm10, %v5120_v55  ;;  %v3706_v52 = vld [vmem:[#allocation3 + $0x30] sm:$0xf]  ;;  %3851 = vmatmul.msk.bf16.gmra.mxu1 %vm209_vm0, %v3743_v57  ;;  %v6088_v45 = vld [vmem:[#allocation18_spill] sm:$0xff] }
 0x20a   : >> { %1246 = vst.msk [vmem:[#allocation3 + $0x58] sm:$0xf] %vm1234_vm6, %v1161_v38  ;;  %v1969_v38 = vld [vmem:[#allocation2 + $0x171] sm:$0xff] }
 0x20b   : >> { %2247 = vst.msk [vmem:[#allocation3 + $0x84] sm:$0xf] %vm559_vm3, %v5215_v51  ;;  %v5273_v50 = vpack.c.bf16 %v1969_v38, %v1969_v38 }
 0x20c   : >> { %1415 = vrot.lane.b32.xlu1 %v5111_v17, %s4055_s10 }
 0x20d   : >> { %965 = vrot.lane.b32.xlu0 %v5066_v44, %s4053_s8  ;;  %v5222_v44 = vor.u32 %v6074_v60, %v6073_v11  ;;  %v6084_v11 = vld [vmem:[#allocation24_spill] sm:$0xff] }
 0x20e   : >> { %v1605_v20 = vpop.permute.xlu1 %1604  ;;  %1417 = vrot.lane.b32.xlu2 %v5141_v62, %s4055_s10 }
 0x20f   : >> { %v1155_v55 = vpop.permute.xlu0 %1154  ;;  %2815 = vmatpush.bf16.msra.mxu2 %v5222_v44 }
 0x210   : >> { %1243 = vst.msk [vmem:[#allocation3 + $0x40] sm:$0xf] %vm1234_vm6, %v1155_v55  ;;  %v3952_v61 = vld [vmem:[#allocation3 + $0x34] sm:$0xf0]  ;;  %v5218_v17 = vpop.permute.xlu2 %1608 }
 0x211   : >> { %1468 = vst.msk [vmem:[#allocation3 + $0x40] sm:$0xf] %vm1459_vm7, %v5139_v33  ;;  %v3707_v62 = vor.u32 %v3952_v61, %v3706_v52  ;;  %v470_v33 = vld [vmem:[#allocation2 + $0x117] sm:$0x1] }
 0x212   : >> { %1693 = vst.msk [vmem:[#allocation3 + $0x40] sm:$0xf] %vm1684_vm8, %v1605_v20  ;;  %v6081_v20 = vld [vmem:[#allocation26_spill] sm:$0xff]  ;;  %v6082_v52 = vld [vmem:[#allocation27_spill] sm:$0xff] }
 0x213   : >> { %2564 = vmatmul.bf16.gmra.mxu0 %v3707_v62  ;;  %2816 = vmatpush.bf16.msra.mxu2 %v5236_v31  ;;  %488 = vst.msk [vmem:[#allocation2 + $0x119] sm:$0x1] %vm440_vm2, %v470_v33  ;;  %v5277_v55 = vor.u32 %v6082_v52, %v6081_v20  ;;  %v5293_v62 = vld [vmem:[#allocation2 + $0x170] sm:$0xff] }
 0x214   : >> { %1642 = vrot.lane.b32.xlu1 %v5151_v0, %s4056_s11  ;;  %420 = vst.msk [vmem:[#allocation2 + $0x1a0] sm:$0xff] %vm209_vm0, %v5293_v62 }
 0x215   : >> { %1192 = vrot.lane.b32.xlu0 %v4821_v23, %s4054_s9  ;;  %v3961_v23 = vld [vmem:[#allocation3 + $0x84] sm:$0xf] }
 0x216   : >> { %v1832_v49 = vpop.permute.xlu1 %1831  ;;  %1865 = vrot.lane.b32.xlu2 %v4861_v8, %s4057_s12  ;;  %v3748_v8 = vld [vmem:[#allocation3 + $0x88] sm:$0xf0] }
 0x217   : >> { %v1382_v1 = vpop.permute.xlu0 %1381  ;;  %2817 = vmatpush.bf16.msra.mxu2 %v5251_v36  ;;  %v3751_v39 = vor.u32 %v3961_v23, %v3748_v8 }
 0x218   : >> { %1469 = vst.msk [vmem:[#allocation3 + $0x48] sm:$0xf] %vm1459_vm7, %v1382_v1  ;;  %v5247_v59 = vpop.permute.xlu2 %1835  ;;  %v6086_v1 = vld [vmem:[#allocation21_spill] sm:$0xff] }
 0x219   : >> { %1694 = vst.msk [vmem:[#allocation3 + $0x48] sm:$0xf] %vm1684_vm8, %v5162_v48  ;;  %3852 = vmatmul.msk.bf16.gmra.mxu1 %vm209_vm0, %v3751_v39  ;;  %v6087_v39 = vld [vmem:[#allocation17_spill] sm:$0xff] }
 0x21a   : >> { %1919 = vst.msk [vmem:[#allocation3 + $0x48] sm:$0xf] %vm1909_vm9, %v1832_v49  ;;  %v2186_v48 = vld [vmem:[#allocation2 + $0x112] sm:$0xff]  ;;  %v5319_v26 = vor.u32 %v6088_v45, %v6087_v39  ;;  %v1957_v39 = vld [vmem:[#allocation2 + $0xe1] sm:$0xff] }
 0x21b   : >> { %2818 = vmatpush.bf16.msra.mxu2 %v5261_v46  ;;  %v5279_v61 = vpack.c.bf16 %v2186_v48, %v2186_v48  ;;  %v6085_v49 = vld [vmem:[#allocation20_spill] sm:$0xff]  ;;  %v1732_v48 = vld [vmem:[#allocation2 + $0xe0] sm:$0xff] }
 0x21c   : >> { %1166 = vrot.lane.b32.xlu1 %v5145_v37, %s4054_s9  ;;  %v5270_v37 = vpack.c.bf16 %v2185_v35, %v2185_v35  ;;  %v5332_v52 = vpack.c.bf16 %v1732_v48, %v1732_v48 }
 0x21d   : >> { %1640 = vrot.lane.b32.xlu0 %v5169_v30, %s4056_s11  ;;  %2250 = vst.msk [vmem:[#allocation3 + $0x9c] sm:$0xf] %vm559_vm3, %v5279_v61 }
 0x21e   : >> { %v1159_v34 = vpop.permute.xlu1 %1158  ;;  %1168 = vrot.lane.b32.xlu2 %v5189_v56, %s4054_s9  ;;  %2249 = vst.msk [vmem:[#allocation3 + $0x94] sm:$0xf] %vm559_vm3, %v5270_v37  ;;  %v6083_v56 = vld [vmem:[#allocation23_spill] sm:$0xff] }
 0x21f   : >> { %v1830_v57 = vpop.permute.xlu0 %1829  ;;  %1245 = vst.msk [vmem:[#allocation3 + $0x50] sm:$0xf] %vm1234_vm6, %v1159_v34  ;;  %2819 = vmatpush.bf16.msra.mxu2 %v5277_v55  ;;  %v5291_v60 = vor.u32 %v6084_v11, %v6083_v56  ;;  %v438_v11 = vld [vmem:[#allocation2 + $0x182] sm:$0x1] }
 0x220   : >> { %1918 = vst.msk [vmem:[#allocation3 + $0x40] sm:$0xf] %vm1909_vm9, %v1830_v57  ;;  %v962_v40 = vpop.permute.xlu2 %961 }
 0x221   : >> { %2143 = vst.msk [vmem:[#allocation3 + $0x40] sm:$0xf] %vm2134_vm10, %v5183_v43 }
 0x222   : >> { %1034 = vst.msk [vmem:[#allocation3 + $0xc0] sm:$0xf] %vm1009_vm5, %v962_v40  ;;  %v1956_v40 = vld [vmem:[#allocation2 + $0xd9] sm:$0xff] }
 0x223   : >> { %2820 = vmatpush.bf16.msra.mxu2 %v5291_v60  ;;  %457 = vst.msk [vmem:[#allocation2 + $0x180] sm:$0x1] %vm440_vm2, %v438_v11 }
 0x224   : >> { %2092 = vrot.lane.b32.xlu1 %v5273_v50, %s4058_s13  ;;  %v3756_v23 = vld [vmem:[#allocation3 + $0x98] sm:$0xf0] }
 0x225   : >> { %1867 = vrot.lane.b32.xlu0 %v4843_v42, %s4057_s12  ;;  %v5310_v42 = vor.u32 %v6086_v1, %v6085_v49  ;;  %v3963_v54 = vld [vmem:[#allocation3 + $0x94] sm:$0xf]  ;;  %v3764_v49 = vld [vmem:[#allocation3 + $0xa8] sm:$0xf0] }
 0x226   : >> { %v1386_v43 = vpop.permute.xlu1 %1385  ;;  %1391 = vrot.lane.b32.xlu2 %v5160_v32, %s4055_s10  ;;  %v1520_v32 = vld [vmem:[#allocation2 + $0x16a] sm:$0xff]  ;;  %v3759_v8 = vor.u32 %v3963_v54, %v3756_v23  ;;  %v5353_v54 = vpack.c.bf16 %v1731_v63, %v1731_v63  ;;  %v417_v23 = vld [vmem:[#allocation2 + $0x178] sm:$0x3] }
 0x227   : >> { %v2057_v5 = vpop.permute.xlu0 %2056  ;;  %1471 = vst.msk [vmem:[#allocation3 + $0x58] sm:$0xf] %vm1459_vm7, %v1386_v43  ;;  %2821 = vmatpush.bf16.msra.mxu2 %v5310_v42  ;;  %v5321_v38 = vpack.c.bf16 %v1520_v32, %v1520_v32  ;;  %v474_v32 = vld [vmem:[#allocation2 + $0x177] sm:$0x1] }
 0x228   : >> { %2144 = vst.msk [vmem:[#allocation3 + $0x48] sm:$0xf] %vm2134_vm10, %v2057_v5  ;;  %v5306_v33 = vpop.permute.xlu2 %1188  ;;  %v3714_v35 = vld [vmem:[#allocation3 + $0x40] sm:$0xf]  ;;  %v3965_v5 = vld [vmem:[#allocation3 + $0xa4] sm:$0xf] }
 0x229   : >> { %3853 = vmatmul.msk.bf16.gmra.mxu1 %vm209_vm0, %v3759_v8  ;;  %2257 = vst.msk [vmem:[#allocation3 + $0xd4] sm:$0xf] %vm559_vm3, %v5321_v38 }
 0x22a   : >> { %492 = vst.msk [vmem:[#allocation2 + $0x179] sm:$0x1] %vm440_vm2, %v474_v32 }
 0x22b   : >> { %2822 = vmatpush.bf16.msra.mxu2 %v5319_v26  ;;  %421 = vst.msk [vmem:[#allocation2 + $0x1a8] sm:$0x3] %vm212_vm1, %v417_v23 }
 0x22c   : >> { %1616 = vrot.lane.b32.xlu1 %v5133_v53, %s4056_s11 }
 0x22d   : >> { %2090 = vrot.lane.b32.xlu0 %v5312_v2, %s4058_s13 }
 0x22e   : >> { %v1834_v34 = vpop.permute.xlu1 %1833  ;;  %1618 = vrot.lane.b32.xlu2 %v5135_v29, %s4056_s11  ;;  %v5339_v29 = vpack.c.bf16 %v1956_v40, %v1956_v40 }
 0x22f   : >> { %v1384_v53 = vpop.permute.xlu0 %1383  ;;  %v3954_v57 = vld [vmem:[#allocation3 + $0x44] sm:$0xf0] }
 0x230   : >> { %1470 = vst.msk [vmem:[#allocation3 + $0x50] sm:$0xf] %vm1459_vm7, %v1384_v53  ;;  %v3715_v20 = vor.u32 %v3954_v57, %v3714_v35  ;;  %v5334_v56 = vpop.permute.xlu2 %1636  ;;  %v1103_v35 = vpack.c.bf16 %v5293_v62, %v5293_v62 }
 0x231   : >> { %1695 = vst.msk [vmem:[#allocation3 + $0x50] sm:$0xf] %vm1684_vm8, %v5218_v17  ;;  %v1521_v53 = vld [vmem:[#allocation2 + $0x172] sm:$0xff] }
 0x232   : >> { %1920 = vst.msk [vmem:[#allocation3 + $0x50] sm:$0xf] %vm1909_vm9, %v1834_v34  ;;  %2569 = vmatmul.bf16.gmra.mxu0 %v3715_v20  ;;  %v5369_v34 = vpack.c.bf16 %v1957_v39, %v1957_v39  ;;  %v5372_v57 = vpack.c.bf16 %v1521_v53, %v1521_v53 }
 0x234   : >> { %1843 = vrot.lane.b32.xlu1 %v5332_v52, %s4057_s12  ;;  %2258 = vst.msk [vmem:[#allocation3 + $0xdc] sm:$0xf] %vm559_vm3, %v5372_v57 }
 0x235   : >> { %1393 = vrot.lane.b32.xlu0 %v5167_v41, %s4055_s10  ;;  %v3767_v41 = vor.u32 %v3965_v5, %v3764_v49  ;;  %v3772_v5 = vld [vmem:[#allocation3 + $0xb8] sm:$0xf0] }
 0x236   : >> { %v2061_v43 = vpop.permute.xlu1 %2060  ;;  %2066 = vrot.lane.b32.xlu2 %v5339_v29, %s4058_s13 }
 0x237   : >> { %v1611_v17 = vpop.permute.xlu0 %1610 }
 0x238   : >> { %1696 = vst.msk [vmem:[#allocation3 + $0x58] sm:$0xf] %vm1684_vm8, %v1611_v17  ;;  %v5349_v1 = vpop.permute.xlu2 %1863  ;;  %v3967_v17 = vld [vmem:[#allocation3 + $0xb4] sm:$0xf] }
 0x239   : >> { %1921 = vst.msk [vmem:[#allocation3 + $0x58] sm:$0xf] %vm1909_vm9, %v5247_v59  ;;  %3854 = vmatmul.msk.bf16.gmra.mxu1 %vm209_vm0, %v3767_v41  ;;  %v2639_v59 = vpop.f32.mrf.mxu1 }
 0x23a   : >> { %2146 = vst.msk [vmem:[#allocation3 + $0x58] sm:$0xf] %vm2134_vm10, %v2061_v43  ;;  %v1070_v43 = vld [vmem:[#allocation2 + $0x168] sm:$0xff] }
 0x23b   : >> { %v1102_v39 = vpack.c.bf16 %v1070_v43, %v1070_v43 }
 0x23c   : >> { %969 = vrot.lane.b32.xlu1 %v5169_v30, %s4053_s8 }
 0x23d   : >> { %1841 = vrot.lane.b32.xlu0 %v5353_v54, %s4057_s12 }
 0x23e   : >> { %v1187_v8 = vpop.permute.xlu1 %1186  ;;  %971 = vrot.lane.b32.xlu2 %v5151_v0, %s4053_s8  ;;  %v6089_v0 = vld [vmem:[#allocation41_spill] sm:$0xff] }
 0x23f   : >> { %v2059_v45 = vpop.permute.xlu0 %2058  ;;  %1259 = vst.msk [vmem:[#allocation3 + $0xc0] sm:$0xf] %vm1234_vm6, %v1187_v8 }
 0x240   : >> { %2145 = vst.msk [vmem:[#allocation3 + $0x50] sm:$0xf] %vm2134_vm10, %v2059_v45  ;;  %v2550_v30 = vpop.f32.mrf.mxu0  ;;  %v2087_v48 = vpop.permute.xlu2 %2086  ;;  %v3775_v45 = vor.u32 %v3967_v17, %v3772_v5  ;;  %v1745_v17 = vld [vmem:[#allocation2 + $0x180] sm:$0xff]  ;;  %v1971_v5 = vld [vmem:[#allocation2 + $0x189] sm:$0xff] }
 0x241   : >> { %v2551_v40 = vadd.f32 %v6089_v0, %v2550_v30  ;;  %v3956_v20 = vld [vmem:[#allocation3 + $0x54] sm:$0xf0] }
 0x243   : >> { %v2640_v32 = vadd.f32 %v2639_v59, %v2551_v40  ;;  %v1746_v59 = vld [vmem:[#allocation2 + $0x188] sm:$0xff] }
 0x244   : >> { %1196 = vrot.lane.b32.xlu1 %v1103_v35, %s4054_s9 }
 0x245   : >> { %2068 = vrot.lane.b32.xlu0 %v5369_v34, %s4058_s13  ;;  %v2719_v35 = vmax.f32 %v2640_v32, 0.0 }
 0x246   : >> { %v1414_v11 = vpop.permute.xlu1 %1413  ;;  %1419 = vrot.lane.b32.xlu2 %v5312_v2, %s4055_s10  ;;  %v2641_v2 = vpop.f32.mrf.mxu1 }
 0x247   : >> { %v964_v62 = vpop.permute.xlu0 %963  ;;  %v3722_v63 = vld [vmem:[#allocation3 + $0x50] sm:$0xf] }
 0x248   : >> { %1035 = vst.msk [vmem:[#allocation3 + $0xc8] sm:$0xf] %vm1009_vm5, %v964_v62  ;;  %v2552_v49 = vpop.f32.mrf.mxu0  ;;  %v3723_v41 = vor.u32 %v3956_v20, %v3722_v63  ;;  %v1390_v23 = vpop.permute.xlu2 %1389  ;;  %v1970_v62 = vld [vmem:[#allocation2 + $0x181] sm:$0xff] }
 0x249   : >> { %1260 = vst.msk [vmem:[#allocation3 + $0xc8] sm:$0xf] %vm1234_vm6, %v5306_v33  ;;  %v2553_v8 = vadd.f32 %v6089_v0, %v2552_v49  ;;  %3855 = vmatmul.msk.bf16.gmra.mxu1 %vm209_vm0, %v3775_v45 }
 0x24a   : >> { %1485 = vst.msk [vmem:[#allocation3 + $0xc8] sm:$0xf] %vm1459_vm7, %v1414_v11  ;;  %2574 = vmatmul.bf16.gmra.mxu0 %v3723_v41  ;;  %v5393_v11 = vpack.c.bf16 %v1746_v59, %v1746_v59  ;;  %v3780_v41 = vld [vmem:[#allocation3 + $0xc8] sm:$0xf0] }
 0x24b   : >> { %v2642_v30 = vadd.f32 %v2641_v2, %v2553_v8 }
 0x24c   : >> { %1644 = vrot.lane.b32.xlu1 %v5321_v38, %s4056_s11 }
 0x24d   : >> { %v2720_v53 = vmax.f32 %v2642_v30, 0.0  ;;  %1194 = vrot.lane.b32.xlu0 %v1102_v39, %s4054_s9 }
 0x24e   : >> { %v1862_v40 = vpop.permute.xlu1 %1861  ;;  %1646 = vrot.lane.b32.xlu2 %v5372_v57, %s4056_s11  ;;  %v2644_v39 = vpop.f32.mrf.mxu1 }
 0x24f   : >> { %v1412_v33 = vpop.permute.xlu0 %1411  ;;  %v2751_v20 = vpack.c.bf16 %v2720_v53, %v2719_v35  ;;  %v1733_v53 = vld [vmem:[#allocation2 + $0xf0] sm:$0xff] }
 0x250   : >> { %1484 = vst.msk [vmem:[#allocation3 + $0xc0] sm:$0xf] %vm1459_vm7, %v1412_v33  ;;  %v5395_v43 = vpop.permute.xlu2 %1837 }
 0x251   : >> { %1709 = vst.msk [vmem:[#allocation3 + $0xc0] sm:$0xf] %vm1684_vm8, %v5334_v56  ;;  %2823 = vmatmul.bf16.vlgmr.msra.gmra.mxu2 %v2751_v20  ;;  %v3969_v56 = vld [vmem:[#allocation3 + $0xc4] sm:$0xf] }
 0x252   : >> { %1934 = vst.msk [vmem:[#allocation3 + $0xc0] sm:$0xf] %vm1909_vm9, %v1862_v40  ;;  %v3783_v8 = vor.u32 %v3969_v56, %v3780_v41 }
 0x253   : >> { %2159 = vst.msk [vmem:[#allocation3 + $0xc0] sm:$0xf] %vm2134_vm10, %v2087_v48  ;;  %v5409_v48 = vpack.c.bf16 %v1970_v62, %v1970_v62 }
 0x254   : >> { %1871 = vrot.lane.b32.xlu1 %v5393_v11, %s4057_s12 }
 0x255   : >> { %1421 = vrot.lane.b32.xlu0 %v5273_v50, %s4055_s10  ;;  %v5415_v50 = vpack.c.bf16 %v1745_v17, %v1745_v17 }
 0x256   : >> { %v1165_v63 = vpop.permute.xlu1 %1164  ;;  %1170 = vrot.lane.b32.xlu2 %v5353_v54, %s4054_s9  ;;  %v5418_v54 = vpack.c.bf16 %v1971_v5, %v1971_v5  ;;  %v2646_v35 = vpop.f32.mrf.mxu1  ;;  %v475_v5 = vld [vmem:[#allocation2 + $0x18f] sm:$0x1] }
 0x257   : >> { %v1639_v49 = vpop.permute.xlu0 %1638  ;;  %1248 = vst.msk [vmem:[#allocation3 + $0x68] sm:$0xf] %vm1234_vm6, %v1165_v63  ;;  %v5441_v63 = vpack.c.bf16 %v1733_v53, %v1733_v53 }
 0x258   : >> { %1710 = vst.msk [vmem:[#allocation3 + $0xc8] sm:$0xf] %vm1684_vm8, %v1639_v49  ;;  %v5411_v32 = vpop.permute.xlu2 %2064  ;;  %v1734_v49 = vld [vmem:[#allocation2 + $0xf8] sm:$0xff] }
 0x259   : >> { %1935 = vst.msk [vmem:[#allocation3 + $0xc8] sm:$0xf] %vm1909_vm9, %v5349_v1  ;;  %3856 = vmatmul.msk.bf16.gmra.mxu1 %vm209_vm0, %v3783_v8  ;;  %v5448_v41 = vpack.c.bf16 %v1734_v49, %v1734_v49 }
 0x25a   : >> { %1473 = vst.msk [vmem:[#allocation3 + $0x68] sm:$0xf] %vm1459_vm7, %v1390_v23  ;;  %v3778_v8 = vld [vmem:[#allocation3 + $0xc0] sm:$0xf] }
 0x25b   : >> { %493 = vst.msk [vmem:[#allocation2 + $0x191] sm:$0x1] %vm440_vm2, %v475_v5 }
 0x25c   : >> { %2094 = vrot.lane.b32.xlu1 %v5409_v48, %s4058_s13 }
 0x25d   : >> { %1869 = vrot.lane.b32.xlu0 %v5415_v50, %s4057_s12 }
 0x25e   : >> { %v1388_v2 = vpop.permute.xlu1 %1387  ;;  %2096 = vrot.lane.b32.xlu2 %v5418_v54, %s4058_s13 }
 0x25f   : >> { %v1163_v1 = vpop.permute.xlu0 %1162  ;;  %v2555_v45 = vpop.f32.mrf.mxu0 }
 0x260   : >> { %1247 = vst.msk [vmem:[#allocation3 + $0x60] sm:$0xf] %vm1234_vm6, %v1163_v1  ;;  %v5428_v23 = vpop.permute.xlu2 %1190  ;;  %v2556_v30 = vadd.f32 %v6089_v0, %v2555_v45  ;;  %v2649_v45 = vpop.f32.mrf.mxu1 }
 0x261   : >> { %1472 = vst.msk [vmem:[#allocation3 + $0x60] sm:$0xf] %vm1459_vm7, %v1388_v2 }
 0x262   : >> { %v2645_v20 = vadd.f32 %v2644_v39, %v2556_v30  ;;  %v1959_v39 = vld [vmem:[#allocation2 + $0xf9] sm:$0xff] }
 0x264   : >> { %1397 = vrot.lane.b32.xlu1 %v5369_v34, %s4055_s10 }
 0x265   : >> { %1172 = vrot.lane.b32.xlu0 %v5332_v52, %s4054_s9  ;;  %v439_v52 = vld [vmem:[#allocation2 + $0x19a] sm:$0x1] }
 0x266   : >> { %v1615_v59 = vpop.permute.xlu1 %1614  ;;  %1620 = vrot.lane.b32.xlu2 %v5180_v58, %s4056_s11  ;;  %458 = vst.msk [vmem:[#allocation2 + $0x198] sm:$0x1] %vm440_vm2, %v439_v52  ;;  %v2721_v58 = vmax.f32 %v2645_v20, 0.0 }
 0x267   : >> { %v2089_v40 = vpop.permute.xlu0 %2088  ;;  %v2557_v33 = vpop.f32.mrf.mxu0  ;;  %1698 = vst.msk [vmem:[#allocation3 + $0x68] sm:$0xf] %vm1684_vm8, %v1615_v59  ;;  %v5456_v59 = vpack.c.bf16 %v1959_v39, %v1959_v39  ;;  %v476_v39 = vld [vmem:[#allocation2 + $0x1a7] sm:$0x1] }
 0x268   : >> { %2160 = vst.msk [vmem:[#allocation3 + $0xc8] sm:$0xf] %vm2134_vm10, %v2089_v40  ;;  %v2558_v62 = vadd.f32 %v6089_v0, %v2557_v33  ;;  %v5443_v34 = vpop.permute.xlu2 %1417  ;;  %v2651_v52 = vpop.f32.mrf.mxu1 }
 0x269   : >> { %494 = vst.msk [vmem:[#allocation2 + $0x1a9] sm:$0x1] %vm440_vm2, %v476_v39 }
 0x26a   : >> { %v2647_v17 = vadd.f32 %v2646_v35, %v2558_v62  ;;  %v1958_v62 = vld [vmem:[#allocation2 + $0xf1] sm:$0xff] }
 0x26c   : >> { %v2722_v56 = vmax.f32 %v2647_v17, 0.0  ;;  %1845 = vrot.lane.b32.xlu1 %v5441_v63, %s4057_s12 }
 0x26d   : >> { %1395 = vrot.lane.b32.xlu0 %v5339_v29, %s4055_s10  ;;  %v1523_v29 = vld [vmem:[#allocation2 + $0x18a] sm:$0xff] }
 0x26e   : >> { %v2063_v2 = vpop.permute.xlu1 %2062  ;;  %v2752_v1 = vpack.c.bf16 %v2722_v56, %v2721_v58  ;;  %1847 = vrot.lane.b32.xlu2 %v5448_v41, %s4057_s12  ;;  %v5466_v33 = vpack.c.bf16 %v1523_v29, %v1523_v29 }
 0x26f   : >> { %v1613_v30 = vpop.permute.xlu0 %1612  ;;  %v3970_v35 = vld [vmem:[#allocation3 + $0xc4] sm:$0xf0] }
 0x270   : >> { %1697 = vst.msk [vmem:[#allocation3 + $0x60] sm:$0xf] %vm1684_vm8, %v1613_v30  ;;  %2828 = vmatmul.bf16.gmra.mxu2 %v2752_v1  ;;  %v3779_v53 = vor.u32 %v3970_v35, %v3778_v8  ;;  %v5458_v40 = vpop.permute.xlu2 %1865 }
 0x271   : >> { %1922 = vst.msk [vmem:[#allocation3 + $0x60] sm:$0xf] %vm1909_vm9, %v5395_v43 }
 0x272   : >> { %2147 = vst.msk [vmem:[#allocation3 + $0x60] sm:$0xf] %vm2134_vm10, %v2063_v2  ;;  %2609 = vmatmul.bf16.vlgmr.msra.gmra.mxu3 %v3779_v53 }
 0x273   : >> { %3986 = vmatpush.bf16.msra.mxu3 %v5222_v44  ;;  %2260 = vst.msk [vmem:[#allocation3 + $0xec] sm:$0xf] %vm559_vm3, %v5466_v33 }
 0x274   : >> { %2072 = vrot.lane.b32.xlu1 %v5456_v59, %s4058_s13 }
 0x275   : >> { %1622 = vrot.lane.b32.xlu0 %v5185_v14, %s4056_s11  ;;  %v5479_v14 = vpack.c.bf16 %v1958_v62, %v1958_v62 }
 0x276   : >> { %v968_v20 = vpop.permute.xlu1 %967  ;;  %973 = vrot.lane.b32.xlu2 %v5321_v38, %s4053_s8 }
 0x277   : >> { %v1840_v43 = vpop.permute.xlu0 %1839  ;;  %v2560_v17 = vpop.f32.mrf.mxu0  ;;  %1037 = vst.msk [vmem:[#allocation3 + $0xd8] sm:$0xf] %vm1009_vm5, %v968_v20  ;;  %3987 = vmatpush.bf16.msra.mxu3 %v5236_v31 }
 0x278   : >> { %1923 = vst.msk [vmem:[#allocation3 + $0x68] sm:$0xf] %vm1909_vm9, %v1840_v43  ;;  %v1169_v44 = vpop.permute.xlu2 %1168  ;;  %v2561_v38 = vadd.f32 %v6089_v0, %v2560_v17  ;;  %v3971_v17 = vld [vmem:[#allocation3 + $0xd4] sm:$0xf] }
 0x279   : >> { %2148 = vst.msk [vmem:[#allocation3 + $0x68] sm:$0xf] %vm2134_vm10, %v5411_v32  ;;  %v3730_v5 = vld [vmem:[#allocation3 + $0x60] sm:$0xf] }
 0x27a   : >> { %1250 = vst.msk [vmem:[#allocation3 + $0x78] sm:$0xf] %vm1234_vm6, %v1169_v44  ;;  %v2650_v58 = vadd.f32 %v2649_v45, %v2561_v38 }
 0x27b   : >> { %3988 = vmatpush.bf16.msra.mxu3 %v5251_v36 }
 0x27c   : >> { %1198 = vrot.lane.b32.xlu1 %v5415_v50, %s4054_s9  ;;  %v2723_v1 = vmax.f32 %v2650_v58, 0.0 }
 0x27d   : >> { %2070 = vrot.lane.b32.xlu0 %v5479_v14, %s4058_s13 }
 0x27e   : >> { %v1416_v31 = vpop.permute.xlu1 %1415  ;;  %1200 = vrot.lane.b32.xlu2 %v5393_v11, %s4054_s9  ;;  %v2654_v11 = vpop.f32.mrf.mxu1 }
 0x27f   : >> { %v966_v32 = vpop.permute.xlu0 %965  ;;  %v2562_v49 = vpop.f32.mrf.mxu0  ;;  %3989 = vmatpush.bf16.msra.mxu3 %v5261_v46  ;;  %v1522_v46 = vld [vmem:[#allocation2 + $0x182] sm:$0xff] }
 0x280   : >> { %1036 = vst.msk [vmem:[#allocation3 + $0xd0] sm:$0xf] %vm1009_vm5, %v966_v32  ;;  %v2563_v36 = vadd.f32 %v6089_v0, %v2562_v49  ;;  %v3958_v56 = vld [vmem:[#allocation3 + $0x64] sm:$0xf0]  ;;  %v1392_v8 = vpop.permute.xlu2 %1391  ;;  %v1554_v30 = vpack.c.bf16 %v1522_v46, %v1522_v46  ;;  %v1062_v46 = vld [vmem:[#allocation2 + $0x108] sm:$0xff] }
 0x281   : >> { %1261 = vst.msk [vmem:[#allocation3 + $0xd0] sm:$0xf] %vm1234_vm6, %v5428_v23  ;;  %v3731_v50 = vor.u32 %v3958_v56, %v3730_v5  ;;  %v1747_v23 = vld [vmem:[#allocation2 + $0x198] sm:$0xff] }
 0x282   : >> { %v2652_v2 = vadd.f32 %v2651_v52, %v2563_v36  ;;  %1486 = vst.msk [vmem:[#allocation3 + $0xd0] sm:$0xf] %vm1459_vm7, %v1416_v31 }
 0x283   : >> { %2579 = vmatmul.bf16.gmra.mxu0 %v3731_v50  ;;  %3990 = vmatpush.bf16.msra.mxu3 %v5277_v55  ;;  %2259 = vst.msk [vmem:[#allocation3 + $0xe4] sm:$0xf] %vm559_vm3, %v1554_v30  ;;  %v1779_v55 = vpack.c.bf16 %v1747_v23, %v1747_v23  ;;  %v1973_v50 = vld [vmem:[#allocation2 + $0x1a1] sm:$0xff] }
 0x284   : >> { %v2724_v45 = vmax.f32 %v2652_v2, 0.0  ;;  %1425 = vrot.lane.b32.xlu1 %v5418_v54, %s4055_s10 }
 0x285   : >> { %975 = vrot.lane.b32.xlu0 %v5372_v57, %s4053_s8  ;;  %v1748_v57 = vld [vmem:[#allocation2 + $0x1a0] sm:$0xff] }
 0x286   : >> { %v1643_v35 = vpop.permute.xlu1 %1642  ;;  %v2753_v53 = vpack.c.bf16 %v2724_v45, %v2723_v1  ;;  %1648 = vrot.lane.b32.xlu2 %v1554_v30, %s4056_s11  ;;  %v1780_v54 = vpack.c.bf16 %v1748_v57, %v1748_v57  ;;  %v2656_v62 = vpop.f32.mrf.mxu1  ;;  %v6090_v45 = vld [vmem:[#allocation7_spill] sm:$0xff] }
 0x287   : >> { %v1193_v29 = vpop.permute.xlu0 %1192  ;;  %3991 = vmatpush.bf16.msra.mxu3 %v5291_v60  ;;  %v2904_v30 = vmul.u32 2654435769, %v6090_v45 }
 0x288   : >> { %1262 = vst.msk [vmem:[#allocation3 + $0xd8] sm:$0xf] %vm1234_vm6, %v1193_v29  ;;  %2833 = vmatmul.bf16.gmra.mxu2 %v2753_v53  ;;  %v5506_v20 = vpop.permute.xlu2 %1618 }
 0x289   : >> { %1487 = vst.msk [vmem:[#allocation3 + $0xd8] sm:$0xf] %vm1459_vm7, %v5443_v34  ;;  %v3788_v34 = vld [vmem:[#allocation3 + $0xd8] sm:$0xf0] }
 0x28a   : >> { %1712 = vst.msk [vmem:[#allocation3 + $0xd8] sm:$0xf] %vm1684_vm8, %v1643_v35  ;;  %v3791_v52 = vor.u32 %v3971_v17, %v3788_v34  ;;  %v1960_v35 = vld [vmem:[#allocation2 + $0x109] sm:$0xff]  ;;  %v1288_v17 = vld [vmem:[#allocation2 + $0x111] sm:$0xff] }
 0x28b   : >> { %3992 = vmatpush.bf16.msra.mxu3 %v5310_v42 }
 0x28c   : >> { %1873 = vrot.lane.b32.xlu1 %v1779_v55, %s4057_s12  ;;  %3857 = vmatmul.msk.bf16.gmra.mxu1 %vm209_vm0, %v3791_v52 }
 0x28d   : >> { %1423 = vrot.lane.b32.xlu0 %v5409_v48, %s4055_s10  ;;  %v1972_v48 = vld [vmem:[#allocation2 + $0x199] sm:$0xff] }
 0x28e   : >> { %v1167_v60 = vpop.permute.xlu1 %1166  ;;  %1875 = vrot.lane.b32.xlu2 %v1780_v54, %s4057_s12  ;;  %v2004_v38 = vpack.c.bf16 %v1972_v48, %v1972_v48  ;;  %v5531_v5 = vpop.f32.mrf.mxu1  ;;  %v5557_v54 = vstv %s2969_s14 }
 0x28f   : >> { %v1641_v43 = vpop.permute.xlu0 %1640  ;;  %1249 = vst.msk [vmem:[#allocation3 + $0x70] sm:$0xf] %vm1234_vm6, %v1167_v60  ;;  %3993 = vmatpush.bf16.msra.mxu3 %v5319_v26  ;;  %v5560_v60 = vpack.c.bf16 %v1960_v35, %v1960_v35 }
 0x290   : >> { %1711 = vst.msk [vmem:[#allocation3 + $0xd0] sm:$0xf] %vm1684_vm8, %v1641_v43  ;;  %v2565_v42 = vpop.f32.mrf.mxu0  ;;  %v5519_v44 = vpop.permute.xlu2 %2066 }
 0x291   : >> { %1936 = vst.msk [vmem:[#allocation3 + $0xd0] sm:$0xf] %vm1909_vm9, %v5458_v40  ;;  %v2566_v26 = vadd.f32 %v6089_v0, %v2565_v42  ;;  %v6091_v42 = vld [vmem:[#allocation8_spill] sm:$0xff] }
 0x292   : >> { %1474 = vst.msk [vmem:[#allocation3 + $0x70] sm:$0xf] %vm1459_vm7, %v1392_v8  ;;  %v2905_v52 = vmul.u32 2654435769, %v6091_v42 }
 0x293   : >> { %v2655_v58 = vadd.f32 %v2654_v11, %v2566_v26 }
 0x294   : >> { %1176 = vrot.lane.b32.xlu1 %v5448_v41, %s4054_s9 }
 0x295   : >> { %1650 = vrot.lane.b32.xlu0 %v5466_v33, %s4056_s11  ;;  %v2725_v33 = vmax.f32 %v2655_v58, 0.0 }
 0x296   : >> { %v2093_v31 = vpop.permute.xlu1 %2092  ;;  %2098 = vrot.lane.b32.xlu2 %v2004_v38, %s4058_s13  ;;  %v2661_v1 = vpop.f32.mrf.mxu1  ;;  %v1320_v38 = vpack.c.bf16 %v1288_v17, %v1288_v17 }
 0x297   : >> { %v1868_v40 = vpop.permute.xlu0 %1867 }
 0x298   : >> { %1937 = vst.msk [vmem:[#allocation3 + $0xd8] sm:$0xf] %vm1909_vm9, %v1868_v40  ;;  %v2567_v32 = vpop.f32.mrf.mxu0  ;;  %v972_v49 = vpop.permute.xlu2 %971 }
 0x299   : >> { %2162 = vst.msk [vmem:[#allocation3 + $0xd8] sm:$0xf] %vm2134_vm10, %v2093_v31  ;;  %v2568_v41 = vadd.f32 %v6089_v0, %v2567_v32  ;;  %v1736_v31 = vld [vmem:[#allocation2 + $0x110] sm:$0xff] }
 0x29a   : >> { %1039 = vst.msk [vmem:[#allocation3 + $0xe8] sm:$0xf] %vm1009_vm5, %v972_v49 }
 0x29b   : >> { %v2657_v36 = vadd.f32 %v2656_v62, %v2568_v41  ;;  %v1768_v41 = vpack.c.bf16 %v1736_v31, %v1736_v31 }
 0x29c   : >> { %1399 = vrot.lane.b32.xlu1 %v5479_v14, %s4055_s10  ;;  %v2005_v14 = vpack.c.bf16 %v1973_v50, %v1973_v50 }
 0x29d   : >> { %v2726_v56 = vmax.f32 %v2657_v36, 0.0  ;;  %1174 = vrot.lane.b32.xlu0 %v5441_v63, %s4054_s9  ;;  %v5549_v63 = vstv %s4100_s0 }
 0x29e   : >> { %v1617_v8 = vpop.permute.xlu1 %1616  ;;  %1401 = vrot.lane.b32.xlu2 %v5456_v59, %s4055_s10  ;;  %v1094_v59 = vpack.c.bf16 %v1062_v46, %v1062_v46  ;;  %v2937_v29 = vadd.s32 %v5549_v63, %v2904_v30  ;;  %v5569_v48 = vpop.f32.mrf.mxu1  ;;  %v2938_v40 = vadd.s32 %v5549_v63, %v2905_v52 }
 0x29f   : >> { %v2091_v39 = vpop.permute.xlu0 %2090  ;;  %1699 = vst.msk [vmem:[#allocation3 + $0x70] sm:$0xf] %vm1684_vm8, %v1617_v8  ;;  %v2754_v2 = vpack.c.bf16 %v2726_v56, %v2725_v33 }
 0x2a0   : >> { %2161 = vst.msk [vmem:[#allocation3 + $0xd0] sm:$0xf] %vm2134_vm10, %v2091_v39  ;;  %v5545_v11 = vpop.permute.xlu2 %1419  ;;  %v3972_v23 = vld [vmem:[#allocation3 + $0xd4] sm:$0xf0]  ;;  %v2971_v34 = vadd.s32 %v5557_v54, %v2937_v29  ;;  %v2972_v36 = vadd.s32 %v5557_v54, %v2938_v40 }
 0x2a1   : >> { %2838 = vmatmul.bf16.gmra.mxu2 %v2754_v2 }
 0x2a2   : >> { %v3004_v39 = vshrl.u32 %v2972_v36, 16 }
 0x2a4   : >> { %1626 = vrot.lane.b32.xlu1 %v5224_v47, %s4056_s11 }
 0x2a5   : >> { %2100 = vrot.lane.b32.xlu0 %v2005_v14, %s4058_s13 }
 0x2a6   : >> { %v1844_v53 = vpop.permute.xlu1 %1843  ;;  %1849 = vrot.lane.b32.xlu2 %v1094_v59, %s4057_s12  ;;  %v5586_v56 = vpop.f32.mrf.mxu1 }
 0x2a7   : >> { %v1394_v55 = vpop.permute.xlu0 %1393  ;;  %v3786_v57 = vld [vmem:[#allocation3 + $0xd0] sm:$0xf] }
 0x2a8   : >> { %1475 = vst.msk [vmem:[#allocation3 + $0x78] sm:$0xf] %vm1459_vm7, %v1394_v55  ;;  %v3787_v62 = vor.u32 %v3972_v23, %v3786_v57  ;;  %v5562_v43 = vpop.permute.xlu2 %1646  ;;  %v3036_v23 = vxor.u32 %v3004_v39, %v2972_v36  ;;  %v1737_v55 = vld [vmem:[#allocation2 + $0x120] sm:$0xff]  ;;  %v6093_v39 = vld [vmem:[#allocation10_spill] sm:$0xff] }
 0x2a9   : >> { %1700 = vst.msk [vmem:[#allocation3 + $0x78] sm:$0xf] %vm1684_vm8, %v5506_v20  ;;  %v3003_v20 = vshrl.u32 %v2971_v34, 16  ;;  %v1769_v52 = vpack.c.bf16 %v1737_v55, %v1737_v55 }
 0x2aa   : >> { %1925 = vst.msk [vmem:[#allocation3 + $0x78] sm:$0xf] %vm1909_vm9, %v1844_v53  ;;  %2614 = vmatmul.bf16.gmra.mxu3 %v3787_v62  ;;  %v3068_v17 = vmul.u32 2146121005, %v3036_v23 }
 0x2ac   : >> { %2074 = vrot.lane.b32.xlu1 %v5560_v60, %s4058_s13 }
 0x2ad   : >> { %1624 = vrot.lane.b32.xlu0 %v5215_v51, %s4056_s11  ;;  %v3035_v51 = vxor.u32 %v3003_v20, %v2971_v34  ;;  %v3100_v20 = vshrl.u32 %v3068_v17, 15 }
 0x2ae   : >> { %v970_v26 = vpop.permute.xlu1 %969  ;;  %2076 = vrot.lane.b32.xlu2 %v1320_v38, %s4058_s13  ;;  %v5600_v31 = vpop.f32.mrf.mxu1 }
 0x2af   : >> { %v1842_v32 = vpop.permute.xlu0 %1841  ;;  %v2570_v49 = vpop.f32.mrf.mxu0  ;;  %1038 = vst.msk [vmem:[#allocation3 + $0xe0] sm:$0xf] %vm1009_vm5, %v970_v26  ;;  %v3067_v50 = vmul.u32 2146121005, %v3035_v51 }
 0x2b0   : >> { %1924 = vst.msk [vmem:[#allocation3 + $0x70] sm:$0xf] %vm1909_vm9, %v1842_v32  ;;  %v1171_v58 = vpop.permute.xlu2 %1170  ;;  %v2571_v33 = vadd.f32 %v6089_v0, %v2570_v49  ;;  %v1963_v32 = vld [vmem:[#allocation2 + $0x129] sm:$0xff] }
 0x2b1   : >> { %2149 = vst.msk [vmem:[#allocation3 + $0x70] sm:$0xf] %vm2134_vm10, %v5519_v44  ;;  %v5612_v36 = vpack.c.bf16 %v1963_v32, %v1963_v32 }
 0x2b2   : >> { %1251 = vst.msk [vmem:[#allocation3 + $0x80] sm:$0xf] %vm1234_vm6, %v1171_v58  ;;  %v2660_v14 = vadd.f32 %v5531_v5, %v2571_v33 }
 0x2b4   : >> { %1178 = vrot.lane.b32.xlu1 %v1094_v59, %s4054_s9  ;;  %v3099_v59 = vshrl.u32 %v3067_v50, 15  ;;  %v2727_v35 = vmax.f32 %v2660_v14, 0.0 }
 0x2b5   : >> { %1851 = vrot.lane.b32.xlu0 %v1768_v41, %s4057_s12 }
 0x2b6   : >> { %v1197_v8 = vpop.permute.xlu1 %1196  ;;  %1180 = vrot.lane.b32.xlu2 %v1768_v41, %s4054_s9  ;;  %v3131_v5 = vxor.u32 %v3099_v59, %v3067_v50  ;;  %v3132_v41 = vxor.u32 %v3100_v20, %v3068_v17  ;;  %v1738_v50 = vld [vmem:[#allocation2 + $0x128] sm:$0xff] }
 0x2b7   : >> { %v2069_v44 = vpop.permute.xlu0 %2068  ;;  %v2572_v2 = vpop.f32.mrf.mxu0  ;;  %1264 = vst.msk [vmem:[#allocation3 + $0xe8] sm:$0xf] %vm1234_vm6, %v1197_v8  ;;  %v5621_v14 = vpack.c.bf16 %v1738_v50, %v1738_v50 }
 0x2b8   : >> { %2150 = vst.msk [vmem:[#allocation3 + $0x78] sm:$0xf] %vm2134_vm10, %v2069_v44  ;;  %v2573_v46 = vadd.f32 %v6089_v0, %v2572_v2  ;;  %v2097_v45 = vpop.permute.xlu2 %2096  ;;  %v3738_v29 = vld [vmem:[#allocation3 + $0x70] sm:$0xf]  ;;  %v3164_v2 = vmul.u32 2221713035, %v3132_v41 }
 0x2ba   : >> { %v2662_v30 = vadd.f32 %v2661_v1, %v2573_v46  ;;  %v5623_v46 = vpop.f32.mrf.mxu1 }
 0x2bc   : >> { %v2728_v53 = vmax.f32 %v2662_v30, 0.0  ;;  %1405 = vrot.lane.b32.xlu1 %v1320_v38, %s4055_s10  ;;  %v6092_v38 = vld [vmem:[#allocation9_spill] sm:$0xff] }
 0x2bd   : >> { %955 = vrot.lane.b32.xlu0 %v5224_v47, %s4053_s8  ;;  %v2906_v26 = vmul.u32 2654435769, %v6092_v38 }
 0x2be   : >> { %v1645_v57 = vpop.permute.xlu1 %1644  ;;  %v2755_v62 = vpack.c.bf16 %v2728_v53, %v2727_v35  ;;  %1628 = vrot.lane.b32.xlu2 %v5270_v37, %s4056_s11  ;;  %v3163_v37 = vmul.u32 2221713035, %v3131_v5  ;;  %v1962_v53 = vld [vmem:[#allocation2 + $0x121] sm:$0xff] }
 0x2bf   : >> { %v1195_v34 = vpop.permute.xlu0 %1194  ;;  %v3960_v1 = vld [vmem:[#allocation3 + $0x74] sm:$0xf0]  ;;  %v2939_v40 = vadd.s32 %v5549_v63, %v2906_v26  ;;  %v5638_v17 = vpack.c.bf16 %v1962_v53, %v1962_v53 }
 0x2c0   : >> { %1263 = vst.msk [vmem:[#allocation3 + $0xe0] sm:$0xf] %vm1234_vm6, %v1195_v34  ;;  %2843 = vmatmul.bf16.gmra.mxu2 %v2755_v62  ;;  %v3739_v42 = vor.u32 %v3960_v1, %v3738_v29  ;;  %v5604_v47 = vpop.permute.xlu2 %1620  ;;  %v3195_v58 = vshrl.u32 %v3163_v37, 16  ;;  %v3196_v29 = vshrl.u32 %v3164_v2, 16  ;;  %v3452_v53 = vld [vmem:[#allocation2 + $0x21] sm:$0xff] }
 0x2c1   : >> { %1488 = vst.msk [vmem:[#allocation3 + $0xe0] sm:$0xf] %vm1459_vm7, %v5545_v11  ;;  %v2973_v33 = vadd.s32 %v5557_v54, %v2939_v40 }
 0x2c2   : >> { %1713 = vst.msk [vmem:[#allocation3 + $0xe0] sm:$0xf] %vm1684_vm8, %v1645_v57  ;;  %2584 = vmatmul.bf16.gmra.mxu0 %v3739_v42  ;;  %v3227_v44 = vxor.u32 %v3195_v58, %v3163_v37  ;;  %v3228_v26 = vxor.u32 %v3196_v29, %v3164_v2  ;;  %v3451_v37 = vld [vmem:[#allocation2 + $0x19] sm:$0xff]  ;;  %v5648_v41 = vpop.f32.mrf.mxu1 }
 0x2c4   : >> { %1853 = vrot.lane.b32.xlu1 %v1769_v52, %s4057_s12  ;;  %v3892_v35 = vxor.u32 2147483648, %v3227_v44 }
 0x2c5   : >> { %1403 = vrot.lane.b32.xlu0 %v5560_v60, %s4055_s10  ;;  %v2907_v60 = vmul.u32 2654435769, %v6093_v39  ;;  %v3893_v39 = vxor.u32 2147483648, %v3228_v26 }
 0x2c6   : >> { %v1872_v49 = vpop.permute.xlu1 %1871  ;;  %1855 = vrot.lane.b32.xlu2 %v5621_v14, %s4057_s12  ;;  %vm5642_vm11 = vcmp.gt.s32.totalorder %v3892_v35, 0 }
 0x2c7   : >> { %v1422_v51 = vpop.permute.xlu0 %1421  ;;  %v2575_v11 = vpop.f32.mrf.mxu0  ;;  %v2940_v59 = vadd.s32 %v5549_v63, %v2907_v60  ;;  %vm3264_vm12 = vcmp.gt.s32.totalorder %v3893_v39, 0 }
 0x2c8   : >> { %1489 = vst.msk [vmem:[#allocation3 + $0xe8] sm:$0xf] %vm1459_vm7, %v1422_v51  ;;  %v5617_v8 = vpop.permute.xlu2 %1847  ;;  %v2576_v30 = vadd.f32 %v6089_v0, %v2575_v11 }
 0x2c9   : >> { %1714 = vst.msk [vmem:[#allocation3 + $0xe8] sm:$0xf] %vm1684_vm8, %v5562_v43  ;;  %v3005_v43 = vshrl.u32 %v2973_v33, 16  ;;  %v2974_v1 = vadd.s32 %v5557_v54, %v2940_v59 }
 0x2ca   : >> { %1939 = vst.msk [vmem:[#allocation3 + $0xe8] sm:$0xf] %vm1909_vm9, %v1872_v49  ;;  %v2665_v57 = vadd.f32 %v5569_v48, %v2576_v30  ;;  %v839_v48 = vld [vmem:[#allocation2 + $0x10a] sm:$0xff] }
 0x2cb   : >> { %2164 = vst.msk [vmem:[#allocation3 + $0xe8] sm:$0xf] %vm2134_vm10, %v2097_v45  ;;  %v3037_v5 = vxor.u32 %v3005_v43, %v2973_v33  ;;  %v871_v20 = vpack.c.bf16 %v839_v48, %v839_v48  ;;  %v3006_v51 = vshrl.u32 %v2974_v1, 16 }
 0x2cc   : >> { %2080 = vrot.lane.b32.xlu1 %v5612_v36, %s4058_s13  ;;  %v2729_v40 = vmax.f32 %v2665_v57, 0.0  ;;  %v1739_v57 = vld [vmem:[#allocation2 + $0x138] sm:$0xff] }
 0x2cd   : >> { %1630 = vrot.lane.b32.xlu0 %v5279_v61, %s4056_s11  ;;  %v3069_v58 = vmul.u32 2146121005, %v3037_v5  ;;  %v3038_v59 = vxor.u32 %v3006_v51, %v2974_v1 }
 0x2ce   : >> { %v2095_v23 = vpop.permute.xlu1 %2094  ;;  %957 = vrot.lane.b32.xlu2 %v871_v20, %s4053_s8  ;;  %v6097_v20 = vld [vmem:[#allocation12_spill] sm:$0xff] }
 0x2cf   : >> { %v1870_v55 = vpop.permute.xlu0 %1869  ;;  %v2577_v45 = vpop.f32.mrf.mxu0  ;;  %v3101_v2 = vshrl.u32 %v3069_v58, 15 }
 0x2d0   : >> { %1938 = vst.msk [vmem:[#allocation3 + $0xe0] sm:$0xf] %vm1909_vm9, %v1870_v55  ;;  %v2578_v62 = vadd.f32 %v6089_v0, %v2577_v45  ;;  %v974_v34 = vpop.permute.xlu2 %973 }
 0x2d1   : >> { %2163 = vst.msk [vmem:[#allocation3 + $0xe0] sm:$0xf] %vm2134_vm10, %v2095_v23  ;;  %v6096_v23 = vld [vmem:[#allocation11_spill] sm:$0xff]  ;;  %v3133_v55 = vxor.u32 %v3101_v2, %v3069_v58 }
 0x2d2   : >> { %v2667_v42 = vadd.f32 %v5586_v56, %v2578_v62  ;;  %1040 = vst.msk [vmem:[#allocation3 + $0xf0] sm:$0xf] %vm1009_vm5, %v974_v34  ;;  %v3974_v50 = vld [vmem:[#allocation3 + $0xe4] sm:$0xf0]  ;;  %v2908_v35 = vmul.u32 2654435769, %v6096_v23 }
 0x2d3   : >> { %v3070_v62 = vmul.u32 2146121005, %v3038_v59  ;;  %v3165_v26 = vmul.u32 2221713035, %v3133_v55  ;;  %v1740_v23 = vld [vmem:[#allocation2 + $0x140] sm:$0xff] }
 0x2d4   : >> { %v2730_v32 = vmax.f32 %v2667_v42, 0.0  ;;  %v2824_v49 = vpop.f32.mrf.mxu2  ;;  %1182 = vrot.lane.b32.xlu1 %v1769_v52, %s4054_s9  ;;  %v2941_v5 = vadd.s32 %v5549_v63, %v2908_v35  ;;  %v5668_v42 = vpop.f32.mrf.mxu1  ;;  %v1772_v35 = vpack.c.bf16 %v1740_v23, %v1740_v23  ;;  %v6099_v23 = vld [vmem:[#allocation14_spill] sm:$0xff] }
 0x2d5   : >> { %v3419_v56 = vsel %vm5642_vm11, %v2824_v49, 0.0  ;;  %2078 = vrot.lane.b32.xlu0 %v5638_v17, %s4058_s13  ;;  %v3102_v48 = vshrl.u32 %v3070_v62, 15  ;;  %v1515_v49 = vld [vmem:[#allocation2 + $0x12a] sm:$0xff]  ;;  %v3197_v58 = vshrl.u32 %v3165_v26, 16 }
 0x2d6   : >> { %v3483_v11 = vadd.f32 %v3451_v37, %v3419_v56  ;;  %v2756_v33 = vpack.c.bf16 %v2730_v32, %v2729_v40  ;;  %v1398_v60 = vpop.permute.xlu1 %1397  ;;  %1184 = vrot.lane.b32.xlu2 %v5621_v14, %s4054_s9  ;;  %v2975_v37 = vadd.s32 %v5557_v54, %v2941_v5  ;;  %v2909_v14 = vmul.u32 2654435769, %v6097_v20  ;;  %v1514_v40 = vld [vmem:[#allocation2 + $0x122] sm:$0xff] }
 0x2d7   : >> { %v1173_v44 = vpop.permute.xlu0 %1172  ;;  %v1546_v32 = vpack.c.bf16 %v1514_v40, %v1514_v40  ;;  %v1965_v56 = vld [vmem:[#allocation2 + $0x141] sm:$0xff]  ;;  %v3134_v51 = vxor.u32 %v3102_v48, %v3070_v62  ;;  %v1547_v39 = vpack.c.bf16 %v1515_v49, %v1515_v49 }
 0x2d8   : >> { %3515 = vst.msk [vmem:[#allocation2 + $0x19] sm:$0xff] %vm209_vm0, %v3483_v11  ;;  %2848 = vmatmul.bf16.gmra.mxu2 %v2756_v33  ;;  %v3794_v52 = vld [vmem:[#allocation3 + $0xe0] sm:$0xf]  ;;  %v5657_v43 = vpop.permute.xlu2 %1200  ;;  %v3007_v11 = vshrl.u32 %v2975_v37, 16  ;;  %v2942_v33 = vadd.s32 %v5549_v63, %v2909_v14  ;;  %v6098_v48 = vld [vmem:[#allocation13_spill] sm:$0xff] }
 0x2d9   : >> { %1252 = vst.msk [vmem:[#allocation3 + $0x88] sm:$0xf] %vm1234_vm6, %v1173_v44  ;;  %v3795_v30 = vor.u32 %v3974_v50, %v3794_v52  ;;  %v3166_v52 = vmul.u32 2221713035, %v3134_v51 }
 0x2da   : >> { %1477 = vst.msk [vmem:[#allocation3 + $0x88] sm:$0xf] %vm1459_vm7, %v1398_v60  ;;  %v1997_v60 = vpack.c.bf16 %v1965_v56, %v1965_v56  ;;  %v2976_v59 = vadd.s32 %v5557_v54, %v2942_v33 }
 0x2db   : >> { %2619 = vmatmul.bf16.gmra.mxu3 %v3795_v30  ;;  %v3039_v30 = vxor.u32 %v3007_v11, %v2975_v37  ;;  %v3198_v55 = vshrl.u32 %v3166_v52, 16  ;;  %v2910_v37 = vmul.u32 2654435769, %v6098_v48 }
 0x2dc   : >> { %v2826_v29 = vpop.f32.mrf.mxu2  ;;  %1409 = vrot.lane.b32.xlu1 %v5612_v36, %s4055_s10  ;;  %v1771_v36 = vpack.c.bf16 %v1739_v57, %v1739_v57  ;;  %v5685_v44 = vpop.f32.mrf.mxu1 }
 0x2dd   : >> { %v3420_v45 = vsel %vm3264_vm12, %v2826_v29, 0.0  ;;  %959 = vrot.lane.b32.xlu0 %v5279_v61, %s4053_s8  ;;  %v5695_v29 = vld [vmem:[#allocation2 + $0x139] sm:$0xff]  ;;  %v2943_v33 = vadd.s32 %v5549_v63, %v2910_v37 }
 0x2de   : >> { %v3484_v34 = vadd.f32 %v3452_v53, %v3420_v45  ;;  %v1846_v1 = vpop.permute.xlu1 %1845  ;;  %1632 = vrot.lane.b32.xlu2 %v1546_v32, %s4056_s11  ;;  %v3008_v45 = vshrl.u32 %v2976_v59, 16  ;;  %v1996_v5 = vpack.c.bf16 %v5695_v29, %v5695_v29 }
 0x2df   : >> { %v1396_v38 = vpop.permute.xlu0 %1395 }
 0x2e0   : >> { %3516 = vst.msk [vmem:[#allocation2 + $0x21] sm:$0xff] %vm209_vm0, %v3484_v34  ;;  %v5672_v61 = vpop.permute.xlu2 %1648  ;;  %v3230_v34 = vxor.u32 %v3198_v55, %v3166_v52  ;;  %v3454_v52 = vld [vmem:[#allocation2 + $0x39] sm:$0xff] }
 0x2e1   : >> { %1476 = vst.msk [vmem:[#allocation3 + $0x80] sm:$0xf] %vm1459_vm7, %v1396_v38 }
 0x2e2   : >> { %1701 = vst.msk [vmem:[#allocation3 + $0x80] sm:$0xf] %vm1684_vm8, %v5604_v47 }
 0x2e3   : >> { %1926 = vst.msk [vmem:[#allocation3 + $0x80] sm:$0xf] %vm1909_vm9, %v1846_v1 }
 0x2e4   : >> { %1857 = vrot.lane.b32.xlu1 %v1771_v36, %s4057_s12  ;;  %v3040_v36 = vxor.u32 %v3008_v45, %v2976_v59  ;;  %v5703_v20 = vpop.f32.mrf.mxu1  ;;  %v2977_v59 = vadd.s32 %v5557_v54, %v2943_v33 }
 0x2e5   : >> { %1407 = vrot.lane.b32.xlu0 %v5638_v17, %s4055_s10  ;;  %v3229_v17 = vxor.u32 %v3197_v58, %v3165_v26  ;;  %v3453_v26 = vld [vmem:[#allocation2 + $0x31] sm:$0xff]  ;;  %v3895_v58 = vxor.u32 2147483648, %v3230_v34 }
 0x2e6   : >> { %v2073_v50 = vpop.permute.xlu1 %2072  ;;  %1859 = vrot.lane.b32.xlu2 %v1772_v35, %s4057_s12  ;;  %v3072_v51 = vmul.u32 2146121005, %v3040_v36  ;;  %v2911_v35 = vmul.u32 2654435769, %v6099_v23 }
 0x2e7   : >> { %v1623_v47 = vpop.permute.xlu0 %1622  ;;  %v3894_v53 = vxor.u32 2147483648, %v3229_v17  ;;  %vm3270_vm14 = vcmp.gt.s32.totalorder %v3895_v58, 0 }
 0x2e8   : >> { %1702 = vst.msk [vmem:[#allocation3 + $0x88] sm:$0xf] %vm1684_vm8, %v1623_v47  ;;  %v5689_v2 = vpop.permute.xlu2 %1875  ;;  %v3104_v17 = vshrl.u32 %v3072_v51, 15  ;;  %v2944_v34 = vadd.s32 %v5549_v63, %v2911_v35 }
 0x2e9   : >> { %1927 = vst.msk [vmem:[#allocation3 + $0x88] sm:$0xf] %vm1909_vm9, %v5617_v8  ;;  %v3071_v8 = vmul.u32 2146121005, %v3039_v30  ;;  %vm3267_vm13 = vcmp.gt.s32.totalorder %v3894_v53, 0 }
 0x2ea   : >> { %2152 = vst.msk [vmem:[#allocation3 + $0x88] sm:$0xf] %vm2134_vm10, %v2073_v50 }
 0x2eb   : >> { %v3103_v1 = vshrl.u32 %v3071_v8, 15 }
 0x2ec   : >> { %2084 = vrot.lane.b32.xlu1 %v1997_v60, %s4058_s13 }
 0x2ed   : >> { %1634 = vrot.lane.b32.xlu0 %v1547_v39, %s4056_s11  ;;  %v3135_v56 = vxor.u32 %v3103_v1, %v3071_v8  ;;  %v5714_v8 = vpop.f32.mrf.mxu1 }
 0x2ee   : >> { %v1199_v57 = vpop.permute.xlu1 %1198 }
 0x2ef   : >> { %v2071_v62 = vpop.permute.xlu0 %2070  ;;  %1265 = vst.msk [vmem:[#allocation3 + $0xf0] sm:$0xf] %vm1234_vm6, %v1199_v57  ;;  %v3167_v60 = vmul.u32 2221713035, %v3135_v56 }
 0x2f0   : >> { %2151 = vst.msk [vmem:[#allocation3 + $0x80] sm:$0xf] %vm2134_vm10, %v2071_v62  ;;  %v2099_v38 = vpop.permute.xlu2 %2098  ;;  %v3136_v62 = vxor.u32 %v3104_v17, %v3072_v51 }
 0x2f1   : >> { %v3962_v49 = vld [vmem:[#allocation3 + $0x84] sm:$0xf0]  ;;  %v3199_v57 = vshrl.u32 %v3167_v60, 16 }
 0x2f2   : >> { %v3168_v48 = vmul.u32 2221713035, %v3136_v62 }
 0x2f3   : >> { %v2829_v14 = vpop.f32.mrf.mxu2 }
 0x2f4   : >> { %v3421_v40 = vsel %vm3267_vm13, %v2829_v14, 0.0  ;;  %v2978_v14 = vadd.s32 %v5557_v54, %v2944_v34  ;;  %v3200_v58 = vshrl.u32 %v3168_v48, 16 }
 0x2f5   : >> { %v3485_v32 = vadd.f32 %v3453_v26, %v3421_v40  ;;  %2082 = vrot.lane.b32.xlu0 %v1996_v5, %s4058_s13  ;;  %v3009_v5 = vshrl.u32 %v2977_v59, 16  ;;  %v3231_v26 = vxor.u32 %v3199_v57, %v3167_v60  ;;  %v5727_v33 = vpop.f32.mrf.mxu1  ;;  %v3455_v60 = vld [vmem:[#allocation2 + $0x49] sm:$0xff] }
 0x2f6   : >> { %v1426_v11 = vpop.permute.xlu1 %1425 }
 0x2f7   : >> { %3517 = vst.msk [vmem:[#allocation2 + $0x31] sm:$0xff] %vm209_vm0, %v3485_v32  ;;  %v976_v50 = vpop.permute.xlu0 %975  ;;  %v3746_v47 = vld [vmem:[#allocation3 + $0x80] sm:$0xf]  ;;  %v3041_v37 = vxor.u32 %v3009_v5, %v2977_v59 }
 0x2f8   : >> { %1041 = vst.msk [vmem:[#allocation3 + $0xf8] sm:$0xf] %vm1009_vm5, %v976_v50  ;;  %v3747_v39 = vor.u32 %v3962_v49, %v3746_v47  ;;  %v1402_v30 = vpop.permute.xlu2 %1401  ;;  %v3896_v49 = vxor.u32 2147483648, %v3231_v26 }
 0x2f9   : >> { %1266 = vst.msk [vmem:[#allocation3 + $0xf8] sm:$0xf] %vm1234_vm6, %v5657_v43  ;;  %v3073_v51 = vmul.u32 2146121005, %v3041_v37 }
 0x2fa   : >> { %2589 = vmatmul.bf16.gmra.mxu0 %v3747_v39  ;;  %1491 = vst.msk [vmem:[#allocation3 + $0xf8] sm:$0xf] %vm1459_vm7, %v1426_v11  ;;  %v3010_v11 = vshrl.u32 %v2978_v14, 16  ;;  %vm3273_vm15 = vcmp.gt.s32.totalorder %v3896_v49, 0  ;;  %v3232_v39 = vxor.u32 %v3200_v58, %v3168_v48 }
 0x2fb   : >> { %v2831_v53 = vpop.f32.mrf.mxu2  ;;  %v3105_v17 = vshrl.u32 %v3073_v51, 15 }
 0x2fc   : >> { %v3422_v55 = vsel %vm3270_vm14, %v2831_v53, 0.0 }
 0x2fd   : >> { %v3486_v45 = vadd.f32 %v3454_v52, %v3422_v55  ;;  %v3042_v52 = vxor.u32 %v3010_v11, %v2978_v14  ;;  %v3137_v62 = vxor.u32 %v3105_v17, %v3073_v51  ;;  %v6101_v17 = vld [vmem:[#allocation16_spill] sm:$0xff] }
 0x2fe   : >> { %v1874_v43 = vpop.permute.xlu1 %1873 }
 0x2ff   : >> { %3518 = vst.msk [vmem:[#allocation2 + $0x39] sm:$0xff] %vm209_vm0, %v3486_v45  ;;  %v1424_v1 = vpop.permute.xlu0 %1423  ;;  %v3169_v26 = vmul.u32 2221713035, %v3137_v62 }
 0x300   : >> { %1490 = vst.msk [vmem:[#allocation3 + $0xf0] sm:$0xf] %vm1459_vm7, %v1424_v1  ;;  %v2580_v36 = vpop.f32.mrf.mxu0  ;;  %v5724_v40 = vpop.permute.xlu2 %1849 }
 0x301   : >> { %1715 = vst.msk [vmem:[#allocation3 + $0xf0] sm:$0xf] %vm1684_vm8, %v5672_v61  ;;  %v2581_v32 = vadd.f32 %v6089_v0, %v2580_v36  ;;  %v3456_v36 = vld [vmem:[#allocation2 + $0x51] sm:$0xff] }
 0x302   : >> { %1940 = vst.msk [vmem:[#allocation3 + $0xf0] sm:$0xf] %vm1909_vm9, %v1874_v43  ;;  %v3074_v43 = vmul.u32 2146121005, %v3042_v52  ;;  %v2913_v52 = vmul.u32 2654435769, %v6101_v17 }
 0x303   : >> { %2165 = vst.msk [vmem:[#allocation3 + $0xf0] sm:$0xf] %vm2134_vm10, %v2099_v38  ;;  %v2670_v47 = vadd.f32 %v5600_v31, %v2581_v32  ;;  %v3897_v31 = vxor.u32 2147483648, %v3232_v39  ;;  %v3458_v17 = vld [vmem:[#allocation2 + $0x69] sm:$0xff] }
 0x304   : >> { %v3106_v48 = vshrl.u32 %v3074_v43, 15 }
 0x305   : >> { %v2731_v53 = vmax.f32 %v2670_v47, 0.0  ;;  %vm3276_vm2 = vcmp.gt.s32.totalorder %v3897_v31, 0 }
 0x306   : >> { %v1177_v56 = vpop.permute.xlu1 %1176  ;;  %v3138_v51 = vxor.u32 %v3106_v48, %v3074_v43  ;;  %v3457_v48 = vld [vmem:[#allocation2 + $0x61] sm:$0xff] }
 0x307   : >> { %v1651_v61 = vpop.permute.xlu0 %1650  ;;  %1254 = vst.msk [vmem:[#allocation3 + $0x98] sm:$0xf] %vm1234_vm6, %v1177_v56  ;;  %v3201_v56 = vshrl.u32 %v3169_v26, 16 }
 0x308   : >> { %1716 = vst.msk [vmem:[#allocation3 + $0xf8] sm:$0xf] %vm1684_vm8, %v1651_v61  ;;  %v2582_v50 = vpop.f32.mrf.mxu0  ;;  %v2197_v61 = vld [vmem:[#allocation2 + $0x19a] sm:$0xff] }
 0x309   : >> { %1941 = vst.msk [vmem:[#allocation3 + $0xf8] sm:$0xf] %vm1909_vm9, %v5689_v2  ;;  %v2583_v38 = vadd.f32 %v6089_v0, %v2582_v50  ;;  %v5737_v2 = vpop.permute.xlu2 %2076  ;;  %v2198_v50 = vld [vmem:[#allocation2 + $0x1a2] sm:$0xff] }
 0x30a   : >> { %1479 = vst.msk [vmem:[#allocation3 + $0x98] sm:$0xf] %vm1459_vm7, %v1402_v30  ;;  %v6100_v30 = vld [vmem:[#allocation15_spill] sm:$0xff]  ;;  %v2230_v39 = vpack.c.bf16 %v2198_v50, %v2198_v50 }
 0x30b   : >> { %v2672_v59 = vadd.f32 %v5623_v46, %v2583_v38  ;;  %v2834_v23 = vpop.f32.mrf.mxu2  ;;  %v2912_v1 = vmul.u32 2654435769, %v6100_v30  ;;  %v5742_v46 = vpop.f32.mrf.mxu1  ;;  %v2229_v38 = vpack.c.bf16 %v2197_v61, %v2197_v61 }
 0x30c   : >> { %v3423_v35 = vsel %vm3273_vm15, %v2834_v23, 0.0  ;;  %v3170_v23 = vmul.u32 2221713035, %v3138_v51  ;;  %2262 = vst.msk [vmem:[#allocation3 + $0xfc] sm:$0xf] %vm559_vm3, %v2230_v39  ;;  %v6102_v39 = vld [vmem:[#allocation19_spill] sm:$0xff] }
 0x30d   : >> { %v2732_v55 = vmax.f32 %v2672_v59, 0.0  ;;  %v3487_v45 = vadd.f32 %v3455_v60, %v3423_v35  ;;  %v2945_v32 = vadd.s32 %v5549_v63, %v2912_v1  ;;  %v3233_v59 = vxor.u32 %v3201_v56, %v3169_v26  ;;  %2261 = vst.msk [vmem:[#allocation3 + $0xf4] sm:$0xf] %vm559_vm3, %v2229_v38 }
 0x30e   : >> { %v1400_v57 = vpop.permute.xlu1 %1399  ;;  %v3202_v62 = vshrl.u32 %v3170_v23, 16 }
 0x30f   : >> { %3519 = vst.msk [vmem:[#allocation2 + $0x49] sm:$0xff] %vm209_vm0, %v3487_v45  ;;  %v1175_v5 = vpop.permute.xlu0 %1174  ;;  %v2757_v34 = vpack.c.bf16 %v2732_v55, %v2731_v53  ;;  %v2979_v60 = vadd.s32 %v5557_v54, %v2945_v32  ;;  %v2946_v55 = vadd.s32 %v5549_v63, %v2913_v52  ;;  %v3802_v45 = vld [vmem:[#allocation3 + $0xf0] sm:$0xf]  ;;  %v3898_v31 = vxor.u32 2147483648, %v3233_v59  ;;  %v3973_v52 = vld [vmem:[#allocation3 + $0xe4] sm:$0xf] }
 0x310   : >> { %1253 = vst.msk [vmem:[#allocation3 + $0x90] sm:$0xf] %vm1234_vm6, %v1175_v5  ;;  %v3234_v26 = vxor.u32 %v3202_v62, %v3170_v23  ;;  %v3796_v59 = vld [vmem:[#allocation3 + $0xe8] sm:$0xf0] }
 0x311   : >> { %2853 = vmatmul.bf16.gmra.mxu2 %v2757_v34  ;;  %1478 = vst.msk [vmem:[#allocation3 + $0x90] sm:$0xf] %vm1459_vm7, %v1400_v57  ;;  %v5746_v11 = vpop.permute.xlu2 %1180  ;;  %v3011_v53 = vshrl.u32 %v2979_v60, 16  ;;  %vm3279_vm3 = vcmp.gt.s32.totalorder %v3898_v31, 0  ;;  %v3799_v62 = vor.u32 %v3973_v52, %v3796_v59 }
 0x312   : >> { %v3899_v51 = vxor.u32 2147483648, %v3234_v26 }
 0x313   : >> { %v2836_v37 = vpop.f32.mrf.mxu2  ;;  %v5754_v35 = vpop.f32.mrf.mxu1  ;;  %v3043_v1 = vxor.u32 %v3011_v53, %v2979_v60  ;;  %v2914_v60 = vmul.u32 2654435769, %v6102_v39 }
 0x314   : >> { %v3424_v14 = vsel %vm3276_vm2, %v2836_v37, 0.0  ;;  %vm3282_vm4 = vcmp.gt.s32.totalorder %v3899_v51, 0 }
 0x315   : >> { %v3488_v49 = vadd.f32 %v3456_v36, %v3424_v14  ;;  %v2980_v36 = vadd.s32 %v5557_v54, %v2946_v55  ;;  %v3075_v14 = vmul.u32 2146121005, %v3043_v1  ;;  %v2947_v31 = vadd.s32 %v5549_v63, %v2914_v60 }
 0x316   : >> { %v1627_v58 = vpop.permute.xlu1 %1626 }
 0x317   : >> { %3520 = vst.msk [vmem:[#allocation2 + $0x51] sm:$0xff] %vm209_vm0, %v3488_v49  ;;  %v2101_v47 = vpop.permute.xlu0 %2100  ;;  %v3012_v32 = vshrl.u32 %v2980_v36, 16 }
 0x318   : >> { %2166 = vst.msk [vmem:[#allocation3 + $0xf8] sm:$0xf] %vm2134_vm10, %v2101_v47 }
 0x319   : >> { %1704 = vst.msk [vmem:[#allocation3 + $0x98] sm:$0xf] %vm1684_vm8, %v1627_v58  ;;  %v5758_v43 = vpop.permute.xlu2 %1628  ;;  %v3044_v38 = vxor.u32 %v3012_v32, %v2980_v36 }
 0x31b   : >> { %v5765_v49 = vpop.f32.mrf.mxu1  ;;  %v3076_v55 = vmul.u32 2146121005, %v3044_v38 }
 0x31d   : >> { %v3108_v36 = vshrl.u32 %v3076_v55, 15 }
 0x31e   : >> { %v2075_v57 = vpop.permute.xlu1 %2074  ;;  %v3552_v3 = vld [vmem:[#allocation2 + $0x51] sm:$0xff] (%p403_p4) }
 0x31f   : >> { %v1625_v5 = vpop.permute.xlu0 %1624  ;;  %v3976_v34 = vld [vmem:[#allocation3 + $0xf4] sm:$0xf0]  ;;  %3584 = vst.msk [vmem:[%s4417_s28 + $0x28] sm:$0xff] (%p403_p4), %vm209_vm0, %v3552_v3 }
 0x320   : >> { %1703 = vst.msk [vmem:[#allocation3 + $0x90] sm:$0xf] %vm1684_vm8, %v1625_v5  ;;  %v3803_v30 = vor.u32 %v3976_v34, %v3802_v45 }
 0x321   : >> { %1928 = vst.msk [vmem:[#allocation3 + $0x90] sm:$0xf] %vm1909_vm9, %v5724_v40  ;;  %v5768_v47 = vpop.permute.xlu2 %1855  ;;  %v3107_v40 = vshrl.u32 %v3075_v14, 15 }
 0x322   : >> { %2624 = vmatmul.bf16.gmra.mxu3 %v3803_v30  ;;  %2153 = vst.msk [vmem:[#allocation3 + $0x90] sm:$0xf] %vm2134_vm10, %v2075_v57 }
 0x323   : >> { %v3139_v53 = vxor.u32 %v3107_v40, %v3075_v14  ;;  %v5776_v34 = vpop.f32.mrf.mxu1  ;;  %v6103_v14 = vld [vmem:[#allocation22_spill] sm:$0xff] }
 0x324   : >> { %v2839_v37 = vpop.f32.mrf.mxu2  ;;  %v2915_v32 = vmul.u32 2654435769, %v6103_v14 }
 0x325   : >> { %v3425_v58 = vsel %vm3279_vm3, %v2839_v37, 0.0  ;;  %v2981_v37 = vadd.s32 %v5557_v54, %v2947_v31 }
 0x326   : >> { %v3489_v56 = vadd.f32 %v3457_v48, %v3425_v58  ;;  %v1179_v61 = vpop.permute.xlu1 %1178  ;;  %v2948_v40 = vadd.s32 %v5549_v63, %v2915_v32 }
 0x327   : >> { %v1852_v50 = vpop.permute.xlu0 %1851  ;;  %1255 = vst.msk [vmem:[#allocation3 + $0xa0] sm:$0xf] %vm1234_vm6, %v1179_v61  ;;  %v3140_v61 = vxor.u32 %v3108_v36, %v3076_v55 }
 0x328   : >> { %3521 = vst.msk [vmem:[#allocation2 + $0x61] sm:$0xff] %vm209_vm0, %v3489_v56  ;;  %v2610_v56 = vpop.f32.mrf.mxu3  ;;  %v2982_v59 = vadd.s32 %v5557_v54, %v2948_v40 }
 0x329   : >> { %1929 = vst.msk [vmem:[#allocation3 + $0x98] sm:$0xf] %vm1909_vm9, %v1852_v50  ;;  %v3754_v1 = vld [vmem:[#allocation3 + $0x90] sm:$0xf]  ;;  %v958_v48 = vpop.permute.xlu2 %957  ;;  %v3013_v50 = vshrl.u32 %v2981_v37, 16 }
 0x32a   : >> { %2154 = vst.msk [vmem:[#allocation3 + $0x98] sm:$0xf] %vm2134_vm10, %v5737_v2  ;;  %v3171_v2 = vmul.u32 2221713035, %v3139_v53  ;;  %v3804_v53 = vld [vmem:[#allocation3 + $0xf8] sm:$0xf0] }
 0x32b   : >> { %1032 = vst.msk [vmem:[#allocation3 + $0xb0] sm:$0xf] %vm1009_vm5, %v958_v48  ;;  %v2699_v60 = vpop.f32.mrf.mxu1  ;;  %v3045_v52 = vxor.u32 %v3013_v50, %v2981_v37  ;;  %v3459_v48 = vld [vmem:[#allocation2 + $0x79] sm:$0xff] }
 0x32c   : >> { %v2841_v23 = vpop.f32.mrf.mxu2  ;;  %v3203_v51 = vshrl.u32 %v3171_v2, 16 }
 0x32d   : >> { %v3426_v45 = vsel %vm3282_vm4, %v2841_v23, 0.0  ;;  %v3975_v23 = vld [vmem:[#allocation3 + $0xf4] sm:$0xf]  ;;  %v3077_v31 = vmul.u32 2146121005, %v3045_v52 }
 0x32e   : >> { %v3490_v57 = vadd.f32 %v3458_v17, %v3426_v45  ;;  %v1406_v5 = vpop.permute.xlu1 %1405  ;;  %v3172_v17 = vmul.u32 2221713035, %v3140_v61 }
 0x32f   : >> { %v956_v30 = vpop.permute.xlu0 %955  ;;  %v3553_v4 = vld [vmem:[#allocation2 + $0x61] sm:$0xff] (%p403_p4) }
 0x330   : >> { %3522 = vst.msk [vmem:[#allocation2 + $0x69] sm:$0xff] %vm209_vm0, %v3490_v57  ;;  %v3204_v45 = vshrl.u32 %v3172_v17, 16  ;;  %v3014_v57 = vshrl.u32 %v2982_v59, 16 }
 0x331   : >> { %1031 = vst.msk [vmem:[#allocation3 + $0xa8] sm:$0xf] %vm1009_vm5, %v956_v30  ;;  %v3964_v26 = vld [vmem:[#allocation3 + $0x94] sm:$0xf0] }
 0x332   : >> { %3858 = vmatmul.msk.bf16.vlgmr.msrb.gmra.mxu3 %vm209_vm0, %v3799_v62  ;;  %v3755_v58 = vor.u32 %v3964_v26, %v3754_v1  ;;  %1256 = vst.msk [vmem:[#allocation3 + $0xa8] sm:$0xf] %vm1234_vm6, %v5746_v11  ;;  %v3235_v11 = vxor.u32 %v3203_v51, %v3171_v2  ;;  %v2612_v62 = vpop.f32.mrf.mxu3  ;;  %v3109_v2 = vshrl.u32 %v3077_v31, 15  ;;  %v3046_v26 = vxor.u32 %v3014_v57, %v2982_v59  ;;  %v3460_v57 = vld [vmem:[#allocation2 + $0x81] sm:$0xff] }
 0x333   : >> { %1481 = vst.msk [vmem:[#allocation3 + $0xa8] sm:$0xf] %vm1459_vm7, %v1406_v5  ;;  %v3807_v5 = vor.u32 %v3975_v23, %v3804_v53  ;;  %v2701_v37 = vpop.f32.mrf.mxu1  ;;  %v2613_v32 = vadd.f32 %v6089_v0, %v2612_v62  ;;  %v1185_v62 = vpop.permute.xlu2 %1184 }
 0x334   : >> { %2594 = vmatmul.bf16.gmra.mxu0 %v3755_v58  ;;  %v3900_v55 = vxor.u32 2147483648, %v3235_v11  ;;  %v3141_v40 = vxor.u32 %v3109_v2, %v3077_v31  ;;  %3585 = vst.msk [vmem:[%s4417_s28 + $0x30] sm:$0xff] (%p403_p4), %vm209_vm0, %v3553_v4 }
 0x335   : >> { %v2702_v59 = vadd.f32 %v2701_v37, %v2613_v32 }
 0x336   : >> { %v1854_v38 = vpop.permute.xlu1 %1853  ;;  %vm3285_vm11 = vcmp.gt.s32.totalorder %v3900_v55, 0  ;;  %v3173_v55 = vmul.u32 2221713035, %v3141_v40 }
 0x337   : >> { %v1404_v39 = vpop.permute.xlu0 %1403  ;;  %v3554_v6 = vld [vmem:[#allocation2 + $0x69] sm:$0xff] (%p403_p4) }
 0x338   : >> { %1480 = vst.msk [vmem:[#allocation3 + $0xa0] sm:$0xf] %vm1459_vm7, %v1404_v39 }
 0x339   : >> { %1705 = vst.msk [vmem:[#allocation3 + $0xa0] sm:$0xf] %vm1684_vm8, %v5758_v43  ;;  %v3236_v43 = vxor.u32 %v3204_v45, %v3172_v17 }
 0x33a   : >> { %1930 = vst.msk [vmem:[#allocation3 + $0xa0] sm:$0xf] %vm1909_vm9, %v1854_v38  ;;  %v3078_v38 = vmul.u32 2146121005, %v3046_v26  ;;  %v2615_v39 = vpop.f32.mrf.mxu3 }
 0x33b   : >> { %v3901_v50 = vxor.u32 2147483648, %v3236_v43  ;;  %3586 = vst.msk [vmem:[%s4417_s28 + $0x38] sm:$0xff] (%p403_p4), %vm209_vm0, %v3554_v6 }
 0x33c   : >> { %v3110_v45 = vshrl.u32 %v3078_v38, 15 }
 0x33d   : >> { %vm3288_vm12 = vcmp.gt.s32.totalorder %v3901_v50, 0 }
 0x33e   : >> { %v2081_v30 = vpop.permute.xlu1 %2080  ;;  %v3142_v37 = vxor.u32 %v3110_v45, %v3078_v38 }
 0x33f   : >> { %v1631_v1 = vpop.permute.xlu0 %1630  ;;  %v2585_v36 = vpop.f32.mrf.mxu0 }
 0x340   : >> { %1706 = vst.msk [vmem:[#allocation3 + $0xa8] sm:$0xf] %vm1684_vm8, %v1631_v1  ;;  %v2586_v58 = vadd.f32 %v6089_v0, %v2585_v36  ;;  %v2744_v1 = vmax.f32 %v2702_v59, 0.0 }
 0x341   : >> { %1931 = vst.msk [vmem:[#allocation3 + $0xa8] sm:$0xf] %vm1909_vm9, %v5768_v47  ;;  %v2611_v47 = vadd.f32 %v6089_v0, %v2610_v56 }
 0x342   : >> { %3859 = vmatmul.msk.bf16.gmra.mxu3 %vm209_vm0, %v3807_v5  ;;  %2156 = vst.msk [vmem:[#allocation3 + $0xa8] sm:$0xf] %vm2134_vm10, %v2081_v30  ;;  %v2675_v23 = vadd.f32 %v5648_v41, %v2586_v58  ;;  %v2704_v5 = vpop.f32.mrf.mxu1  ;;  %v2617_v50 = vpop.f32.mrf.mxu3 }
 0x343   : >> { %v2844_v14 = vpop.f32.mrf.mxu2  ;;  %v2700_v31 = vadd.f32 %v2699_v60, %v2611_v47  ;;  %v3174_v47 = vmul.u32 2221713035, %v3142_v37  ;;  %v2618_v38 = vadd.f32 %v6089_v0, %v2617_v50  ;;  %v6104_v37 = vld [vmem:[#allocation25_spill] sm:$0xff]  ;;  %v6105_v50 = vld [vmem:[#allocation28_spill] sm:$0xff] }
 0x344   : >> { %v3427_v51 = vsel %vm3285_vm11, %v2844_v14, 0.0  ;;  %v2733_v36 = vmax.f32 %v2675_v23, 0.0  ;;  %v2616_v23 = vadd.f32 %v6089_v0, %v2615_v39 }
 0x345   : >> { %v3491_v61 = vadd.f32 %v3459_v48, %v3427_v51  ;;  %v3205_v48 = vshrl.u32 %v3173_v55, 16  ;;  %v2743_v14 = vmax.f32 %v2700_v31, 0.0  ;;  %v3206_v59 = vshrl.u32 %v3174_v47, 16 }
 0x346   : >> { %v1183_v11 = vpop.permute.xlu1 %1182 }
 0x347   : >> { %3523 = vst.msk [vmem:[#allocation2 + $0x79] sm:$0xff] %vm209_vm0, %v3491_v61  ;;  %v2079_v17 = vpop.permute.xlu0 %2078  ;;  %v2587_v52 = vpop.f32.mrf.mxu0  ;;  %v3237_v40 = vxor.u32 %v3205_v48, %v3173_v55  ;;  %v3238_v55 = vxor.u32 %v3206_v59, %v3174_v47 }
 0x348   : >> { %2155 = vst.msk [vmem:[#allocation3 + $0xa0] sm:$0xf] %vm2134_vm10, %v2079_v17  ;;  %v2588_v53 = vadd.f32 %v6089_v0, %v2587_v52 }
 0x349   : >> { %1257 = vst.msk [vmem:[#allocation3 + $0xb0] sm:$0xf] %vm1234_vm6, %v1183_v11  ;;  %v3966_v26 = vld [vmem:[#allocation3 + $0xa4] sm:$0xf0]  ;;  %v1633_v11 = vpop.permute.xlu2 %1632  ;;  %v3902_v52 = vxor.u32 2147483648, %v3237_v40 }
 0x34a   : >> { %v2677_v56 = vadd.f32 %v5668_v42, %v2588_v53  ;;  %v2763_v42 = vpack.c.bf16 %v2744_v1, %v2743_v14  ;;  %v2706_v17 = vpop.f32.mrf.mxu1  ;;  %v2916_v14 = vmul.u32 2654435769, %v6104_v37  ;;  %v2917_v40 = vmul.u32 2654435769, %v6105_v50 }
 0x34b   : >> { %v2846_v30 = vpop.f32.mrf.mxu2  ;;  %v2707_v31 = vadd.f32 %v2706_v17, %v2618_v38 }
 0x34c   : >> { %v2734_v43 = vmax.f32 %v2677_v56, 0.0  ;;  %v3428_v41 = vsel %vm3288_vm12, %v2846_v30, 0.0  ;;  %v2705_v56 = vadd.f32 %v2704_v5, %v2616_v23  ;;  %v3462_v5 = vld [vmem:[#allocation2 + $0x99] sm:$0xff] }
 0x34d   : >> { %v3492_v2 = vadd.f32 %v3460_v57, %v3428_v41  ;;  %v3461_v57 = vld [vmem:[#allocation2 + $0x91] sm:$0xff]  ;;  %v2746_v30 = vmax.f32 %v2707_v31, 0.0 }
 0x34e   : >> { %v2758_v32 = vpack.c.bf16 %v2734_v43, %v2733_v36  ;;  %v1410_v58 = vpop.permute.xlu1 %1409  ;;  %v3903_v43 = vxor.u32 2147483648, %v3238_v55  ;;  %v2745_v41 = vmax.f32 %v2705_v56, 0.0  ;;  %v3555_v7 = vld [vmem:[#allocation2 + $0x79] sm:$0xff] (%p403_p4) }
 0x34f   : >> { %3524 = vst.msk [vmem:[#allocation2 + $0x81] sm:$0xff] %vm209_vm0, %v3492_v2  ;;  %v960_v60 = vpop.permute.xlu0 %959  ;;  %v3762_v51 = vld [vmem:[#allocation3 + $0xa0] sm:$0xf] }
 0x350   : >> { %1033 = vst.msk [vmem:[#allocation3 + $0xb8] sm:$0xf] %vm1009_vm5, %v960_v60  ;;  %2858 = vmatmul.bf16.gmra.mxu2 %v2758_v32  ;;  %v3763_v61 = vor.u32 %v3966_v26, %v3762_v51  ;;  %vm3291_vm5 = vcmp.gt.s32.totalorder %v3902_v52, 0  ;;  %v2764_v48 = vpack.c.bf16 %v2746_v30, %v2745_v41  ;;  %v2949_v51 = vadd.s32 %v5549_v63, %v2916_v14 }
 0x351   : >> { %1258 = vst.msk [vmem:[#allocation3 + $0xb8] sm:$0xf] %vm1234_vm6, %v1185_v62  ;;  %v1860_v39 = vpop.permute.xlu2 %1859  ;;  %vm3294_vm6 = vcmp.gt.s32.totalorder %v3903_v43, 0 }
 0x352   : >> { %2599 = vmatmul.bf16.gmra.mxu0 %v3763_v61  ;;  %2883 = vmatmul.bf16.vlgmr.msra.gmra.mxu3 %v2763_v42  ;;  %1483 = vst.msk [vmem:[#allocation3 + $0xb8] sm:$0xf] %vm1459_vm7, %v1410_v58  ;;  %v2983_v61 = vadd.s32 %v5557_v54, %v2949_v51 }
 0x353   : > { %3587 = vst.msk [vmem:[%s4417_s28 + $0x40] sm:$0xff] (%p403_p4), %vm209_vm0, %v3555_v7 }
 0x354   : >> { %v3015_v38 = vshrl.u32 %v2983_v61, 16 }
 0x356   : >> { %v1858_v53 = vpop.permute.xlu1 %1857  ;;  %v3047_v59 = vxor.u32 %v3015_v38, %v2983_v61  ;;  %v3464_v38 = vld [vmem:[#allocation2 + $0xb1] sm:$0xff]  ;;  %v3556_v9 = vld [vmem:[#allocation2 + $0x81] sm:$0xff] (%p403_p4) }
 0x357   : >> { %v1408_v45 = vpop.permute.xlu0 %1407  ;;  %3588 = vst.msk [vmem:[%s4417_s28 + $0x48] sm:$0xff] (%p403_p4), %vm209_vm0, %v3556_v9 }
 0x358   : >> { %1482 = vst.msk [vmem:[#allocation3 + $0xb0] sm:$0xf] %vm1459_vm7, %v1408_v45 }
 0x359   : >> { %1707 = vst.msk [vmem:[#allocation3 + $0xb0] sm:$0xf] %vm1684_vm8, %v1633_v11  ;;  %v2950_v11 = vadd.s32 %v5549_v63, %v2917_v40 }
 0x35a   : >> { %1932 = vst.msk [vmem:[#allocation3 + $0xb0] sm:$0xf] %vm1909_vm9, %v1858_v53  ;;  %v3079_v53 = vmul.u32 2146121005, %v3047_v59 }
 0x35b   : >> { %v2849_v62 = vpop.f32.mrf.mxu2  ;;  %v2984_v23 = vadd.s32 %v5557_v54, %v2950_v11 }
 0x35c   : >> { %v3429_v1 = vsel %vm3291_vm5, %v2849_v62, 0.0  ;;  %v3111_v55 = vshrl.u32 %v3079_v53, 15 }
 0x35d   : >> { %v3493_v36 = vadd.f32 %v3461_v57, %v3429_v1  ;;  %v3016_v45 = vshrl.u32 %v2984_v23, 16 }
 0x35e   : >> { %v2085_v26 = vpop.permute.xlu1 %2084  ;;  %v3143_v62 = vxor.u32 %v3111_v55, %v3079_v53  ;;  %v2620_v61 = vpop.f32.mrf.mxu3 }
 0x35f   : >> { %3525 = vst.msk [vmem:[#allocation2 + $0x91] sm:$0xff] %vm209_vm0, %v3493_v36  ;;  %v1635_v2 = vpop.permute.xlu0 %1634  ;;  %v3048_v56 = vxor.u32 %v3016_v45, %v2984_v23  ;;  %v6106_v23 = vld [vmem:[#allocation31_spill] sm:$0xff]  ;;  %v6107_v45 = vld [vmem:[#allocation48_spill] sm:$0xff] }
 0x360   : >> { %1708 = vst.msk [vmem:[#allocation3 + $0xb8] sm:$0xf] %vm1684_vm8, %v1635_v2  ;;  %v2918_v53 = vmul.u32 2654435769, %v6106_v23 }
 0x361   : >> { %1933 = vst.msk [vmem:[#allocation3 + $0xb8] sm:$0xf] %vm1909_vm9, %v1860_v39  ;;  %v3080_v30 = vmul.u32 2146121005, %v3048_v56  ;;  %v3175_v39 = vmul.u32 2221713035, %v3143_v62 }
 0x362   : >> { %2888 = vmatmul.bf16.gmra.mxu3 %v2764_v48  ;;  %2158 = vst.msk [vmem:[#allocation3 + $0xb8] sm:$0xf] %vm2134_vm10, %v2085_v26  ;;  %v2951_v56 = vadd.s32 %v5549_v63, %v2918_v53  ;;  %v2621_v53 = vadd.f32 %v6089_v0, %v2620_v61 }
 0x363   : >> { %v2851_v32 = vpop.f32.mrf.mxu2  ;;  %v3112_v2 = vshrl.u32 %v3080_v30, 15  ;;  %v3207_v37 = vshrl.u32 %v3175_v39, 16 }
 0x364   : >> { %v3430_v58 = vsel %vm3294_vm6, %v2851_v32, 0.0  ;;  %v2985_v62 = vadd.s32 %v5557_v54, %v2951_v56 }
 0x365   : >> { %v3494_v60 = vadd.f32 %v3462_v5, %v3430_v58  ;;  %v3144_v14 = vxor.u32 %v3112_v2, %v3080_v30  ;;  %v3239_v32 = vxor.u32 %v3207_v37, %v3175_v39  ;;  %v6108_v30 = vld [vmem:[#allocation34_spill] sm:$0xff] }
 0x366   : >> { %v3017_v2 = vshrl.u32 %v2985_v62, 16  ;;  %v3557_v10 = vld [vmem:[#allocation2 + $0x91] sm:$0xff] (%p403_p4) }
 0x367   : >> { %3526 = vst.msk [vmem:[#allocation2 + $0x99] sm:$0xff] %vm209_vm0, %v3494_v60  ;;  %v2083_v42 = vpop.permute.xlu0 %2082  ;;  %v3176_v58 = vmul.u32 2221713035, %v3144_v14  ;;  %v3904_v60 = vxor.u32 2147483648, %v3239_v32 }
 0x368   : >> { %2157 = vst.msk [vmem:[#allocation3 + $0xb0] sm:$0xf] %vm2134_vm10, %v2083_v42  ;;  %v3049_v14 = vxor.u32 %v3017_v2, %v2985_v62 }
 0x369   : >> { %v3968_v47 = vld [vmem:[#allocation3 + $0xb4] sm:$0xf0]  ;;  %v3208_v51 = vshrl.u32 %v3176_v58, 16  ;;  %vm3297_vm7 = vcmp.gt.s32.totalorder %v3904_v60, 0  ;;  %3589 = vst.msk [vmem:[%s4417_s28 + $0x50] sm:$0xff] (%p403_p4), %vm209_vm0, %v3557_v10 }
 0x36b   : >> { %v3240_v42 = vxor.u32 %v3208_v51, %v3176_v58  ;;  %v6110_v51 = vld [vmem:[#allocation50_spill] sm:$0xff] }
 0x36e   : > { %v3558_v12 = vld [vmem:[#allocation2 + $0x99] sm:$0xff] (%p403_p4) }
 0x36f   : >> { %v3770_v17 = vld [vmem:[#allocation3 + $0xb0] sm:$0xf]  ;;  %3590 = vst.msk [vmem:[%s4417_s28 + $0x58] sm:$0xff] (%p403_p4), %vm209_vm0, %v3558_v12 }
 0x370   : >> { %v3771_v52 = vor.u32 %v3968_v47, %v3770_v17  ;;  %v2622_v17 = vpop.f32.mrf.mxu3 }
 0x372   : >> { %2604 = vmatmul.bf16.gmra.mxu0 %v3771_v52 }
 0x377   : >> { %v2590_v31 = vpop.f32.mrf.mxu0 }
 0x378   : >> { %v2591_v57 = vadd.f32 %v6089_v0, %v2590_v31  ;;  %v2928_v31 = vmul.u32 2654435769, %v6107_v45 }
 0x37a   : >> { %v2680_v36 = vadd.f32 %v5685_v44, %v2591_v57  ;;  %v3463_v44 = vld [vmem:[#allocation2 + $0xa9] sm:$0xff]  ;;  %v2961_v57 = vadd.s32 %v5549_v63, %v2928_v31 }
 0x37c   : >> { %v2735_v26 = vmax.f32 %v2680_v36, 0.0  ;;  %v2995_v36 = vadd.s32 %v5557_v54, %v2961_v57 }
 0x37f   : >> { %v2592_v1 = vpop.f32.mrf.mxu0 }
 0x380   : >> { %v2593_v43 = vadd.f32 %v6089_v0, %v2592_v1  ;;  %v2919_v1 = vmul.u32 2654435769, %v6108_v30  ;;  %v6111_v30 = vld [vmem:[#allocation51_spill] sm:$0xff] }
 0x382   : >> { %v2682_v41 = vadd.f32 %v5703_v20, %v2593_v43  ;;  %v3905_v20 = vxor.u32 2147483648, %v3240_v42  ;;  %v6109_v43 = vld [vmem:[#allocation49_spill] sm:$0xff]  ;;  %v2930_v42 = vmul.u32 2654435769, %v6110_v51 }
 0x384   : >> { %v2736_v48 = vmax.f32 %v2682_v41, 0.0  ;;  %vm3300_vm8 = vcmp.gt.s32.totalorder %v3905_v20, 0  ;;  %v2929_v41 = vmul.u32 2654435769, %v6109_v43 }
 0x386   : >> { %v2759_v5 = vpack.c.bf16 %v2736_v48, %v2735_v26  ;;  %v2952_v26 = vadd.s32 %v5549_v63, %v2919_v1  ;;  %v3027_v48 = vshrl.u32 %v2995_v36, 16  ;;  %v2931_v1 = vmul.u32 2654435769, %v6111_v30 }
 0x388   : >> { %2863 = vmatmul.bf16.gmra.mxu2 %v2759_v5  ;;  %v2962_v5 = vadd.s32 %v5549_v63, %v2929_v41  ;;  %v2986_v32 = vadd.s32 %v5557_v54, %v2952_v26  ;;  %v3059_v58 = vxor.u32 %v3027_v48, %v2995_v36  ;;  %v2623_v36 = vadd.f32 %v6089_v0, %v2622_v17 }
 0x38a   : >> { %v2996_v60 = vadd.s32 %v5557_v54, %v2962_v5  ;;  %v3091_v20 = vmul.u32 2146121005, %v3059_v58  ;;  %v2964_v58 = vadd.s32 %v5549_v63, %v2931_v1 }
 0x38c   : >> { %v3123_v56 = vshrl.u32 %v3091_v20, 15 }
 0x394   : >> { %v2854_v50 = vpop.f32.mrf.mxu2 }
 0x395   : >> { %v3431_v40 = vsel %vm3297_vm7, %v2854_v50, 0.0  ;;  %v3081_v50 = vmul.u32 2146121005, %v3049_v14 }
 0x396   : >> { %v3495_v47 = vadd.f32 %v3463_v44, %v3431_v40  ;;  %v3018_v40 = vshrl.u32 %v2986_v32, 16 }
 0x398   : >> { %3527 = vst.msk [vmem:[#allocation2 + $0xa9] sm:$0xff] %vm209_vm0, %v3495_v47  ;;  %v3050_v23 = vxor.u32 %v3018_v40, %v2986_v32 }
 0x39a   : >> { %v3082_v48 = vmul.u32 2146121005, %v3050_v23 }
 0x39c   : >> { %v2856_v11 = vpop.f32.mrf.mxu2 }
 0x39d   : >> { %v3432_v52 = vsel %vm3300_vm8, %v2856_v11, 0.0  ;;  %v2963_v11 = vadd.s32 %v5549_v63, %v2930_v42 }
 0x39e   : >> { %v3496_v59 = vadd.f32 %v3464_v38, %v3432_v52  ;;  %v3028_v38 = vshrl.u32 %v2996_v60, 16 }
 0x39f   : >> { %v2997_v62 = vadd.s32 %v5557_v54, %v2963_v11  ;;  %v3559_v13 = vld [vmem:[#allocation2 + $0xa9] sm:$0xff] (%p403_p4) }
 0x3a0   : >> { %3528 = vst.msk [vmem:[#allocation2 + $0xb1] sm:$0xff] %vm209_vm0, %v3496_v59  ;;  %v3113_v59 = vshrl.u32 %v3081_v50, 15  ;;  %v3060_v57 = vxor.u32 %v3028_v38, %v2996_v60 }
 0x3a1   : >> { %v3029_v32 = vshrl.u32 %v2997_v62, 16  ;;  %3591 = vst.msk [vmem:[%s4417_s28 + $0x60] sm:$0xff] (%p403_p4), %vm209_vm0, %v3559_v13 }
 0x3a2   : >> { %v3145_v26 = vxor.u32 %v3113_v59, %v3081_v50  ;;  %v3092_v14 = vmul.u32 2146121005, %v3060_v57  ;;  %v2998_v50 = vadd.s32 %v5557_v54, %v2964_v58 }
 0x3a3   : >> { %v3061_v38 = vxor.u32 %v3029_v32, %v2997_v62 }
 0x3a4   : >> { %v3177_v40 = vmul.u32 2221713035, %v3145_v26 }
 0x3a5   : >> { %v5836_v55 = vpop.f32.mrf.mxu3 }
 0x3a6   : >> { %v2626_v57 = vadd.f32 %v6089_v0, %v5836_v55 }
 0x3a7   : > { %v3560_v15 = vld [vmem:[#allocation2 + $0xb1] sm:$0xff] (%p403_p4) }
 0x3a8   : > { %3592 = vst.msk [vmem:[%s4417_s28 + $0x68] sm:$0xff] (%p403_p4), %vm209_vm0, %v3560_v15 }
 0x3ad   : >> { %v5844_v39 = vpop.f32.mrf.mxu3 }
 0x3ae   : >> { %v2628_v62 = vadd.f32 %v6089_v0, %v5844_v39 }
 0x3b1   : >> { %v2595_v37 = vpop.f32.mrf.mxu0 }
 0x3b2   : >> { %v2596_v47 = vadd.f32 %v6089_v0, %v2595_v37 }
 0x3b4   : >> { %v2685_v45 = vadd.f32 %v5714_v8, %v2596_v47  ;;  %v3155_v8 = vxor.u32 %v3123_v56, %v3091_v20  ;;  %v3114_v47 = vshrl.u32 %v3082_v48, 15 }
 0x3b5   : >> { %v2709_v44 = vpop.f32.mrf.mxu3 }
 0x3b6   : >> { %v2710_v43 = vadd.f32 %v2709_v44, %v2621_v53  ;;  %v2737_v5 = vmax.f32 %v2685_v45, 0.0  ;;  %v3187_v44 = vmul.u32 2221713035, %v3155_v8  ;;  %v3146_v20 = vxor.u32 %v3114_v47, %v3082_v48 }
 0x3b7   : >> { %v3093_v53 = vmul.u32 2146121005, %v3061_v38  ;;  %v3030_v45 = vshrl.u32 %v2998_v50, 16 }
 0x3b8   : >> { %v2747_v60 = vmax.f32 %v2710_v43, 0.0  ;;  %v3219_v59 = vshrl.u32 %v3187_v44, 16  ;;  %v3178_v56 = vmul.u32 2221713035, %v3146_v20 }
 0x3b9   : >> { %v2597_v52 = vpop.f32.mrf.mxu0  ;;  %v3062_v43 = vxor.u32 %v3030_v45, %v2998_v50 }
 0x3ba   : >> { %v2598_v31 = vadd.f32 %v6089_v0, %v2597_v52  ;;  %v3209_v52 = vshrl.u32 %v3177_v40, 16  ;;  %v3251_v30 = vxor.u32 %v3219_v59, %v3187_v44  ;;  %v3210_v48 = vshrl.u32 %v3178_v56, 16 }
 0x3bb   : >> { %v3094_v32 = vmul.u32 2146121005, %v3062_v43 }
 0x3bc   : >> { %v2687_v41 = vadd.f32 %v5727_v33, %v2598_v31  ;;  %v3124_v33 = vshrl.u32 %v3092_v14, 15  ;;  %v3241_v31 = vxor.u32 %v3209_v52, %v3177_v40  ;;  %v3242_v55 = vxor.u32 %v3210_v48, %v3178_v56  ;;  %v3476_v48 = vld [vmem:[#allocation2 + $0x141] sm:$0xff] }
 0x3bd   : >> { %v2711_v2 = vpop.f32.mrf.mxu3 }
 0x3be   : >> { %v2738_v61 = vmax.f32 %v2687_v41, 0.0  ;;  %v2712_v37 = vadd.f32 %v2711_v2, %v2623_v36  ;;  %v3156_v23 = vxor.u32 %v3124_v33, %v3092_v14  ;;  %v3125_v36 = vshrl.u32 %v3093_v53, 15 }
 0x3bf   : >> { %v3906_v26 = vxor.u32 2147483648, %v3241_v31 }
 0x3c0   : >> { %v2748_v51 = vmax.f32 %v2712_v37, 0.0  ;;  %v2760_v42 = vpack.c.bf16 %v2738_v61, %v2737_v5  ;;  %v3188_v1 = vmul.u32 2221713035, %v3156_v23  ;;  %v3916_v37 = vxor.u32 2147483648, %v3251_v30 }
 0x3c1   : >> { %v3157_v14 = vxor.u32 %v3125_v36, %v3093_v53  ;;  %vm3303_vm9 = vcmp.gt.s32.totalorder %v3906_v26, 0  ;;  %v3466_v36 = vld [vmem:[#allocation2 + $0xc9] sm:$0xff] }
 0x3c2   : >> { %2868 = vmatmul.bf16.gmra.mxu2 %v2760_v42  ;;  %v2765_v17 = vpack.c.bf16 %v2748_v51, %v2747_v60  ;;  %v3220_v8 = vshrl.u32 %v3188_v1, 16  ;;  %v3465_v51 = vld [vmem:[#allocation2 + $0xc1] sm:$0xff]  ;;  %vm3333_vm10 = vcmp.gt.s32.totalorder %v3916_v37, 0 }
 0x3c3   : >> { %v3189_v39 = vmul.u32 2221713035, %v3157_v14 }
 0x3c4   : >> { %2893 = vmatmul.bf16.gmra.mxu3 %v2765_v17  ;;  %v3252_v47 = vxor.u32 %v3220_v8, %v3188_v1  ;;  %v3126_v17 = vshrl.u32 %v3094_v32, 15 }
 0x3c5   : >> { %v2714_v11 = vpop.f32.mrf.mxu3  ;;  %v3221_v53 = vshrl.u32 %v3189_v39, 16 }
 0x3c6   : >> { %v2715_v41 = vadd.f32 %v2714_v11, %v2626_v57  ;;  %v3907_v11 = vxor.u32 2147483648, %v3242_v55  ;;  %v3917_v23 = vxor.u32 2147483648, %v3252_v47  ;;  %v3158_v45 = vxor.u32 %v3126_v17, %v3094_v32  ;;  %v6112_v57 = vld [vmem:[#allocation37_spill] sm:$0xff] }
 0x3c7   : >> { %v2920_v30 = vmul.u32 2654435769, %v6112_v57 }
 0x3c8   : >> { %v2749_v58 = vmax.f32 %v2715_v41, 0.0  ;;  %vm3306_vm13 = vcmp.gt.s32.totalorder %v3907_v11, 0  ;;  %vm3336_vm14 = vcmp.gt.s32.totalorder %v3917_v23, 0  ;;  %v3478_v11 = vld [vmem:[#allocation2 + $0x159] sm:$0xff] }
 0x3cd   : >> { %v2716_v2 = vpop.f32.mrf.mxu3 }
 0x3ce   : >> { %v2717_v5 = vadd.f32 %v2716_v2, %v2628_v62  ;;  %v3253_v62 = vxor.u32 %v3221_v53, %v3189_v39 }
 0x3cf   : >> { %v2600_v61 = vpop.f32.mrf.mxu0 }
 0x3d0   : >> { %v2750_v60 = vmax.f32 %v2717_v5, 0.0  ;;  %v2601_v44 = vadd.f32 %v6089_v0, %v2600_v61  ;;  %v2953_v61 = vadd.s32 %v5549_v63, %v2920_v30  ;;  %v3918_v32 = vxor.u32 2147483648, %v3253_v62 }
 0x3d2   : >> { %v2766_v42 = vpack.c.bf16 %v2750_v60, %v2749_v58  ;;  %v2690_v31 = vadd.f32 %v5742_v46, %v2601_v44  ;;  %v2987_v58 = vadd.s32 %v5557_v54, %v2953_v61  ;;  %v6113_v60 = vld [vmem:[#allocation40_spill] sm:$0xff]  ;;  %vm3339_vm15 = vcmp.gt.s32.totalorder %v3918_v32, 0 }
 0x3d3   : >> { %v2859_v40 = vpop.f32.mrf.mxu2  ;;  %v2921_v55 = vmul.u32 2654435769, %v6113_v60 }
 0x3d4   : >> { %v3433_v33 = vsel %vm3303_vm9, %v2859_v40, 0.0  ;;  %2898 = vmatmul.bf16.gmra.mxu3 %v2766_v42  ;;  %v2739_v41 = vmax.f32 %v2690_v31, 0.0  ;;  %v3477_v42 = vld [vmem:[#allocation2 + $0x151] sm:$0xff]  ;;  %v3019_v47 = vshrl.u32 %v2987_v58, 16 }
 0x3d5   : >> { %v3497_v38 = vadd.f32 %v3465_v51, %v3433_v33  ;;  %v2884_v50 = vpop.f32.mrf.mxu3  ;;  %v2954_v39 = vadd.s32 %v5549_v63, %v2921_v55 }
 0x3d6   : >> { %v3443_v52 = vsel %vm3333_vm10, %v2884_v50, 0.0 }
 0x3d7   : >> { %3529 = vst.msk [vmem:[#allocation2 + $0xc1] sm:$0xff] %vm209_vm0, %v3497_v38  ;;  %v3507_v20 = vadd.f32 %v3443_v52, %v5695_v29  ;;  %v2602_v59 = vpop.f32.mrf.mxu0  ;;  %v3190_v29 = vmul.u32 2221713035, %v3158_v45  ;;  %v3051_v38 = vxor.u32 %v3019_v47, %v2987_v58  ;;  %v2988_v50 = vadd.s32 %v5557_v54, %v2954_v39  ;;  %v3467_v58 = vld [vmem:[#allocation2 + $0xd9] sm:$0xff] }
 0x3d8   : >> { %v2603_v56 = vadd.f32 %v6089_v0, %v2602_v59 }
 0x3d9   : >> { %3539 = vst.msk [vmem:[#allocation2 + $0x139] sm:$0xff] %vm209_vm0, %v3507_v20  ;;  %v3083_v20 = vmul.u32 2146121005, %v3051_v38  ;;  %v3020_v59 = vshrl.u32 %v2988_v50, 16 }
 0x3da   : >> { %v2692_v1 = vadd.f32 %v5754_v35, %v2603_v56  ;;  %v3222_v35 = vshrl.u32 %v3190_v29, 16 }
 0x3db   : >> { %v2861_v43 = vpop.f32.mrf.mxu2  ;;  %v3115_v31 = vshrl.u32 %v3083_v20, 15  ;;  %v3052_v56 = vxor.u32 %v3020_v59, %v2988_v50 }
 0x3dc   : >> { %v2740_v2 = vmax.f32 %v2692_v1, 0.0  ;;  %v3434_v26 = vsel %vm3306_vm13, %v2861_v43, 0.0  ;;  %v3254_v51 = vxor.u32 %v3222_v35, %v3190_v29 }
 0x3dd   : >> { %v3498_v5 = vadd.f32 %v3466_v36, %v3434_v26  ;;  %v2886_v46 = vpop.f32.mrf.mxu3  ;;  %v3147_v30 = vxor.u32 %v3115_v31, %v3083_v20  ;;  %v3084_v1 = vmul.u32 2146121005, %v3052_v56 }
 0x3de   : >> { %v3444_v37 = vsel %vm3336_vm14, %v2886_v46, 0.0  ;;  %v2761_v8 = vpack.c.bf16 %v2740_v2, %v2739_v41  ;;  %v3919_v33 = vxor.u32 2147483648, %v3254_v51  ;;  %v3561_v16 = vld [vmem:[#allocation2 + $0xc1] sm:$0xff] (%p403_p4) }
 0x3df   : >> { %3530 = vst.msk [vmem:[#allocation2 + $0xc9] sm:$0xff] %vm209_vm0, %v3498_v5  ;;  %v3508_v14 = vadd.f32 %v3476_v48, %v3444_v37  ;;  %v3179_v29 = vmul.u32 2221713035, %v3147_v30  ;;  %v3116_v41 = vshrl.u32 %v3084_v1, 15 }
 0x3e0   : >> { %2873 = vmatmul.bf16.gmra.mxu2 %v2761_v8  ;;  %vm3342_vm2 = vcmp.gt.s32.totalorder %v3919_v33, 0  ;;  %3593 = vst.msk [vmem:[%s4417_s28 + $0x70] sm:$0xff] (%p403_p4), %vm209_vm0, %v3561_v16 }
 0x3e1   : >> { %3540 = vst.msk [vmem:[#allocation2 + $0x141] sm:$0xff] %vm209_vm0, %v3508_v14  ;;  %v3211_v5 = vshrl.u32 %v3179_v29, 16  ;;  %v3148_v46 = vxor.u32 %v3116_v41, %v3084_v1 }
 0x3e3   : >> { %v3243_v37 = vxor.u32 %v3211_v5, %v3179_v29  ;;  %v3180_v8 = vmul.u32 2221713035, %v3148_v46 }
 0x3e5   : >> { %v2889_v40 = vpop.f32.mrf.mxu3  ;;  %v3908_v14 = vxor.u32 2147483648, %v3243_v37  ;;  %v3212_v32 = vshrl.u32 %v3180_v8, 16  ;;  %v6119_v37 = vld [vmem:[#allocation55_spill] sm:$0xff] }
 0x3e6   : >> { %v3445_v17 = vsel %vm3339_vm15, %v2889_v40, 0.0  ;;  %v6114_v40 = vld [vmem:[#allocation42_spill] sm:$0xff] }
 0x3e7   : >> { %v3509_v44 = vadd.f32 %v3477_v42, %v3445_v17  ;;  %vm3309_vm3 = vcmp.gt.s32.totalorder %v3908_v14, 0  ;;  %v3244_v35 = vxor.u32 %v3212_v32, %v3180_v8  ;;  %v2922_v47 = vmul.u32 2654435769, %v6114_v40  ;;  %v3562_v18 = vld [vmem:[#allocation2 + $0xc9] sm:$0xff] (%p403_p4) }
 0x3e8   : >> { %v2935_v8 = vmul.u32 2654435769, %v6119_v37  ;;  %3594 = vst.msk [vmem:[%s4417_s28 + $0x78] sm:$0xff] (%p403_p4), %vm209_vm0, %v3562_v18 }
 0x3e9   : >> { %3541 = vst.msk [vmem:[#allocation2 + $0x151] sm:$0xff] %vm209_vm0, %v3509_v44  ;;  %v3909_v51 = vxor.u32 2147483648, %v3244_v35  ;;  %v6115_v44 = vld [vmem:[#allocation52_spill] sm:$0xff]  ;;  %v2955_v38 = vadd.s32 %v5549_v63, %v2922_v47 }
 0x3ea   : >> { %v2932_v33 = vmul.u32 2654435769, %v6115_v44 }
 0x3eb   : >> { %vm3312_vm4 = vcmp.gt.s32.totalorder %v3909_v51, 0 }
 0x3ec   : >> { %v2965_v50 = vadd.s32 %v5549_v63, %v2932_v33 }
 0x3ed   : >> { %v2891_v52 = vpop.f32.mrf.mxu3 }
 0x3ee   : >> { %v3446_v23 = vsel %vm3342_vm2, %v2891_v52, 0.0  ;;  %v6116_v52 = vld [vmem:[#allocation43_spill] sm:$0xff]  ;;  %v2999_v59 = vadd.s32 %v5557_v54, %v2965_v50 }
 0x3ef   : >> { %v3510_v53 = vadd.f32 %v3478_v11, %v3446_v23  ;;  %v2605_v45 = vpop.f32.mrf.mxu0  ;;  %v2989_v11 = vadd.s32 %v5557_v54, %v2955_v38  ;;  %v2923_v20 = vmul.u32 2654435769, %v6116_v52  ;;  %v6117_v23 = vld [vmem:[#allocation53_spill] sm:$0xff] }
 0x3f0   : >> { %v2606_v57 = vadd.f32 %v6089_v0, %v2605_v45  ;;  %v3031_v56 = vshrl.u32 %v2999_v59, 16 }
 0x3f1   : >> { %3542 = vst.msk [vmem:[#allocation2 + $0x159] sm:$0xff] %vm209_vm0, %v3510_v53  ;;  %v2933_v53 = vmul.u32 2654435769, %v6117_v23  ;;  %v3021_v45 = vshrl.u32 %v2989_v11, 16  ;;  %v2956_v31 = vadd.s32 %v5549_v63, %v2923_v20 }
 0x3f2   : >> { %v2695_v43 = vadd.f32 %v5765_v49, %v2606_v57 }
 0x3f3   : >> { %v2966_v57 = vadd.s32 %v5549_v63, %v2933_v53  ;;  %v3053_v30 = vxor.u32 %v3021_v45, %v2989_v11  ;;  %v2990_v1 = vadd.s32 %v5557_v54, %v2956_v31  ;;  %v6121_v31 = vld [vmem:[#allocation45_spill] sm:$0xff] }
 0x3f4   : >> { %v2741_v26 = vmax.f32 %v2695_v43, 0.0 }
 0x3f5   : >> { %v3000_v43 = vadd.s32 %v5557_v54, %v2966_v57  ;;  %v3085_v41 = vmul.u32 2146121005, %v3053_v30 }
 0x3f7   : >> { %v2607_v36 = vpop.f32.mrf.mxu0  ;;  %v3117_v46 = vshrl.u32 %v3085_v41, 15 }
 0x3f8   : >> { %v2608_v62 = vadd.f32 %v6089_v0, %v2607_v36  ;;  %v3063_v36 = vxor.u32 %v3031_v56, %v2999_v59  ;;  %v2925_v56 = vmul.u32 2654435769, %v6121_v31 }
 0x3fa   : >> { %v2697_v2 = vadd.f32 %v5776_v34, %v2608_v62  ;;  %v3468_v34 = vld [vmem:[#allocation2 + $0xe1] sm:$0xff] }
 0x3fb   : >> { %v6118_v62 = vld [vmem:[#allocation54_spill] sm:$0xff] }
 0x3fc   : >> { %v2742_v48 = vmax.f32 %v2697_v2, 0.0  ;;  %v2934_v29 = vmul.u32 2654435769, %v6118_v62  ;;  %v3022_v2 = vshrl.u32 %v2990_v1, 16 }
 0x3fe   : >> { %v2762_v61 = vpack.c.bf16 %v2742_v48, %v2741_v26  ;;  %v3095_v26 = vmul.u32 2146121005, %v3063_v36  ;;  %v3032_v48 = vshrl.u32 %v3000_v43, 16  ;;  %v2967_v5 = vadd.s32 %v5549_v63, %v2934_v29 }
 0x400   : >> { %2878 = vmatmul.bf16.gmra.mxu2 %v2762_v61  ;;  %v3054_v61 = vxor.u32 %v3022_v2, %v2990_v1  ;;  %v3127_v14 = vshrl.u32 %v3095_v26, 15  ;;  %v3064_v32 = vxor.u32 %v3032_v48, %v3000_v43  ;;  %v3001_v35 = vadd.s32 %v5557_v54, %v2967_v5 }
 0x402   : >> { %v3033_v40 = vshrl.u32 %v3001_v35, 16 }
 0x404   : >> { %v3065_v50 = vxor.u32 %v3033_v40, %v3001_v35 }
 0x406   : >> { %v3097_v45 = vmul.u32 2146121005, %v3065_v50 }
 0x408   : >> { %v3129_v29 = vshrl.u32 %v3097_v45, 15 }
 0x40a   : >> { %v3161_v37 = vxor.u32 %v3129_v29, %v3097_v45 }
 0x40b   : >> { %v2864_v49 = vpop.f32.mrf.mxu2 }
 0x40c   : >> { %v3435_v60 = vsel %vm3309_vm3, %v2864_v49, 0.0  ;;  %v3086_v49 = vmul.u32 2146121005, %v3054_v61 }
 0x40d   : >> { %v3499_v55 = vadd.f32 %v3467_v58, %v3435_v60  ;;  %v3149_v58 = vxor.u32 %v3117_v46, %v3085_v41  ;;  %v2968_v60 = vadd.s32 %v5549_v63, %v2935_v8  ;;  %v2958_v41 = vadd.s32 %v5549_v63, %v2925_v56 }
 0x40f   : >> { %3531 = vst.msk [vmem:[#allocation2 + $0xd9] sm:$0xff] %vm209_vm0, %v3499_v55  ;;  %v6120_v55 = vld [vmem:[#allocation44_spill] sm:$0xff]  ;;  %v3181_v47 = vmul.u32 2221713035, %v3149_v58  ;;  %v2992_v8 = vadd.s32 %v5557_v54, %v2958_v41 }
 0x410   : >> { %v2924_v51 = vmul.u32 2654435769, %v6120_v55  ;;  %v3193_v55 = vmul.u32 2221713035, %v3161_v37 }
 0x411   : >> { %v3213_v11 = vshrl.u32 %v3181_v47, 16 }
 0x412   : >> { %v2957_v44 = vadd.s32 %v5549_v63, %v2924_v51  ;;  %v3024_v51 = vshrl.u32 %v2992_v8, 16 }
 0x413   : >> { %v2866_v42 = vpop.f32.mrf.mxu2  ;;  %v3245_v57 = vxor.u32 %v3213_v11, %v3181_v47  ;;  %v3225_v11 = vshrl.u32 %v3193_v55, 16 }
 0x414   : >> { %v3436_v39 = vsel %vm3312_vm4, %v2866_v42, 0.0  ;;  %v3096_v42 = vmul.u32 2146121005, %v3064_v32  ;;  %v2991_v59 = vadd.s32 %v5557_v54, %v2957_v44  ;;  %v3469_v32 = vld [vmem:[#allocation2 + $0xf1] sm:$0xff] }
 0x415   : >> { %v3500_v17 = vadd.f32 %v3468_v34, %v3436_v39  ;;  %v3159_v34 = vxor.u32 %v3127_v14, %v3095_v26  ;;  %v3118_v39 = vshrl.u32 %v3086_v49, 15  ;;  %v3910_v2 = vxor.u32 2147483648, %v3245_v57  ;;  %v3480_v57 = vld [vmem:[#allocation2 + $0x171] sm:$0xff] }
 0x416   : >> { %v3128_v38 = vshrl.u32 %v3096_v42, 15  ;;  %v3023_v36 = vshrl.u32 %v2991_v59, 16  ;;  %v3257_v45 = vxor.u32 %v3225_v11, %v3193_v55  ;;  %v3563_v19 = vld [vmem:[#allocation2 + $0xd9] sm:$0xff] (%p403_p4) }
 0x417   : >> { %3532 = vst.msk [vmem:[#allocation2 + $0xe1] sm:$0xff] %vm209_vm0, %v3500_v17  ;;  %v3002_v17 = vadd.s32 %v5557_v54, %v2968_v60  ;;  %v3191_v33 = vmul.u32 2221713035, %v3159_v34  ;;  %v3150_v52 = vxor.u32 %v3118_v39, %v3086_v49  ;;  %vm3315_vm11 = vcmp.gt.s32.totalorder %v3910_v2, 0 }
 0x418   : >> { %v3160_v53 = vxor.u32 %v3128_v38, %v3096_v42  ;;  %v3055_v5 = vxor.u32 %v3023_v36, %v2991_v59  ;;  %v3479_v42 = vld [vmem:[#allocation2 + $0x169] sm:$0xff]  ;;  %v3922_v41 = vxor.u32 2147483648, %v3257_v45  ;;  %3595 = vst.msk [vmem:[%s4417_s28 + $0x80] sm:$0xff] (%p403_p4), %vm209_vm0, %v3563_v19 }
 0x419   : >> { %v3034_v20 = vshrl.u32 %v3002_v17, 16  ;;  %v3223_v23 = vshrl.u32 %v3191_v33, 16  ;;  %v3182_v30 = vmul.u32 2221713035, %v3150_v52  ;;  %v3056_v52 = vxor.u32 %v3024_v51, %v2992_v8  ;;  %v3481_v8 = vld [vmem:[#allocation2 + $0x181] sm:$0xff]  ;;  %v6123_v51 = vld [vmem:[#allocation47_spill] sm:$0xff] }
 0x41a   : >> { %v3192_v62 = vmul.u32 2221713035, %v3160_v53  ;;  %v3087_v58 = vmul.u32 2146121005, %v3055_v5  ;;  %vm3351_vm7 = vcmp.gt.s32.totalorder %v3922_v41, 0 }
 0x41b   : >> { %v3066_v1 = vxor.u32 %v3034_v20, %v3002_v17  ;;  %v3255_v43 = vxor.u32 %v3223_v23, %v3191_v33  ;;  %v3214_v26 = vshrl.u32 %v3182_v30, 16  ;;  %v3470_v20 = vld [vmem:[#allocation2 + $0xf9] sm:$0xff]  ;;  %v3088_v31 = vmul.u32 2146121005, %v3056_v52 }
 0x41c   : >> { %v3224_v61 = vshrl.u32 %v3192_v62, 16  ;;  %v3119_v33 = vshrl.u32 %v3087_v58, 15 }
 0x41d   : >> { %v3098_v48 = vmul.u32 2146121005, %v3066_v1  ;;  %v3920_v46 = vxor.u32 2147483648, %v3255_v43  ;;  %v3246_v14 = vxor.u32 %v3214_v26, %v3182_v30  ;;  %v3120_v2 = vshrl.u32 %v3088_v31, 15  ;;  %v6122_v26 = vld [vmem:[#allocation46_spill] sm:$0xff] }
 0x41e   : >> { %v3256_v60 = vxor.u32 %v3224_v61, %v3192_v62  ;;  %v3151_v23 = vxor.u32 %v3119_v33, %v3087_v58  ;;  %v3564_v21 = vld [vmem:[#allocation2 + $0xe1] sm:$0xff] (%p403_p4) }
 0x41f   : >> { %v3130_v35 = vshrl.u32 %v3098_v48, 15  ;;  %vm3345_vm12 = vcmp.gt.s32.totalorder %v3920_v46, 0  ;;  %v3911_v39 = vxor.u32 2147483648, %v3246_v14  ;;  %v3152_v61 = vxor.u32 %v3120_v2, %v3088_v31  ;;  %3596 = vst.msk [vmem:[%s4417_s28 + $0x88] sm:$0xff] (%p403_p4), %vm209_vm0, %v3564_v21 }
 0x420   : >> { %v3921_v50 = vxor.u32 2147483648, %v3256_v60  ;;  %v3183_v62 = vmul.u32 2221713035, %v3151_v23 }
 0x421   : >> { %v3162_v44 = vxor.u32 %v3130_v35, %v3098_v48  ;;  %vm3318_vm5 = vcmp.gt.s32.totalorder %v3911_v39, 0  ;;  %v2926_v48 = vmul.u32 2654435769, %v6122_v26  ;;  %v3184_v60 = vmul.u32 2221713035, %v3152_v61 }
 0x422   : >> { %vm3348_vm6 = vcmp.gt.s32.totalorder %v3921_v50, 0  ;;  %v3215_v46 = vshrl.u32 %v3183_v62, 16 }
 0x423   : >> { %v3194_v59 = vmul.u32 2221713035, %v3162_v44  ;;  %v2959_v37 = vadd.s32 %v5549_v63, %v2926_v48 }
 0x424   : >> { %v3247_v58 = vxor.u32 %v3215_v46, %v3183_v62 }
 0x425   : >> { %v3226_v43 = vshrl.u32 %v3194_v59, 16  ;;  %v2993_v55 = vadd.s32 %v5557_v54, %v2959_v37 }
 0x427   : >> { %v3258_v5 = vxor.u32 %v3226_v43, %v3194_v59 }
 0x429   : >> { %v3923_v35 = vxor.u32 2147483648, %v3258_v5 }
 0x42b   : >> { %vm3354_vm8 = vcmp.gt.s32.totalorder %v3923_v35, 0 }
 0x445   : >> { %v2869_v49 = vpop.f32.mrf.mxu2 }
 0x446   : >> { %v3437_v34 = vsel %vm3315_vm11, %v2869_v49, 0.0 }
 0x447   : >> { %v3501_v40 = vadd.f32 %v3469_v32, %v3437_v34  ;;  %v2894_v47 = vpop.f32.mrf.mxu3  ;;  %v2927_v34 = vmul.u32 2654435769, %v6123_v51 }
 0x448   : >> { %v3447_v17 = vsel %vm3345_vm12, %v2894_v47, 0.0  ;;  %v3025_v47 = vshrl.u32 %v2993_v55, 16 }
 0x449   : >> { %3533 = vst.msk [vmem:[#allocation2 + $0xf1] sm:$0xff] %vm209_vm0, %v3501_v40  ;;  %v3511_v38 = vadd.f32 %v3479_v42, %v3447_v17  ;;  %v3912_v42 = vxor.u32 2147483648, %v3247_v58  ;;  %v3216_v40 = vshrl.u32 %v3184_v60, 16  ;;  %v2960_v39 = vadd.s32 %v5549_v63, %v2927_v34  ;;  %v3482_v17 = vld [vmem:[#allocation2 + $0x189] sm:$0xff]  ;;  %v3547_v34 = vld [vmem:[#allocation2 + $0x19] sm:$0xff] (%p403_p4) }
 0x44a   : >> { %v3057_v11 = vxor.u32 %v3025_v47, %v2993_v55  ;;  %3579 = vst.msk [vmem:[%s4417_s28] sm:$0xff] (%p403_p4), %vm209_vm0, %v3547_v34  ;;  %v3550_v47 = vld [vmem:[#allocation2 + $0x39] sm:$0xff] (%p403_p4) }
 0x44b   : >> { %3543 = vst.msk [vmem:[#allocation2 + $0x169] sm:$0xff] %vm209_vm0, %v3511_v38  ;;  %vm3321_vm9 = vcmp.gt.s32.totalorder %v3912_v42, 0  ;;  %v3248_v50 = vxor.u32 %v3216_v40, %v3184_v60  ;;  %v2994_v52 = vadd.s32 %v5557_v54, %v2960_v39  ;;  %v3548_v42 = vld [vmem:[#allocation2 + $0x21] sm:$0xff] (%p403_p4)  ;;  %v3549_v40 = vld [vmem:[#allocation2 + $0x31] sm:$0xff] (%p403_p4)  ;;  %v3551_v39 = vld [vmem:[#allocation2 + $0x49] sm:$0xff] (%p403_p4) }
 0x44c   : >> { %v3089_v31 = vmul.u32 2146121005, %v3057_v11  ;;  %3580 = vst.msk [vmem:[%s4417_s28 + $0x8] sm:$0xff] (%p403_p4), %vm209_vm0, %v3548_v42 }
 0x44d   : >> { %v2871_v53 = vpop.f32.mrf.mxu2  ;;  %v3913_v45 = vxor.u32 2147483648, %v3248_v50  ;;  %3581 = vst.msk [vmem:[%s4417_s28 + $0x10] sm:$0xff] (%p403_p4), %vm209_vm0, %v3549_v40 }
 0x44e   : >> { %v3438_v56 = vsel %vm3318_vm5, %v2871_v53, 0.0  ;;  %v3121_v63 = vshrl.u32 %v3089_v31, 15  ;;  %3582 = vst.msk [vmem:[%s4417_s28 + $0x18] sm:$0xff] (%p403_p4), %vm209_vm0, %v3550_v47 }
 0x44f   : >> { %v3502_v30 = vadd.f32 %v3470_v20, %v3438_v56  ;;  %v2896_v1 = vpop.f32.mrf.mxu3  ;;  %v3471_v20 = vld [vmem:[#allocation2 + $0x109] sm:$0xff]  ;;  %v3026_v56 = vshrl.u32 %v2994_v52, 16  ;;  %vm3324_vm10 = vcmp.gt.s32.totalorder %v3913_v45, 0  ;;  %3583 = vst.msk [vmem:[%s4417_s28 + $0x20] sm:$0xff] (%p403_p4), %vm209_vm0, %v3551_v39 }
 0x450   : >> { %v3448_v36 = vsel %vm3348_vm6, %v2896_v1, 0.0  ;;  %v3153_v62 = vxor.u32 %v3121_v63, %v3089_v31  ;;  %v3565_v22 = vld [vmem:[#allocation2 + $0xf1] sm:$0xff] (%p403_p4) }
 0x451   : >> { %3534 = vst.msk [vmem:[#allocation2 + $0xf9] sm:$0xff] %vm209_vm0, %v3502_v30  ;;  %v3512_v29 = vadd.f32 %v3480_v57, %v3448_v36  ;;  %v3058_v57 = vxor.u32 %v3026_v56, %v2994_v52  ;;  %v3472_v30 = vld [vmem:[#allocation2 + $0x111] sm:$0xff] }
 0x452   : > { %3597 = vst.msk [vmem:[%s4417_s28 + $0x90] sm:$0xff] (%p403_p4), %vm209_vm0, %v3565_v22  ;;  %v3575_v50 = vld [vmem:[#allocation2 + $0x169] sm:$0xff] (%p403_p4) }
 0x453   : >> { %3544 = vst.msk [vmem:[#allocation2 + $0x171] sm:$0xff] %vm209_vm0, %v3512_v29  ;;  %v3090_v54 = vmul.u32 2146121005, %v3058_v57  ;;  %v3185_v29 = vmul.u32 2221713035, %v3153_v62 }
 0x454   : > { %3607 = vst.msk [vmem:[%s4417_s28 + $0xe0] sm:$0xff] (%p403_p4), %vm209_vm0, %v3575_v50 }
 0x455   : >> { %v3122_v41 = vshrl.u32 %v3090_v54, 15  ;;  %v3217_v2 = vshrl.u32 %v3185_v29, 16 }
 0x457   : >> { %v2899_v14 = vpop.f32.mrf.mxu3  ;;  %v3154_v26 = vxor.u32 %v3122_v41, %v3090_v54  ;;  %v3249_v48 = vxor.u32 %v3217_v2, %v3185_v29 }
 0x458   : >> { %v3449_v32 = vsel %vm3351_vm7, %v2899_v14, 0.0  ;;  %v3566_v24 = vld [vmem:[#allocation2 + $0xf9] sm:$0xff] (%p403_p4) }
 0x459   : >> { %v3513_v49 = vadd.f32 %v3481_v8, %v3449_v32  ;;  %v3186_v5 = vmul.u32 2221713035, %v3154_v26  ;;  %v3914_v46 = vxor.u32 2147483648, %v3249_v48  ;;  %v3473_v8 = vld [vmem:[#allocation2 + $0x121] sm:$0xff]  ;;  %3598 = vst.msk [vmem:[%s4417_s28 + $0x98] sm:$0xff] (%p403_p4), %vm209_vm0, %v3566_v24 }
 0x45a   : > { %v3576_v11 = vld [vmem:[#allocation2 + $0x171] sm:$0xff] (%p403_p4) }
 0x45b   : >> { %3545 = vst.msk [vmem:[#allocation2 + $0x181] sm:$0xff] %vm209_vm0, %v3513_v49  ;;  %v3218_v61 = vshrl.u32 %v3186_v5, 16  ;;  %vm3327_vm13 = vcmp.gt.s32.totalorder %v3914_v46, 0  ;;  %v3474_v49 = vld [vmem:[#allocation2 + $0x129] sm:$0xff] }
 0x45c   : > { %3608 = vst.msk [vmem:[%s4417_s28 + $0xe8] sm:$0xff] (%p403_p4), %vm209_vm0, %v3576_v11 }
 0x45d   : >> { %v3250_v37 = vxor.u32 %v3218_v61, %v3186_v5 }
 0x45f   : >> { %v2901_v44 = vpop.f32.mrf.mxu3  ;;  %v3915_v58 = vxor.u32 2147483648, %v3250_v37 }
 0x460   : >> { %v3450_v33 = vsel %vm3354_vm8, %v2901_v44, 0.0  ;;  %v3572_v44 = vld [vmem:[#allocation2 + $0x141] sm:$0xff] (%p403_p4) }
 0x461   : >> { %v3514_v38 = vadd.f32 %v3482_v17, %v3450_v33  ;;  %vm3330_vm14 = vcmp.gt.s32.totalorder %v3915_v58, 0  ;;  %v3571_v17 = vld [vmem:[#allocation2 + $0x139] sm:$0xff] (%p403_p4)  ;;  %v3573_v33 = vld [vmem:[#allocation2 + $0x151] sm:$0xff] (%p403_p4)  ;;  %3604 = vst.msk [vmem:[%s4417_s28 + $0xc8] sm:$0xff] (%p403_p4), %vm209_vm0, %v3572_v44 }
 0x462   : > { %3603 = vst.msk [vmem:[%s4417_s28 + $0xc0] sm:$0xff] (%p403_p4), %vm209_vm0, %v3571_v17  ;;  %v3577_v52 = vld [vmem:[#allocation2 + $0x181] sm:$0xff] (%p403_p4) }
 0x463   : >> { %3546 = vst.msk [vmem:[#allocation2 + $0x189] sm:$0xff] %vm209_vm0, %v3514_v38  ;;  %v2874_v59 = vpop.f32.mrf.mxu2  ;;  %v3574_v38 = vld [vmem:[#allocation2 + $0x159] sm:$0xff] (%p403_p4) }
 0x464   : >> { %v3439_v23 = vsel %vm3321_vm9, %v2874_v59, 0.0  ;;  %3605 = vst.msk [vmem:[%s4417_s28 + $0xd0] sm:$0xff] (%p403_p4), %vm209_vm0, %v3573_v33 }
 0x465   : >> { %v3503_v53 = vadd.f32 %v3471_v20, %v3439_v23  ;;  %3606 = vst.msk [vmem:[%s4417_s28 + $0xd8] sm:$0xff] (%p403_p4), %vm209_vm0, %v3574_v38 }
 0x466   : > { %3609 = vst.msk [vmem:[%s4417_s28 + $0xf0] sm:$0xff] (%p403_p4), %vm209_vm0, %v3577_v52 }
 0x467   : >> { %3535 = vst.msk [vmem:[#allocation2 + $0x109] sm:$0xff] %vm209_vm0, %v3503_v53 }
 0x46a   : > { %v3578_v20 = vld [vmem:[#allocation2 + $0x189] sm:$0xff] (%p403_p4) }
 0x46b   : >> { %v2876_v1 = vpop.f32.mrf.mxu2  ;;  %3610 = vst.msk [vmem:[%s4417_s28 + $0xf8] sm:$0xff] (%p403_p4), %vm209_vm0, %v3578_v20 }
 0x46c   : >> { %v3440_v36 = vsel %vm3324_vm10, %v2876_v1, 0.0 }
 0x46d   : >> { %v3504_v43 = vadd.f32 %v3472_v30, %v3440_v36 }
 0x46e   : > { %v3567_v25 = vld [vmem:[#allocation2 + $0x109] sm:$0xff] (%p403_p4) }
 0x46f   : >> { %3536 = vst.msk [vmem:[#allocation2 + $0x111] sm:$0xff] %vm209_vm0, %v3504_v43 }
 0x470   : > { %3599 = vst.msk [vmem:[%s4417_s28 + $0xa0] sm:$0xff] (%p403_p4), %vm209_vm0, %v3567_v25 }
 0x476   : > { %v3568_v27 = vld [vmem:[#allocation2 + $0x111] sm:$0xff] (%p403_p4) }
 0x477   : > { %3600 = vst.msk [vmem:[%s4417_s28 + $0xa8] sm:$0xff] (%p403_p4), %vm209_vm0, %v3568_v27 }
 0x483   : >> { %v2879_v14 = vpop.f32.mrf.mxu2 }
 0x484   : >> { %v3441_v32 = vsel %vm3327_vm13, %v2879_v14, 0.0 }
 0x485   : >> { %v3505_v35 = vadd.f32 %v3473_v8, %v3441_v32 }
 0x487   : >> { %3537 = vst.msk [vmem:[#allocation2 + $0x121] sm:$0xff] %vm209_vm0, %v3505_v35 }
 0x48b   : >> { %v2881_v60 = vpop.f32.mrf.mxu2  ;;  %405 = sbr.rel (!%p403_p4) target bundleno = 153 (0x99), region = 77 }
 0x48c   : >> { %v3442_v55 = vsel %vm3330_vm14, %v2881_v60, 0.0 }
 0x48d   : >> { %v3506_v51 = vadd.f32 %v3474_v49, %v3442_v55 }
 0x48e   : > { %v3569_v28 = vld [vmem:[#allocation2 + $0x121] sm:$0xff] (%p403_p4) }
 0x48f   : >> { %3538 = vst.msk [vmem:[#allocation2 + $0x129] sm:$0xff] %vm209_vm0, %v3506_v51 }
 0x490   : > { %3601 = vst.msk [vmem:[%s4417_s28 + $0xb0] sm:$0xff] %vm209_vm0, %v3569_v28 }
 0x496   : > { %v3570_v0 = vld [vmem:[#allocation2 + $0x129] sm:$0xff] }
 0x497   : > { %3602 = vst.msk [vmem:[%s4417_s28 + $0xb8] sm:$0xff] %vm209_vm0, %v3570_v0 }
 0x498 PF: > { %s23_s22 = sadd.s32 1, %s4044_s22  }
 0x499   : > { %p20_p5 = scmp.ge.s32.totalorder %s23_s22, 4  }
 0x49b   :  { %22 = sbr.rel (!%p20_p5) target bundleno = 7 (0x7), region = 88 }

</bundles_post_ra>
